<compile_context>
chip_gen: v7x
topology: tpu7x:2x2x1
jax: 0.10.0
libtpu: 0.0.40
codegen_flags: <defaults>
</compile_context>

<pallas_src>
import jax
import jax.numpy as jnp
import numpy as np
from jax.experimental import pallas as pl
from jax.experimental.pallas import tpu as pltpu

# static problem sizes fixed by the module's weight shapes
C_IN, H, W = 128, 28, 28
L, G = 32, 4                  # 128 channels = 32 groups of 4
KH, KW, M = 3, 3, 2           # H taps, W taps, inner m dim
C_OUT = 128

PITCH = 32                    # padded rows per W column (28 -> 32, 8/16-aligned)
NCOL_IN = W + 2               # one zero W column each side (the W-unfold padding)
NROWS_IN = NCOL_IN * PITCH    # 960 input-slab rows
KC = KH * C_IN                # 384 contraction width (H tap k folded onto lanes)
S_OUT = W * PITCH             # 896 output-slab rows (rows 28..31 per column junk)

NBLK = 2                      # grid blocks (v7x: one per TensorCore)
BLK = S_OUT // NBLK           # 448 output rows per grid block
CHUNK = 112                   # rows per register-resident accumulator chunk
NCHUNK = BLK // CHUNK         # 4

# TODO(synk): the torch module draws shift_direction = +/-1 at __init__ time via
# random.random(); here it is a static argument (both signs exercised in main).


def _fused_kernel(x_ref, w_ref, o_ref):
    """y_rows[r, :] = sum_j x3[r + j*32, :] @ wcomb[j], chunked over rows.

    x_ref : (960, 384) bf16  H-unfolded, doubly-rolled, zero-padded input slab;
                             rows r = q*32 + s (q = padded W column, s = H row),
                             lanes = k*128 + c (H tap k folded onto lanes).
    w_ref : (3, 384, 128) bf16  fused weights wcomb[j, k*128+c, i].
    o_ref : (448, 128) f32   output rows r = p*32 + o for this grid block.
    """
    base = pl.program_id(0) * BLK
    for c in range(NCHUNK):
        out_lo = c * CHUNK                       # static, 16-aligned
        r0 = pl.multiple_of(base + out_lo, 16)
        r1 = pl.multiple_of(base + out_lo + PITCH, 16)
        r2 = pl.multiple_of(base + out_lo + 2 * PITCH, 16)
        # Uninterrupted dot-accumulation chain (MRB-accumulable on v7x).
        acc = jnp.dot(x_ref[pl.ds(r0, CHUNK), :], w_ref[0],
                      preferred_element_type=jnp.float32)
        acc = acc + jnp.dot(x_ref[pl.ds(r1, CHUNK), :], w_ref[1],
                            preferred_element_type=jnp.float32)
        acc = acc + jnp.dot(x_ref[pl.ds(r2, CHUNK), :], w_ref[2],
                            preferred_element_type=jnp.float32)
        o_ref[pl.ds(out_lo, CHUNK), :] = acc


def prepare_weights(w1, w2):
    """Fold stage 1 (grouped sub-channel contraction) into stage 2 — once, at init."""
    l_of_c = jnp.arange(C_IN) // G                       # group index of each channel
    w1c = w1[:, l_of_c, :, :, :]                         # (i, c, k, j, m)
    wcomb = jnp.einsum('ickjm,ckm->jkci', w1c, w2,
                       precision='highest')              # (j, k, c, i)
    return wcomb.reshape(KW, KC, C_OUT).astype(jnp.bfloat16)


def forward(x, wcomb, shift=1):
    # Both rolls commute with everything up to their respective unfolds.
    xr = jnp.roll(x.reshape(C_IN, H, W).astype(jnp.bfloat16),
                  (shift, shift), axis=(1, 2))
    xt = jnp.transpose(xr, (2, 1, 0))                    # (p, o, c)
    xp = jnp.pad(xt, ((1, 1), (1, 1), (0, 0)))           # (30, 30, c) zero margins
    # H-unfold folded onto the lane axis: lane block k holds rows shifted by k.
    taps = [jnp.pad(xp[:, k:, :], ((0, 0), (0, PITCH - 30 + k), (0, 0)))
            for k in range(KH)]                          # each (30, 32, 128)
    x3 = jnp.concatenate(taps, axis=-1).reshape(NROWS_IN, KC)   # (960, 384) bf16

    out = pl.pallas_call(
        _fused_kernel,
        out_shape=jax.ShapeDtypeStruct((S_OUT, C_OUT), jnp.float32),
        grid=(NBLK,),
        in_specs=[pl.BlockSpec((NROWS_IN, KC), lambda g: (0, 0)),
                  pl.BlockSpec((KW, KC, C_OUT), lambda g: (0, 0, 0))],
        out_specs=pl.BlockSpec((BLK, C_OUT), lambda g: (g, 0)),
        compiler_params=pltpu.CompilerParams(
            dimension_semantics=("parallel",)),
        cost_estimate=pl.CostEstimate(
            flops=2 * S_OUT * KC * C_OUT * KW,
            transcendentals=0,
            bytes_accessed=NROWS_IN * KC * 2 + KW * KC * C_OUT * 2
                           + S_OUT * C_OUT * 4),
    )(x3, wcomb)

    # out[p*32 + o, i] == y[0, i, o, p]  (rows o in [28, 32) of each column are junk)
    y = jnp.transpose(out.reshape(W, PITCH, C_OUT)[:, :H, :], (2, 1, 0))
    return y.reshape(1, C_OUT, H, W)


# ---------------- pure-JAX reference (mirrors the torch ops exactly) --------
def reference(x, w1, w2, shift):
    t3 = jnp.roll(x, shift, axis=2).reshape(1, C_IN, H, W)
    t3p = jnp.pad(t3, ((0, 0), (0, 0), (1, 1), (0, 0)))
    t3u = jnp.stack([t3p[:, :, k:k + H, :] for k in range(KH)], axis=2)     # (1,128,3,28,28)
    t4 = jnp.einsum('ljkmn,jki->ljkmni', t3u, w2, precision='highest')
    t5 = t4.reshape(1, L, G, KH, H, W, M).sum(axis=2)                       # (1,32,3,28,28,2)
    t6 = jnp.roll(t5, shift, axis=4).reshape(1, L * KH * H, W, M)           # (1,2688,28,2)
    t6p = jnp.pad(t6, ((0, 0), (0, 0), (1, 1), (0, 0)))
    t6u = jnp.stack([t6p[:, :, j:j + W, :] for j in range(KW)], axis=2)     # (1,2688,3,28,2)
    t6r = t6u.reshape(1, L, KH, H, KW, W, M)
    return jnp.einsum('nlkojpm,ilkjm->niop', t6r, w1, precision='highest')


if __name__ == "__main__":
    key = jax.random.PRNGKey(0)
    kx, k1, k2 = jax.random.split(key, 3)
    x = jax.random.normal(kx, (1, C_IN, H, W), dtype=jnp.float32)
    w1 = jax.random.normal(k1, (C_OUT, L, KH, KW, M), dtype=jnp.float32)    # weights[0]
    w2 = jax.random.normal(k2, (C_IN, KH, M), dtype=jnp.float32)            # weights[1]

    # Weight folding happens once (init-time), outside the per-call path.
    wcomb = jax.block_until_ready(prepare_weights(w1, w2))

    fwd = jax.jit(forward, static_argnames=("shift",))
    for shift in (1, -1):                 # module picks +/-1 at init; cover both
        y = jax.block_until_ready(fwd(x, wcomb, shift=shift))
        assert y.shape == (1, C_OUT, H, W) and y.dtype == jnp.float32
        y_ref = reference(x, w1, w2, shift)
        # bf16 operands, f32 MXU accumulation; outputs have std ~50 and the
        # bf16 rounding error bound is <~1 absolute, so this is ~2% relative.
        np.testing.assert_allclose(np.asarray(y), np.asarray(y_ref),
                                   rtol=2e-2, atol=2.0)
    print("KERNEL_OK")
</pallas_src>

<mosaic_0001>
module attributes {stable_mosaic.version = 11 : i64} {
  func.func @_fused_kernel(%arg0: i32, %arg1: memref<960x384xbf16, #tpu.memory_space<vmem>>, %arg2: memref<3x384x128xbf16, #tpu.memory_space<vmem>>, %arg3: memref<448x128xf32, #tpu.memory_space<vmem>>) attributes {dimension_semantics = [#tpu.dimension_semantics<parallel>], iteration_bounds = array<i64: 2>, scalar_prefetch = 0 : i64, scratch_operands = 0 : i64, tpu.core_type = #tpu.core_type<tc>, window_params = [{pipeline_mode = #tpu.pipeline_mode<synchronous>, transform_indices = @transform_0, window_bounds = array<i64: 960, 384>}, {pipeline_mode = #tpu.pipeline_mode<synchronous>, transform_indices = @transform_1, window_bounds = array<i64: 3, 384, 128>}, {transform_indices = @transform_2, window_bounds = array<i64: 448, 128>}]} {
    %c448_i32 = arith.constant 448 : i32
    %0 = arith.muli %arg0, %c448_i32 : i32
    %c0_i32 = arith.constant 0 : i32
    %1 = arith.addi %0, %c0_i32 : i32
    %2 = tpu.assume_multiple %1, 16 : i32
    %c0_i32_0 = arith.constant 0 : i32
    %3 = arith.addi %0, %c0_i32_0 : i32
    %c32_i32 = arith.constant 32 : i32
    %4 = arith.addi %3, %c32_i32 : i32
    %5 = tpu.assume_multiple %4, 16 : i32
    %c0_i32_1 = arith.constant 0 : i32
    %6 = arith.addi %0, %c0_i32_1 : i32
    %c64_i32 = arith.constant 64 : i32
    %7 = arith.addi %6, %c64_i32 : i32
    %8 = tpu.assume_multiple %7, 16 : i32
    %9 = arith.index_cast %2 : i32 to index
    %c0 = arith.constant 0 : index
    %10 = vector.load %arg1[%9, %c0] : memref<960x384xbf16, #tpu.memory_space<vmem>>, vector<112x384xbf16>
    %c0_2 = arith.constant 0 : index
    %c0_3 = arith.constant 0 : index
    %c0_4 = arith.constant 0 : index
    %11 = vector.load %arg2[%c0_2, %c0_3, %c0_4] : memref<3x384x128xbf16, #tpu.memory_space<vmem>>, vector<1x384x128xbf16>
    %12 = vector.shape_cast %11 : vector<1x384x128xbf16> to vector<384x128xbf16>
    %cst = arith.constant dense<0.000000e+00> : vector<112x128xf32>
    %13 = tpu.matmul %10, %12, %cst {dimension_numbers = #tpu.dot_dimension_numbers<[1], [0], [0], [1], [0, 0, 1, 1], [], []>} : vector<112x384xbf16>, vector<384x128xbf16>, vector<112x128xf32> -> vector<112x128xf32>
    %14 = arith.index_cast %5 : i32 to index
    %c0_5 = arith.constant 0 : index
    %15 = vector.load %arg1[%14, %c0_5] : memref<960x384xbf16, #tpu.memory_space<vmem>>, vector<112x384xbf16>
    %c1 = arith.constant 1 : index
    %c0_6 = arith.constant 0 : index
    %c0_7 = arith.constant 0 : index
    %16 = vector.load %arg2[%c1, %c0_6, %c0_7] : memref<3x384x128xbf16, #tpu.memory_space<vmem>>, vector<1x384x128xbf16>
    %17 = vector.shape_cast %16 : vector<1x384x128xbf16> to vector<384x128xbf16>
    %cst_8 = arith.constant dense<0.000000e+00> : vector<112x128xf32>
    %18 = tpu.matmul %15, %17, %cst_8 {dimension_numbers = #tpu.dot_dimension_numbers<[1], [0], [0], [1], [0, 0, 1, 1], [], []>} : vector<112x384xbf16>, vector<384x128xbf16>, vector<112x128xf32> -> vector<112x128xf32>
    %19 = arith.addf %13, %18 : vector<112x128xf32>
    %20 = arith.index_cast %8 : i32 to index
    %c0_9 = arith.constant 0 : index
    %21 = vector.load %arg1[%20, %c0_9] : memref<960x384xbf16, #tpu.memory_space<vmem>>, vector<112x384xbf16>
    %c2 = arith.constant 2 : index
    %c0_10 = arith.constant 0 : index
    %c0_11 = arith.constant 0 : index
    %22 = vector.load %arg2[%c2, %c0_10, %c0_11] : memref<3x384x128xbf16, #tpu.memory_space<vmem>>, vector<1x384x128xbf16>
    %23 = vector.shape_cast %22 : vector<1x384x128xbf16> to vector<384x128xbf16>
    %cst_12 = arith.constant dense<0.000000e+00> : vector<112x128xf32>
    %24 = tpu.matmul %21, %23, %cst_12 {dimension_numbers = #tpu.dot_dimension_numbers<[1], [0], [0], [1], [0, 0, 1, 1], [], []>} : vector<112x384xbf16>, vector<384x128xbf16>, vector<112x128xf32> -> vector<112x128xf32>
    %25 = arith.addf %19, %24 : vector<112x128xf32>
    %c0_13 = arith.constant 0 : index
    %c0_14 = arith.constant 0 : index
    %26 = vector.load %arg3[%c0_13, %c0_14] : memref<448x128xf32, #tpu.memory_space<vmem>>, vector<112x128xf32>
    tpu.vector_store %arg3[%c0_13, %c0_14], %25 {strides = array<i32>} : memref<448x128xf32, #tpu.memory_space<vmem>>, vector<112x128xf32>,
    %c112_i32 = arith.constant 112 : i32
    %27 = arith.addi %0, %c112_i32 : i32
    %28 = tpu.assume_multiple %27, 16 : i32
    %c112_i32_15 = arith.constant 112 : i32
    %29 = arith.addi %0, %c112_i32_15 : i32
    %c32_i32_16 = arith.constant 32 : i32
    %30 = arith.addi %29, %c32_i32_16 : i32
    %31 = tpu.assume_multiple %30, 16 : i32
    %c112_i32_17 = arith.constant 112 : i32
    %32 = arith.addi %0, %c112_i32_17 : i32
    %c64_i32_18 = arith.constant 64 : i32
    %33 = arith.addi %32, %c64_i32_18 : i32
    %34 = tpu.assume_multiple %33, 16 : i32
    %35 = arith.index_cast %28 : i32 to index
    %c0_19 = arith.constant 0 : index
    %36 = vector.load %arg1[%35, %c0_19] : memref<960x384xbf16, #tpu.memory_space<vmem>>, vector<112x384xbf16>
    %c0_20 = arith.constant 0 : index
    %c0_21 = arith.constant 0 : index
    %c0_22 = arith.constant 0 : index
    %37 = vector.load %arg2[%c0_20, %c0_21, %c0_22] : memref<3x384x128xbf16, #tpu.memory_space<vmem>>, vector<1x384x128xbf16>
    %38 = vector.shape_cast %37 : vector<1x384x128xbf16> to vector<384x128xbf16>
    %cst_23 = arith.constant dense<0.000000e+00> : vector<112x128xf32>
    %39 = tpu.matmul %36, %38, %cst_23 {dimension_numbers = #tpu.dot_dimension_numbers<[1], [0], [0], [1], [0, 0, 1, 1], [], []>} : vector<112x384xbf16>, vector<384x128xbf16>, vector<112x128xf32> -> vector<112x128xf32>
    %40 = arith.index_cast %31 : i32 to index
    %c0_24 = arith.constant 0 : index
    %41 = vector.load %arg1[%40, %c0_24] : memref<960x384xbf16, #tpu.memory_space<vmem>>, vector<112x384xbf16>
    %c1_25 = arith.constant 1 : index
    %c0_26 = arith.constant 0 : index
    %c0_27 = arith.constant 0 : index
    %42 = vector.load %arg2[%c1_25, %c0_26, %c0_27] : memref<3x384x128xbf16, #tpu.memory_space<vmem>>, vector<1x384x128xbf16>
    %43 = vector.shape_cast %42 : vector<1x384x128xbf16> to vector<384x128xbf16>
    %cst_28 = arith.constant dense<0.000000e+00> : vector<112x128xf32>
    %44 = tpu.matmul %41, %43, %cst_28 {dimension_numbers = #tpu.dot_dimension_numbers<[1], [0], [0], [1], [0, 0, 1, 1], [], []>} : vector<112x384xbf16>, vector<384x128xbf16>, vector<112x128xf32> -> vector<112x128xf32>
    %45 = arith.addf %39, %44 : vector<112x128xf32>
    %46 = arith.index_cast %34 : i32 to index
    %c0_29 = arith.constant 0 : index
    %47 = vector.load %arg1[%46, %c0_29] : memref<960x384xbf16, #tpu.memory_space<vmem>>, vector<112x384xbf16>
    %c2_30 = arith.constant 2 : index
    %c0_31 = arith.constant 0 : index
    %c0_32 = arith.constant 0 : index
    %48 = vector.load %arg2[%c2_30, %c0_31, %c0_32] : memref<3x384x128xbf16, #tpu.memory_space<vmem>>, vector<1x384x128xbf16>
    %49 = vector.shape_cast %48 : vector<1x384x128xbf16> to vector<384x128xbf16>
    %cst_33 = arith.constant dense<0.000000e+00> : vector<112x128xf32>
    %50 = tpu.matmul %47, %49, %cst_33 {dimension_numbers = #tpu.dot_dimension_numbers<[1], [0], [0], [1], [0, 0, 1, 1], [], []>} : vector<112x384xbf16>, vector<384x128xbf16>, vector<112x128xf32> -> vector<112x128xf32>
    %51 = arith.addf %45, %50 : vector<112x128xf32>
    %c112 = arith.constant 112 : index
    %c0_34 = arith.constant 0 : index
    %52 = vector.load %arg3[%c112, %c0_34] : memref<448x128xf32, #tpu.memory_space<vmem>>, vector<112x128xf32>
    tpu.vector_store %arg3[%c112, %c0_34], %51 {strides = array<i32>} : memref<448x128xf32, #tpu.memory_space<vmem>>, vector<112x128xf32>,
    %c224_i32 = arith.constant 224 : i32
    %53 = arith.addi %0, %c224_i32 : i32
    %54 = tpu.assume_multiple %53, 16 : i32
    %c224_i32_35 = arith.constant 224 : i32
    %55 = arith.addi %0, %c224_i32_35 : i32
    %c32_i32_36 = arith.constant 32 : i32
    %56 = arith.addi %55, %c32_i32_36 : i32
    %57 = tpu.assume_multiple %56, 16 : i32
    %c224_i32_37 = arith.constant 224 : i32
    %58 = arith.addi %0, %c224_i32_37 : i32
    %c64_i32_38 = arith.constant 64 : i32
    %59 = arith.addi %58, %c64_i32_38 : i32
    %60 = tpu.assume_multiple %59, 16 : i32
    %61 = arith.index_cast %54 : i32 to index
    %c0_39 = arith.constant 0 : index
    %62 = vector.load %arg1[%61, %c0_39] : memref<960x384xbf16, #tpu.memory_space<vmem>>, vector<112x384xbf16>
    %c0_40 = arith.constant 0 : index
    %c0_41 = arith.constant 0 : index
    %c0_42 = arith.constant 0 : index
    %63 = vector.load %arg2[%c0_40, %c0_41, %c0_42] : memref<3x384x128xbf16, #tpu.memory_space<vmem>>, vector<1x384x128xbf16>
    %64 = vector.shape_cast %63 : vector<1x384x128xbf16> to vector<384x128xbf16>
    %cst_43 = arith.constant dense<0.000000e+00> : vector<112x128xf32>
    %65 = tpu.matmul %62, %64, %cst_43 {dimension_numbers = #tpu.dot_dimension_numbers<[1], [0], [0], [1], [0, 0, 1, 1], [], []>} : vector<112x384xbf16>, vector<384x128xbf16>, vector<112x128xf32> -> vector<112x128xf32>
    %66 = arith.index_cast %57 : i32 to index
    %c0_44 = arith.constant 0 : index
    %67 = vector.load %arg1[%66, %c0_44] : memref<960x384xbf16, #tpu.memory_space<vmem>>, vector<112x384xbf16>
    %c1_45 = arith.constant 1 : index
    %c0_46 = arith.constant 0 : index
    %c0_47 = arith.constant 0 : index
    %68 = vector.load %arg2[%c1_45, %c0_46, %c0_47] : memref<3x384x128xbf16, #tpu.memory_space<vmem>>, vector<1x384x128xbf16>
    %69 = vector.shape_cast %68 : vector<1x384x128xbf16> to vector<384x128xbf16>
    %cst_48 = arith.constant dense<0.000000e+00> : vector<112x128xf32>
    %70 = tpu.matmul %67, %69, %cst_48 {dimension_numbers = #tpu.dot_dimension_numbers<[1], [0], [0], [1], [0, 0, 1, 1], [], []>} : vector<112x384xbf16>, vector<384x128xbf16>, vector<112x128xf32> -> vector<112x128xf32>
    %71 = arith.addf %65, %70 : vector<112x128xf32>
    %72 = arith.index_cast %60 : i32 to index
    %c0_49 = arith.constant 0 : index
    %73 = vector.load %arg1[%72, %c0_49] : memref<960x384xbf16, #tpu.memory_space<vmem>>, vector<112x384xbf16>
    %c2_50 = arith.constant 2 : index
    %c0_51 = arith.constant 0 : index
    %c0_52 = arith.constant 0 : index
    %74 = vector.load %arg2[%c2_50, %c0_51, %c0_52] : memref<3x384x128xbf16, #tpu.memory_space<vmem>>, vector<1x384x128xbf16>
    %75 = vector.shape_cast %74 : vector<1x384x128xbf16> to vector<384x128xbf16>
    %cst_53 = arith.constant dense<0.000000e+00> : vector<112x128xf32>
    %76 = tpu.matmul %73, %75, %cst_53 {dimension_numbers = #tpu.dot_dimension_numbers<[1], [0], [0], [1], [0, 0, 1, 1], [], []>} : vector<112x384xbf16>, vector<384x128xbf16>, vector<112x128xf32> -> vector<112x128xf32>
    %77 = arith.addf %71, %76 : vector<112x128xf32>
    %c224 = arith.constant 224 : index
    %c0_54 = arith.constant 0 : index
    %78 = vector.load %arg3[%c224, %c0_54] : memref<448x128xf32, #tpu.memory_space<vmem>>, vector<112x128xf32>
    tpu.vector_store %arg3[%c224, %c0_54], %77 {strides = array<i32>} : memref<448x128xf32, #tpu.memory_space<vmem>>, vector<112x128xf32>,
    %c336_i32 = arith.constant 336 : i32
    %79 = arith.addi %0, %c336_i32 : i32
    %80 = tpu.assume_multiple %79, 16 : i32
    %c336_i32_55 = arith.constant 336 : i32
    %81 = arith.addi %0, %c336_i32_55 : i32
    %c32_i32_56 = arith.constant 32 : i32
    %82 = arith.addi %81, %c32_i32_56 : i32
    %83 = tpu.assume_multiple %82, 16 : i32
    %c336_i32_57 = arith.constant 336 : i32
    %84 = arith.addi %0, %c336_i32_57 : i32
    %c64_i32_58 = arith.constant 64 : i32
    %85 = arith.addi %84, %c64_i32_58 : i32
    %86 = tpu.assume_multiple %85, 16 : i32
    %87 = arith.index_cast %80 : i32 to index
    %c0_59 = arith.constant 0 : index
    %88 = vector.load %arg1[%87, %c0_59] : memref<960x384xbf16, #tpu.memory_space<vmem>>, vector<112x384xbf16>
    %c0_60 = arith.constant 0 : index
    %c0_61 = arith.constant 0 : index
    %c0_62 = arith.constant 0 : index
    %89 = vector.load %arg2[%c0_60, %c0_61, %c0_62] : memref<3x384x128xbf16, #tpu.memory_space<vmem>>, vector<1x384x128xbf16>
    %90 = vector.shape_cast %89 : vector<1x384x128xbf16> to vector<384x128xbf16>
    %cst_63 = arith.constant dense<0.000000e+00> : vector<112x128xf32>
    %91 = tpu.matmul %88, %90, %cst_63 {dimension_numbers = #tpu.dot_dimension_numbers<[1], [0], [0], [1], [0, 0, 1, 1], [], []>} : vector<112x384xbf16>, vector<384x128xbf16>, vector<112x128xf32> -> vector<112x128xf32>
    %92 = arith.index_cast %83 : i32 to index
    %c0_64 = arith.constant 0 : index
    %93 = vector.load %arg1[%92, %c0_64] : memref<960x384xbf16, #tpu.memory_space<vmem>>, vector<112x384xbf16>
    %c1_65 = arith.constant 1 : index
    %c0_66 = arith.constant 0 : index
    %c0_67 = arith.constant 0 : index
    %94 = vector.load %arg2[%c1_65, %c0_66, %c0_67] : memref<3x384x128xbf16, #tpu.memory_space<vmem>>, vector<1x384x128xbf16>
    %95 = vector.shape_cast %94 : vector<1x384x128xbf16> to vector<384x128xbf16>
    %cst_68 = arith.constant dense<0.000000e+00> : vector<112x128xf32>
    %96 = tpu.matmul %93, %95, %cst_68 {dimension_numbers = #tpu.dot_dimension_numbers<[1], [0], [0], [1], [0, 0, 1, 1], [], []>} : vector<112x384xbf16>, vector<384x128xbf16>, vector<112x128xf32> -> vector<112x128xf32>
    %97 = arith.addf %91, %96 : vector<112x128xf32>
    %98 = arith.index_cast %86 : i32 to index
    %c0_69 = arith.constant 0 : index
    %99 = vector.load %arg1[%98, %c0_69] : memref<960x384xbf16, #tpu.memory_space<vmem>>, vector<112x384xbf16>
    %c2_70 = arith.constant 2 : index
    %c0_71 = arith.constant 0 : index
    %c0_72 = arith.constant 0 : index
    %100 = vector.load %arg2[%c2_70, %c0_71, %c0_72] : memref<3x384x128xbf16, #tpu.memory_space<vmem>>, vector<1x384x128xbf16>
    %101 = vector.shape_cast %100 : vector<1x384x128xbf16> to vector<384x128xbf16>
    %cst_73 = arith.constant dense<0.000000e+00> : vector<112x128xf32>
    %102 = tpu.matmul %99, %101, %cst_73 {dimension_numbers = #tpu.dot_dimension_numbers<[1], [0], [0], [1], [0, 0, 1, 1], [], []>} : vector<112x384xbf16>, vector<384x128xbf16>, vector<112x128xf32> -> vector<112x128xf32>
    %103 = arith.addf %97, %102 : vector<112x128xf32>
    %c336 = arith.constant 336 : index
    %c0_74 = arith.constant 0 : index
    %104 = vector.load %arg3[%c336, %c0_74] : memref<448x128xf32, #tpu.memory_space<vmem>>, vector<112x128xf32>
    tpu.vector_store %arg3[%c336, %c0_74], %103 {strides = array<i32>} : memref<448x128xf32, #tpu.memory_space<vmem>>, vector<112x128xf32>,
    return
  }
  func.func @transform_0(%arg0: i32) -> (i32, i32) {
    %c0_i32 = arith.constant 0 : i32
    %c0_i32_0 = arith.constant 0 : i32
    %c0_i32_1 = arith.constant 0 : i32
    return %c0_i32, %c0_i32_0 : i32, i32
  }
  func.func @transform_1(%arg0: i32) -> (i32, i32, i32) {
    %c0_i32 = arith.constant 0 : i32
    %c0_i32_0 = arith.constant 0 : i32
    %c0_i32_1 = arith.constant 0 : i32
    %c0_i32_2 = arith.constant 0 : i32
    return %c0_i32, %c0_i32_0, %c0_i32_1 : i32, i32, i32
  }
  func.func @transform_2(%arg0: i32) -> (i32, i32) {
    %c0_i32 = arith.constant 0 : i32
    %c0_i32_0 = arith.constant 0 : i32
    return %arg0, %c0_i32 : i32, i32
  }
}

</mosaic_0001>

<bundles_post_ra>
// kernel: forward.1
= control target key start
LH: loop header
LB: loop body
LE: loop exit
PB: predicated region body
PF: predicated region fallthrough
CT: control target
= control target key end

     0   :  { %s9910_s9 = smov 0   ;;  %s11731_s0 = inlined_call_operand.vmem [shape: bf16[960,384], index: 0, kind: input, shape index: {}]   ;;  %s11732_s1 = inlined_call_operand.vmem [shape: bf16[3,384,128], index: 1, kind: input, shape index: {}]   ;;  %s11733_s2 = inlined_call_operand.vmem [shape: f32[896,128], index: 2, kind: output, shape index: {}]  }
   0x1 LB: > { %s6500_s10 = sadd.s32 4294967295, %s9891_s9   ;;  %p6503_p0 = scmp.ge.s32.totalorder %s9891_s9, 1  ;;  %s9891_s9 = sphi %s9910_s9, %s12_s9  }
   0x2   : > { %p102_p1 = scmp.lt.s32.totalorder %s9891_s9, 3 }
   0x4   : > { %p103_p2 = pnand %p6503_p0, %p102_p1 }
   0x5   : > { %v9261_v0 = vld [vmem:[%s11732_s1 + $0x100] sm:$0xff] (!%p103_p2)   ;;  %v9893_v1 = vmov (!%p103_p2), 0.0   ;;  %vm9894_vm0 = vmmov (!%p103_p2), 0   ;;  %v9264_v4 = vld [vmem:[%s11732_s1 + $0x108] sm:$0xff] (!%p103_p2)   ;;  %v9267_v7 = vld [vmem:[%s11732_s1 + $0x110] sm:$0xff] (!%p103_p2)   ;;  %s9952_s29 = smul.u32 (!%p103_p2), 448, %s6500_s10 }
   0x6   : > { %106 = sbr.rel (%p103_p2) target bundleno = 925 (0x39d), region = 28  ;;  %8331 = vmatprep.subr.bf16.mxu1 (!%p103_p2), %v9893_v1  ;;  %v9262_v2 = vld [vmem:[%s11732_s1 + $0x140] sm:$0xff] (!%p103_p2)   ;;  %7455 = vmatprep.subr.bf16.mxu0 (!%p103_p2), %v9261_v0  ;;  %v9265_v5 = vld [vmem:[%s11732_s1 + $0x148] sm:$0xff] (!%p103_p2)   ;;  %v9268_v8 = vld [vmem:[%s11732_s1 + $0x150] sm:$0xff] (!%p103_p2)  }
   0x7   : > { %v9263_v3 = vld [vmem:[%s11732_s1 + $0xc0] sm:$0xff] (!%p103_p2)   ;;  %8347 = vmatprep.mubr.msk.bf16.mxu1 (!%p103_p2), %vm9894_vm0, %v9893_v1  ;;  %8332 = vmatpush3.bf16.msra.mxu1 (!%p103_p2), %v9262_v2  ;;  %v9266_v6 = vld [vmem:[%s11732_s1 + $0xc8] sm:$0xff] (!%p103_p2)   ;;  %v9269_v9 = vld [vmem:[%s11732_s1 + $0xd0] sm:$0xff] (!%p103_p2)   ;;  %s127_s8 = sadd.s32 (!%p103_p2), 32, %s9952_s29  ;;  %s129_s30 = sshra.s32 (!%p103_p2), %s9952_s29, 3 }
   0x8   : > { %7456 = vmatpush3.bf16.msra.mxu0 (!%p103_p2), %v9263_v3  ;;  %8333 = vmatprep.subr.bf16.mxu1 (!%p103_p2), %v9893_v1  ;;  %v9270_v10 = vld [vmem:[%s11732_s1 + $0x118] sm:$0xff] (!%p103_p2)   ;;  %v9273_v13 = vld [vmem:[%s11732_s1 + $0x120] sm:$0xff] (!%p103_p2)   ;;  %s210_s15 = sshra.s32 (!%p103_p2), %s127_s8, 3  ;;  %v9276_v16 = vld [vmem:[%s11732_s1 + $0x128] sm:$0xff] (!%p103_p2)   ;;  %s7443_s6 = smul.u32 (!%p103_p2), 12, %s129_s30 }
   0x9   : > { %7457 = vmatprep.subr.bf16.mxu0 (!%p103_p2), %v9264_v4  ;;  %v9271_v11 = vld [vmem:[%s11732_s1 + $0x158] sm:$0xff] (!%p103_p2)   ;;  %v9274_v14 = vld [vmem:[%s11732_s1 + $0x160] sm:$0xff] (!%p103_p2)   ;;  %s7444_s20 = smul.u32 (!%p103_p2), 12, %s210_s15  ;;  %v9277_v17 = vld [vmem:[%s11732_s1 + $0x168] sm:$0xff] (!%p103_p2)   ;;  %s128_s7 = sadd.s32 (!%p103_p2), 64, %s9952_s29 }
   0xa   : > { %v9272_v12 = vld [vmem:[%s11732_s1 + $0xd8] sm:$0xff] (!%p103_p2)   ;;  %v9275_v15 = vld [vmem:[%s11732_s1 + $0xe0] sm:$0xff] (!%p103_p2)   ;;  %v9278_v18 = vld [vmem:[%s11732_s1 + $0xe8] sm:$0xff] (!%p103_p2)   ;;  %s10114_s17 = scalar_lea.vmem (!%p103_p2), %s11731_s0, %s7443_s6  ;;  %s1160_s14 = sshra.s32 (!%p103_p2), %s128_s7, 3 }
   0xb   : > { %8334 = vmatpush3.bf16.msra.mxu1 (!%p103_p2), %v9265_v5  ;;  %v9279_v19 = vld [vmem:[%s11732_s1 + $0x130] sm:$0xff] (!%p103_p2)   ;;  %s9994_s4 = scalar_lea.vmem (!%p103_p2), %s11731_s0, %s7444_s20  ;;  %v9282_v22 = vld [vmem:[%s11732_s1 + $0x138] sm:$0xff] (!%p103_p2)   ;;  %v9289_v27 = vld [vmem:[%s11732_s1 + $0x40] sm:$0xff] (!%p103_p2)   ;;  %s7445_s18 = smul.u32 (!%p103_p2), 12, %s1160_s14 }
   0xc   : > { %7458 = vmatpush3.bf16.msra.mxu0 (!%p103_p2), %v9266_v6  ;;  %8335 = vmatprep.subr.bf16.mxu1 (!%p103_p2), %v9893_v1  ;;  %v9280_v20 = vld [vmem:[%s11732_s1 + $0x170] sm:$0xff] (!%p103_p2)   ;;  %v9283_v24 = vld [vmem:[%s11732_s1 + $0x178] sm:$0xff] (!%p103_p2)   ;;  %v9285_v26 = vld [vmem:[%s9994_s4] ss:$12 sps:$4 sm:$0xff] (!%p103_p2)   ;;  %s1705_s28 = sadd.s32 (!%p103_p2), 144, %s9952_s29  ;;  %s1706_s19 = sadd.s32 (!%p103_p2), 176, %s9952_s29 }
   0xd   : > { %7459 = vmatprep.subr.bf16.mxu0 %v9267_v7  ;;  %v9281_v21 = vld [vmem:[%s11732_s1 + $0xf0] sm:$0xff]   ;;  %v9284_v25 = vld [vmem:[%s11732_s1 + $0xf8] sm:$0xff]   ;;  %v9290_v29 = vld [vmem:[%s11732_s1] sm:$0xff]   ;;  %s10192_s26 = scalar_lea.vmem %s11731_s0, %s7445_s18  ;;  %s1788_s30 = sshra.s32 %s1705_s28, 3 }
   0xe   : > { %v9287_v23 = vld [vmem:[%s9994_s4 + $0x4] ss:$12 sps:$4 sm:$0xff]   ;;  %v9288_v28 = vld [vmem:[%s9994_s4 + $0x8] ss:$12 sps:$4 sm:$0xff]   ;;  %v9294_v34 = vld [vmem:[%s9994_s4 + $0x20] ss:$12 sps:$4 sm:$0xff]  }
   0xf   : > { %8336 = vmatpush3.bf16.msra.mxu1 %v9268_v8  ;;  %580 = vmatprep.mubr.bf16.mxu0 %v9287_v23  ;;  %v9291_v30 = vld [vmem:[%s11732_s1 + $0x80] sm:$0xff]   ;;  %v9292_v31 = vld [vmem:[%s9994_s4 + $0x1c] ss:$12 sps:$4 sm:$0xff]   ;;  %v9299_v36 = vld [vmem:[%s11732_s1 + $0x50] sm:$0xff]   ;;  %s7447_s3 = smul.u32 12, %s1788_s30  ;;  %s2737_s25 = sshra.s32 %s1706_s19, 3 }
  0x10   : > { %7460 = vmatpush3.bf16.msra.mxu0 %v9269_v9  ;;  %8337 = vmatprep.subr.bf16.mxu1 %v9893_v1  ;;  %v9295_v32 = vld [vmem:[%s11732_s1 + $0x48] sm:$0xff]   ;;  %v9296_v37 = vld [vmem:[%s9994_s4 + $0x18] ss:$12 sps:$4 sm:$0xff]   ;;  %v9300_v38 = vld [vmem:[%s9994_s4 + $0x34] ss:$12 sps:$4 sm:$0xff]   ;;  %s7448_s28 = smul.u32 12, %s2737_s25 }
  0x11   : > { %7461 = vmatprep.subr.bf16.mxu0 %v9270_v10  ;;  %v9297_v33 = vld [vmem:[%s11732_s1 + $0x8] sm:$0xff]   ;;  %v9303_v39 = vld [vmem:[%s11732_s1 + $0x10] sm:$0xff]   ;;  %v9306_v41 = vld [vmem:[%s11732_s1 + $0x58] sm:$0xff]   ;;  %s10270_s12 = scalar_lea.vmem %s11731_s0, %s7447_s3  ;;  %s3280_s7 = sadd.s32 224, %s9952_s29 }
  0x12   : > { %v9298_v35 = vld [vmem:[%s11732_s1 + $0x88] sm:$0xff]   ;;  %v9305_v40 = vld [vmem:[%s11732_s1 + $0x90] sm:$0xff]   ;;  %v9302_v42 = vld [vmem:[%s9994_s4 + $0x38] ss:$12 sps:$4 sm:$0xff]   ;;  %s10471_s15 = scalar_lea.vmem %s11731_s0, %s7448_s28  ;;  %s3283_s8 = sshra.s32 %s3280_s7, 3 }
  0x13   : > { %8338 = vmatpush3.bf16.msra.mxu1 %v9271_v11  ;;  %v9307_v43 = vld [vmem:[%s11732_s1 + $0x18] sm:$0xff]   ;;  %v9313_v46 = vld [vmem:[%s11732_s1 + $0x60] sm:$0xff]   ;;  %v9320_v50 = vld [vmem:[%s11732_s1 + $0x68] sm:$0xff]   ;;  %s3282_s21 = sadd.s32 288, %s9952_s29  ;;  %s4857_s7 = sadd.s32 368, %s9952_s29 }
  0x14   : > { %7462 = vmatpush3.bf16.msra.mxu0 %v9272_v12  ;;  %8339 = vmatprep.subr.bf16.mxu1 %v9893_v1  ;;  %v9304_v44 = vld [vmem:[%s9994_s4 + $0x30] ss:$12 sps:$4 sm:$0xff]   ;;  %v9308_v47 = vld [vmem:[%s9994_s4 + $0x4c] ss:$12 sps:$4 sm:$0xff]   ;;  %v9314_v48 = vld [vmem:[%s11732_s1 + $0x20] sm:$0xff]   ;;  %s4313_s22 = sshra.s32 %s3282_s21, 3 }
  0x15   : > { %7463 = vmatprep.subr.bf16.mxu0 %v9273_v13  ;;  %v9312_v45 = vld [vmem:[%s11732_s1 + $0x98] sm:$0xff]   ;;  %v9319_v49 = vld [vmem:[%s11732_s1 + $0xa0] sm:$0xff]   ;;  %v9321_v51 = vld [vmem:[%s11732_s1 + $0x28] sm:$0xff]   ;;  %s7451_s23 = smul.u32 12, %s4313_s22  ;;  %s4856_s21 = sadd.s32 336, %s9952_s29 }
  0x16   : > { %v9310_v52 = vld [vmem:[%s9994_s4 + $0x50] ss:$12 sps:$4 sm:$0xff]   ;;  %v9311_v53 = vld [vmem:[%s9994_s4 + $0x48] ss:$12 sps:$4 sm:$0xff]   ;;  %v9318_v59 = vld [vmem:[%s9994_s4 + $0x60] ss:$12 sps:$4 sm:$0xff]  }
  0x17   : > { %8340 = vmatpush3.bf16.msra.mxu1 %v9274_v14  ;;  %v9315_v54 = vld [vmem:[%s9994_s4 + $0x64] ss:$12 sps:$4 sm:$0xff]   ;;  %v9326_v55 = vld [vmem:[%s11732_s1 + $0xa8] sm:$0xff]   ;;  %v9334_v62 = vld [vmem:[%s11732_s1 + $0x78] sm:$0xff]   ;;  %s4858_s30 = sadd.s32 400, %s9952_s29 }
  0x18   : > { %7464 = vmatpush3.bf16.msra.mxu0 %v9275_v15  ;;  %8341 = vmatprep.subr.bf16.mxu1 %v9893_v1  ;;  %v9327_v56 = vld [vmem:[%s11732_s1 + $0x70] sm:$0xff]   ;;  %v9322_v61 = vld [vmem:[%s9994_s4 + $0x7c] ss:$12 sps:$4 sm:$0xff]   ;;  %v9341_v2 = vld [vmem:[%s11732_s1 + $0x1c0] sm:$0xff]   ;;  %s5889_s3 = sshra.s32 %s4858_s30, 3 }
  0x19   : > { %7465 = vmatprep.subr.bf16.mxu0 %v9276_v16  ;;  %v9328_v57 = vld [vmem:[%s11732_s1 + $0x30] sm:$0xff]   ;;  %v9335_v63 = vld [vmem:[%s11732_s1 + $0x38] sm:$0xff]   ;;  %v9324_v3 = vld [vmem:[%s9994_s4 + $0x80] ss:$12 sps:$4 sm:$0xff]  }
  0x1a   : > { %v9317_v58 = vld [vmem:[%s9994_s4 + $0x68] ss:$12 sps:$4 sm:$0xff]   ;;  %v9336_v0 = vld [vmem:[%s11732_s1 + $0xb8] sm:$0xff]   ;;  %v9339_v8 = vld [vmem:[%s10114_s17 + $0x4] ss:$12 sps:$4 sm:$0xff]  }
  0x1b   : > { %8342 = vmatpush3.bf16.msra.mxu1 %v9277_v17  ;;  %v9333_v60 = vld [vmem:[%s11732_s1 + $0xb0] sm:$0xff]   ;;  %v9325_v4 = vld [vmem:[%s9994_s4 + $0x78] ss:$12 sps:$4 sm:$0xff]   ;;  %v9337_v9 = vld [vmem:[%s10114_s17] ss:$12 sps:$4 sm:$0xff]  }
  0x1c   : > { %7466 = vmatpush3.bf16.msra.mxu0 %v9278_v18  ;;  %8343 = vmatprep.subr.bf16.mxu1 %v9893_v1  ;;  %v9329_v5 = vld [vmem:[%s9994_s4 + $0x94] ss:$12 sps:$4 sm:$0xff]   ;;  %v9331_v6 = vld [vmem:[%s9994_s4 + $0x98] ss:$12 sps:$4 sm:$0xff]   ;;  %v9332_v7 = vld [vmem:[%s9994_s4 + $0x90] ss:$12 sps:$4 sm:$0xff]   ;;  %s10812_s4 = scalar_lea.vmem %s11731_s0, %s7451_s23 }
  0x1d   : > { %7467 = vmatprep.subr.bf16.mxu0 %v9279_v19  ;;  %v9340_v10 = vld [vmem:[%s10114_s17 + $0x8] ss:$12 sps:$4 sm:$0xff]   ;;  %v9342_v11 = vld [vmem:[%s11732_s1 + $0x180] sm:$0xff]   ;;  %v9358_v23 = vld [vmem:[%s11732_s1 + $0x1d8] sm:$0xff]  }
  0x1e   : > { %v9343_v12 = vld [vmem:[%s11732_s1 + $0x200] sm:$0xff]   ;;  %v9344_v13 = vld [vmem:[%s10114_s17 + $0x1c] ss:$12 sps:$4 sm:$0xff]   ;;  %v9351_v19 = vld [vmem:[%s11732_s1 + $0x1d0] sm:$0xff]  }
  0x1f   : > { %8344 = vmatpush3.bf16.msra.mxu1 %v9280_v20  ;;  %v9347_v14 = vld [vmem:[%s11732_s1 + $0x1c8] sm:$0xff]   ;;  %v9348_v18 = vld [vmem:[%s10114_s17 + $0x18] ss:$12 sps:$4 sm:$0xff]   ;;  %v9352_v20 = vld [vmem:[%s10114_s17 + $0x34] ss:$12 sps:$4 sm:$0xff]  }
  0x20   : > { %7468 = vmatpush3.bf16.msra.mxu0 %v9281_v21  ;;  %8345 = vmatprep.subr.bf16.mxu1 %v9893_v1  ;;  %v9349_v15 = vld [vmem:[%s11732_s1 + $0x188] sm:$0xff]   ;;  %v9355_v21 = vld [vmem:[%s11732_s1 + $0x190] sm:$0xff]  }
  0x21   : > { %7469 = vmatprep.subr.bf16.mxu0 %v9282_v22  ;;  %v9346_v16 = vld [vmem:[%s10114_s17 + $0x20] ss:$12 sps:$4 sm:$0xff]   ;;  %v9357_v22 = vld [vmem:[%s11732_s1 + $0x210] sm:$0xff]  }
  0x22   : > { %v9350_v17 = vld [vmem:[%s11732_s1 + $0x208] sm:$0xff]  }
  0x23   : > { %8346 = vmatpush3.bf16.msra.mxu1 %v9283_v24  ;;  %v9354_v24 = vld [vmem:[%s10114_s17 + $0x38] ss:$12 sps:$4 sm:$0xff]  }
  0x24   : > { %7470 = vmatpush3.bf16.msra.mxu0 %v9284_v25  ;;  %8375 = vmatprep.subr.bf16.mxu1 %v9893_v1  ;;  %v9359_v25 = vld [vmem:[%s11732_s1 + $0x198] sm:$0xff]  }
  0x25   : > { %7528 = vmatprep.subr.bf16.mxu0 %v9289_v27  ;;  %v9365_v27 = vld [vmem:[%s11732_s1 + $0x1e0] sm:$0xff]  }
  0x26   : > { %8348 = vmatmul.mubr.bf16.vlgmr.msra.gmra.mrb[0].mxu1 %v9288_v28  ;;  %v9356_v28 = vld [vmem:[%s10114_s17 + $0x30] ss:$12 sps:$4 sm:$0xff]  }
  0x27   : > { %581 = vmatmul.mubr.bf16.vlgmr.msra.gmra.mrb[0].mxu0 %v9285_v26  ;;  %8351 = vmatprep.mubr.msk.bf16.mxu1 %vm9894_vm0, %v9893_v1  ;;  %v9364_v26 = vld [vmem:[%s11732_s1 + $0x218] sm:$0xff]  }
  0x28   : > { %7529 = vmatpush3.bf16.msra.mxu0 %v9290_v29  ;;  %8376 = vmatpush3.bf16.msra.mxu1 %v9291_v30  ;;  %v9360_v29 = vld [vmem:[%s10114_s17 + $0x4c] ss:$12 sps:$4 sm:$0xff]   ;;  %v9366_v30 = vld [vmem:[%s11732_s1 + $0x1a0] sm:$0xff]  }
  0x29   : > { %588 = vmatprep.mubr.bf16.mxu0 %v9292_v31  ;;  %7530 = vmatprep.subr.bf16.mxu0 %v9295_v32  ;;  %v9371_v31 = vld [vmem:[%s11732_s1 + $0x220] sm:$0xff]   ;;  %v9372_v32 = vld [vmem:[%s11732_s1 + $0x1e8] sm:$0xff]  }
  0x2a   : > { %8377 = vmatprep.subr.bf16.mxu1 %v9893_v1 }
  0x2c   : > { %7531 = vmatpush3.bf16.msra.mxu0 %v9297_v33  ;;  %8378 = vmatpush3.bf16.msra.mxu1 %v9298_v35  ;;  %v9373_v33 = vld [vmem:[%s11732_s1 + $0x1a8] sm:$0xff]  }
  0x2d   : > { %7532 = vmatprep.subr.bf16.mxu0 %v9299_v36  ;;  %8379 = vmatprep.subr.bf16.mxu1 %v9893_v1  ;;  %v9378_v35 = vld [vmem:[%s11732_s1 + $0x228] sm:$0xff]  }
  0x2e   : > { %8352 = vmatmul.mubr.bf16.gmra.mrb[4].mxu1 %v9294_v34  ;;  %v9362_v34 = vld [vmem:[%s10114_s17 + $0x50] ss:$12 sps:$4 sm:$0xff]   ;;  %v9363_v36 = vld [vmem:[%s10114_s17 + $0x48] ss:$12 sps:$4 sm:$0xff]  }
  0x2f   : > { %589 = vmatmul.mubr.bf16.gmra.mrb[4].mxu0 %v9296_v37  ;;  %8355 = vmatprep.mubr.msk.bf16.mxu1 %vm9894_vm0, %v9893_v1  ;;  %v9379_v37 = vld [vmem:[%s11732_s1 + $0x1f0] sm:$0xff]  }
  0x30   : > { %596 = vmatprep.mubr.bf16.mxu0 %v9300_v38  ;;  %7533 = vmatpush3.bf16.msra.mxu0 %v9303_v39  ;;  %v9367_v38 = vld [vmem:[%s10114_s17 + $0x64] ss:$12 sps:$4 sm:$0xff]  }
  0x31   : > { %8380 = vmatpush3.bf16.msra.mxu1 %v9305_v40  ;;  %7534 = vmatprep.subr.bf16.mxu0 %v9306_v41  ;;  %v9380_v39 = vld [vmem:[%s11732_s1 + $0x1b0] sm:$0xff]   ;;  %v9386_v41 = vld [vmem:[%s11732_s1 + $0x1f8] sm:$0xff]  }
  0x32   : > { %8381 = vmatprep.subr.bf16.mxu1 %v9893_v1  ;;  %v9385_v40 = vld [vmem:[%s11732_s1 + $0x230] sm:$0xff]  }
  0x34   : > { %7535 = vmatpush3.bf16.msra.mxu0 %v9307_v43  ;;  %v9388_v43 = vld [vmem:[%s11732_s1 + $0x238] sm:$0xff]  }
  0x35   : > { %8382 = vmatpush3.bf16.msra.mxu1 %v9312_v45  ;;  %7536 = vmatprep.subr.bf16.mxu0 %v9313_v46  ;;  %v9369_v45 = vld [vmem:[%s10114_s17 + $0x68] ss:$12 sps:$4 sm:$0xff]   ;;  %v9370_v46 = vld [vmem:[%s10114_s17 + $0x60] ss:$12 sps:$4 sm:$0xff]  }
  0x36   : > { %8356 = vmatmul.mubr.bf16.gmra.mrb[8].mxu1 %v9302_v42  ;;  %8383 = vmatprep.subr.bf16.mxu1 %v9893_v1  ;;  %v9387_v42 = vld [vmem:[%s11732_s1 + $0x1b8] sm:$0xff]  }
  0x37   : > { %597 = vmatmul.mubr.bf16.gmra.mrb[8].mxu0 %v9304_v44  ;;  %8359 = vmatprep.mubr.msk.bf16.mxu1 %vm9894_vm0, %v9893_v1  ;;  %v9393_v44 = vld [vmem:[%s11732_s1 + $0x100] sm:$0xff]  }
  0x38   : > { %604 = vmatprep.mubr.bf16.mxu0 %v9308_v47  ;;  %7537 = vmatpush3.bf16.msra.mxu0 %v9314_v48  ;;  %v9374_v47 = vld [vmem:[%s10114_s17 + $0x7c] ss:$12 sps:$4 sm:$0xff]   ;;  %v9376_v48 = vld [vmem:[%s10114_s17 + $0x80] ss:$12 sps:$4 sm:$0xff]  }
  0x39   : > { %8384 = vmatpush3.bf16.msra.mxu1 %v9319_v49  ;;  %7538 = vmatprep.subr.bf16.mxu0 %v9320_v50  ;;  %v9377_v49 = vld [vmem:[%s10114_s17 + $0x78] ss:$12 sps:$4 sm:$0xff]   ;;  %v9381_v50 = vld [vmem:[%s10114_s17 + $0x94] ss:$12 sps:$4 sm:$0xff]  }
  0x3a   : > { %8385 = vmatprep.subr.bf16.mxu1 %v9893_v1 }
  0x3c   : > { %7539 = vmatpush3.bf16.msra.mxu0 %v9321_v51  ;;  %v9383_v51 = vld [vmem:[%s10114_s17 + $0x98] ss:$12 sps:$4 sm:$0xff]  }
  0x3d   : > { %8386 = vmatpush3.bf16.msra.mxu1 %v9326_v55  ;;  %7540 = vmatprep.subr.bf16.mxu0 %v9327_v56  ;;  %v9392_v55 = vld [vmem:[%s10192_s26 + $0x8] ss:$12 sps:$4 sm:$0xff]   ;;  %v9394_v56 = vld [vmem:[%s11732_s1 + $0xc0] sm:$0xff]  }
  0x3e   : > { %8360 = vmatmul.mubr.bf16.gmra.mrb[12].mxu1 %v9310_v52  ;;  %8387 = vmatprep.subr.bf16.mxu1 %v9893_v1  ;;  %v9384_v52 = vld [vmem:[%s10114_s17 + $0x90] ss:$12 sps:$4 sm:$0xff]   ;;  %s1704_s17 = sadd.s32 112, %s9952_s29 }
  0x3f   : > { %605 = vmatmul.mubr.bf16.gmra.mrb[12].mxu0 %v9311_v53  ;;  %8363 = vmatprep.mubr.msk.bf16.mxu1 %vm9894_vm0, %v9893_v1  ;;  %v9391_v53 = vld [vmem:[%s10192_s26 + $0x4] ss:$12 sps:$4 sm:$0xff]   ;;  %s1707_s11 = sshra.s32 %s1704_s17, 3  ;;  %s7449_s17 = smul.u32 12, %s3283_s8 }
  0x40   : > { %612 = vmatprep.mubr.bf16.mxu0 %v9315_v54  ;;  %7541 = vmatpush3.bf16.msra.mxu0 %v9328_v57  ;;  %v9389_v54 = vld [vmem:[%s10192_s26] ss:$12 sps:$4 sm:$0xff]   ;;  %s7446_s13 = smul.u32 12, %s1707_s11  ;;  %s4940_s8 = sshra.s32 %s4857_s7, 3 }
  0x41   : > { %8388 = vmatpush3.bf16.msra.mxu1 %v9333_v60  ;;  %7542 = vmatprep.subr.bf16.mxu0 %v9334_v62  ;;  %v9395_v57 = vld [vmem:[%s11732_s1 + $0x140] sm:$0xff]   ;;  %v9401_v60 = vld [vmem:[%s11732_s1 + $0xc8] sm:$0xff]  }
  0x42   : > { %8389 = vmatprep.subr.bf16.mxu1 %v9893_v1  ;;  %v9402_v62 = vld [vmem:[%s11732_s1 + $0x148] sm:$0xff]   ;;  %s10375_s16 = scalar_lea.vmem %s11731_s0, %s7446_s13 }
  0x44   : > { %7543 = vmatpush3.bf16.msra.mxu0 %v9335_v63  ;;  %v9403_v63 = vld [vmem:[%s11732_s1 + $0x110] sm:$0xff]  }
  0x45   : > { %8390 = vmatpush3.bf16.msra.mxu1 %v9336_v0  ;;  %7601 = vmatprep.subr.bf16.mxu0 %v9341_v2  ;;  %v9400_v0 = vld [vmem:[%s10192_s26 + $0x18] ss:$12 sps:$4 sm:$0xff]   ;;  %v9404_v2 = vld [vmem:[%s10192_s26 + $0x34] ss:$12 sps:$4 sm:$0xff]  }
  0x46   : > { %8364 = vmatmul.mubr.bf16.gmra.mrb[16].mxu1 %v9317_v58  ;;  %8419 = vmatprep.subr.bf16.mxu1 %v9893_v1  ;;  %v9396_v58 = vld [vmem:[%s10192_s26 + $0x1c] ss:$12 sps:$4 sm:$0xff]  }
  0x47   : > { %613 = vmatmul.mubr.bf16.gmra.mrb[16].mxu0 %v9318_v59  ;;  %8367 = vmatprep.mubr.msk.bf16.mxu1 %vm9894_vm0, %v9893_v1  ;;  %v9399_v59 = vld [vmem:[%s11732_s1 + $0x108] sm:$0xff]  }
  0x48   : > { %620 = vmatprep.mubr.bf16.mxu0 %v9322_v61  ;;  %v9398_v61 = vld [vmem:[%s10192_s26 + $0x20] ss:$12 sps:$4 sm:$0xff]  }
  0x4e   : > { %8368 = vmatmul.mubr.bf16.gmra.mrb[20].mxu1 %v9324_v3  ;;  %v9407_v3 = vld [vmem:[%s11732_s1 + $0xd0] sm:$0xff]  }
  0x4f   : > { %621 = vmatmul.mubr.bf16.gmra.mrb[20].mxu0 %v9325_v4  ;;  %8371 = vmatprep.mubr.msk.bf16.mxu1 %vm9894_vm0, %v9893_v1  ;;  %v9409_v4 = vld [vmem:[%s11732_s1 + $0x150] sm:$0xff]  }
  0x50   : > { %628 = vmatprep.mubr.bf16.mxu0 %v9329_v5  ;;  %v9410_v5 = vld [vmem:[%s11732_s1 + $0x118] sm:$0xff]  }
  0x56   : > { %8372 = vmatmul.mubr.bf16.gmra.mrb[24].mxu1 %v9331_v6  ;;  %v9411_v6 = vld [vmem:[%s11732_s1 + $0xd8] sm:$0xff]  }
  0x57   : > { %629 = vmatmul.mubr.bf16.gmra.mrb[24].mxu0 %v9332_v7  ;;  %8391 = vmatprep.mubr.msk.bf16.mxu1 %vm9894_vm0, %v9893_v1  ;;  %v9406_v7 = vld [vmem:[%s10192_s26 + $0x38] ss:$12 sps:$4 sm:$0xff]  }
  0x58   : > { %1014 = vmatprep.mubr.bf16.mxu0 %v9339_v8  ;;  %v9416_v8 = vld [vmem:[%s11732_s1 + $0x158] sm:$0xff]  }
  0x5e   : > { %8392 = vmatmul.mubr.bf16.vlgmr.msra.gmra.mrb[0].mxu1 %v9340_v10  ;;  %v9408_v10 = vld [vmem:[%s10192_s26 + $0x30] ss:$12 sps:$4 sm:$0xff]  }
  0x5f   : > { %1015 = vmatmul.mubr.bf16.vlgmr.msra.gmra.mrb[28].mxu0 %v9337_v9  ;;  %8395 = vmatprep.mubr.msk.bf16.mxu1 %vm9894_vm0, %v9893_v1  ;;  %v9417_v9 = vld [vmem:[%s11732_s1 + $0x120] sm:$0xff]  }
  0x60   : > { %7602 = vmatpush3.bf16.msra.mxu0 %v9342_v11  ;;  %8420 = vmatpush3.bf16.msra.mxu1 %v9343_v12  ;;  %v9412_v11 = vld [vmem:[%s10192_s26 + $0x4c] ss:$12 sps:$4 sm:$0xff]   ;;  %v9418_v12 = vld [vmem:[%s11732_s1 + $0xe0] sm:$0xff]  }
  0x61   : > { %1022 = vmatprep.mubr.bf16.mxu0 %v9344_v13  ;;  %7603 = vmatprep.subr.bf16.mxu0 %v9347_v14  ;;  %v9423_v13 = vld [vmem:[%s11732_s1 + $0x160] sm:$0xff]   ;;  %v9424_v14 = vld [vmem:[%s11732_s1 + $0x128] sm:$0xff]  }
  0x62   : > { %8421 = vmatprep.subr.bf16.mxu1 %v9893_v1 }
  0x64   : > { %7604 = vmatpush3.bf16.msra.mxu0 %v9349_v15  ;;  %8422 = vmatpush3.bf16.msra.mxu1 %v9350_v17  ;;  %v9425_v15 = vld [vmem:[%s11732_s1 + $0xe8] sm:$0xff]  }
  0x65   : > { %7605 = vmatprep.subr.bf16.mxu0 %v9351_v19  ;;  %8423 = vmatprep.subr.bf16.mxu1 %v9893_v1  ;;  %v9430_v17 = vld [vmem:[%s11732_s1 + $0x168] sm:$0xff]   ;;  %v9431_v19 = vld [vmem:[%s11732_s1 + $0x130] sm:$0xff]  }
  0x66   : > { %8396 = vmatmul.mubr.bf16.gmra.mrb[4].mxu1 %v9346_v16  ;;  %v9414_v16 = vld [vmem:[%s10192_s26 + $0x50] ss:$12 sps:$4 sm:$0xff]  }
  0x67   : > { %1023 = vmatmul.mubr.bf16.gmra.mrb[32].mxu0 %v9348_v18  ;;  %8399 = vmatprep.mubr.msk.bf16.mxu1 %vm9894_vm0, %v9893_v1  ;;  %v9415_v18 = vld [vmem:[%s10192_s26 + $0x48] ss:$12 sps:$4 sm:$0xff]  }
  0x68   : > { %1030 = vmatprep.mubr.bf16.mxu0 %v9352_v20  ;;  %7606 = vmatpush3.bf16.msra.mxu0 %v9355_v21  ;;  %v9419_v20 = vld [vmem:[%s10192_s26 + $0x64] ss:$12 sps:$4 sm:$0xff]  }
  0x69   : > { %8424 = vmatpush3.bf16.msra.mxu1 %v9357_v22  ;;  %7607 = vmatprep.subr.bf16.mxu0 %v9358_v23  ;;  %v9432_v21 = vld [vmem:[%s11732_s1 + $0xf0] sm:$0xff]   ;;  %v9438_v23 = vld [vmem:[%s11732_s1 + $0x138] sm:$0xff]  }
  0x6a   : > { %8425 = vmatprep.subr.bf16.mxu1 %v9893_v1  ;;  %v9437_v22 = vld [vmem:[%s11732_s1 + $0x170] sm:$0xff]  }
  0x6c   : > { %7608 = vmatpush3.bf16.msra.mxu0 %v9359_v25  ;;  %v9440_v25 = vld [vmem:[%s11732_s1 + $0x178] sm:$0xff]  }
  0x6d   : > { %8426 = vmatpush3.bf16.msra.mxu1 %v9364_v26  ;;  %7609 = vmatprep.subr.bf16.mxu0 %v9365_v27  ;;  %v9445_v26 = vld [vmem:[%s11732_s1 + $0x40] sm:$0xff]   ;;  %v9421_v27 = vld [vmem:[%s10192_s26 + $0x68] ss:$12 sps:$4 sm:$0xff]  }
  0x6e   : > { %8400 = vmatmul.mubr.bf16.gmra.mrb[8].mxu1 %v9354_v24  ;;  %8427 = vmatprep.subr.bf16.mxu1 %v9893_v1  ;;  %v9439_v24 = vld [vmem:[%s11732_s1 + $0xf8] sm:$0xff]  }
  0x6f   : > { %1031 = vmatmul.mubr.bf16.gmra.mrb[36].mxu0 %v9356_v28  ;;  %8403 = vmatprep.mubr.msk.bf16.mxu1 %vm9894_vm0, %v9893_v1  ;;  %v9422_v28 = vld [vmem:[%s10192_s26 + $0x60] ss:$12 sps:$4 sm:$0xff]  }
  0x70   : > { %1038 = vmatprep.mubr.bf16.mxu0 %v9360_v29  ;;  %7610 = vmatpush3.bf16.msra.mxu0 %v9366_v30  ;;  %v9426_v29 = vld [vmem:[%s10192_s26 + $0x7c] ss:$12 sps:$4 sm:$0xff]   ;;  %v9428_v30 = vld [vmem:[%s10192_s26 + $0x80] ss:$12 sps:$4 sm:$0xff]  }
  0x71   : > { %8428 = vmatpush3.bf16.msra.mxu1 %v9371_v31  ;;  %7611 = vmatprep.subr.bf16.mxu0 %v9372_v32  ;;  %v9429_v31 = vld [vmem:[%s10192_s26 + $0x78] ss:$12 sps:$4 sm:$0xff]   ;;  %v9433_v32 = vld [vmem:[%s10192_s26 + $0x94] ss:$12 sps:$4 sm:$0xff]  }
  0x72   : > { %8429 = vmatprep.subr.bf16.mxu1 %v9893_v1 }
  0x74   : > { %7612 = vmatpush3.bf16.msra.mxu0 %v9373_v33  ;;  %v9435_v33 = vld [vmem:[%s10192_s26 + $0x98] ss:$12 sps:$4 sm:$0xff]  }
  0x75   : > { %8430 = vmatpush3.bf16.msra.mxu1 %v9378_v35  ;;  %7613 = vmatprep.subr.bf16.mxu0 %v9379_v37  ;;  %v9443_v35 = vld [vmem:[%s10270_s12 + $0x4] ss:$12 sps:$4 sm:$0xff]   ;;  %v9444_v37 = vld [vmem:[%s10270_s12 + $0x8] ss:$12 sps:$4 sm:$0xff]  }
  0x76   : > { %8404 = vmatmul.mubr.bf16.gmra.mrb[12].mxu1 %v9362_v34  ;;  %8431 = vmatprep.subr.bf16.mxu1 %v9893_v1  ;;  %v9436_v34 = vld [vmem:[%s10192_s26 + $0x90] ss:$12 sps:$4 sm:$0xff]   ;;  %s119_s26 = smul.u32 56, %s6500_s10 }
  0x77   : > { %1039 = vmatmul.mubr.bf16.gmra.mrb[40].mxu0 %v9363_v36  ;;  %8407 = vmatprep.mubr.msk.bf16.mxu1 %vm9894_vm0, %v9893_v1  ;;  %v9441_v36 = vld [vmem:[%s10270_s12] ss:$12 sps:$4 sm:$0xff]  }
  0x78   : > { %1046 = vmatprep.mubr.bf16.mxu0 %v9367_v38  ;;  %7614 = vmatpush3.bf16.msra.mxu0 %v9380_v39  ;;  %v9446_v38 = vld [vmem:[%s11732_s1] sm:$0xff]   ;;  %p120_p3 = scmp.lt.s32.totalorder %s119_s26, 111 }
  0x79   : > { %8432 = vmatpush3.bf16.msra.mxu1 %v9385_v40  ;;  %7615 = vmatprep.subr.bf16.mxu0 %v9386_v41  ;;  %v9447_v39 = vld [vmem:[%s11732_s1 + $0x80] sm:$0xff]   ;;  %v9448_v40 = vld [vmem:[%s10270_s12 + $0x1c] ss:$12 sps:$4 sm:$0xff]  }
  0x7a   : > { %8433 = vmatprep.subr.bf16.mxu1 %v9893_v1  ;;  %v9451_v41 = vld [vmem:[%s11732_s1 + $0x48] sm:$0xff]   ;;  %s11735_s26 = smov (!%p120_p3, %s119_s26), 111 }
  0x7b   : > { %s6504_s10 = sshll.u32 %s11735_s26, 3  ;;  %s4859_s26 = sshra.s32 %s4856_s21, 3 }
  0x7c   : > { %7616 = vmatpush3.bf16.msra.mxu0 %v9387_v42  ;;  %v9453_v42 = vld [vmem:[%s11732_s1 + $0x8] sm:$0xff]   ;;  %s7452_s22 = smul.u32 12, %s4859_s26 }
  0x7d   : > { %8434 = vmatpush3.bf16.msra.mxu1 %v9388_v43  ;;  %7674 = vmatprep.subr.bf16.mxu0 %v9393_v44  ;;  %v9450_v43 = vld [vmem:[%s10270_s12 + $0x20] ss:$12 sps:$4 sm:$0xff]  }
  0x7e   : > { %8408 = vmatmul.mubr.bf16.gmra.mrb[16].mxu1 %v9369_v45  ;;  %8463 = vmatprep.subr.bf16.mxu1 %v9893_v1  ;;  %v9454_v44 = vld [vmem:[%s11732_s1 + $0x88] sm:$0xff]   ;;  %v9452_v45 = vld [vmem:[%s10270_s12 + $0x18] ss:$12 sps:$4 sm:$0xff]   ;;  %s11117_s25 = scalar_lea.vmem %s11731_s0, %s7452_s22 }
  0x7f   : > { %1047 = vmatmul.mubr.bf16.gmra.mrb[44].mxu0 %v9370_v46  ;;  %8411 = vmatprep.mubr.msk.bf16.mxu1 %vm9894_vm0, %v9893_v1  ;;  %v9455_v46 = vld [vmem:[%s11732_s1 + $0x50] sm:$0xff]  }
  0x80   : > { %1054 = vmatprep.mubr.bf16.mxu0 %v9374_v47  ;;  %v9456_v47 = vld [vmem:[%s10270_s12 + $0x34] ss:$12 sps:$4 sm:$0xff]  }
  0x86   : > { %8412 = vmatmul.mubr.bf16.gmra.mrb[20].mxu1 %v9376_v48  ;;  %v9459_v48 = vld [vmem:[%s11732_s1 + $0x10] sm:$0xff]  }
  0x87   : > { %1055 = vmatmul.mubr.bf16.gmra.mrb[48].mxu0 %v9377_v49  ;;  %8415 = vmatprep.mubr.msk.bf16.mxu1 %vm9894_vm0, %v9893_v1  ;;  %v9461_v49 = vld [vmem:[%s11732_s1 + $0x90] sm:$0xff]  }
  0x88   : > { %1062 = vmatprep.mubr.bf16.mxu0 %v9381_v50  ;;  %v9462_v50 = vld [vmem:[%s11732_s1 + $0x58] sm:$0xff]  }
  0x8e   : > { %8416 = vmatmul.mubr.bf16.gmra.mrb[24].mxu1 %v9383_v51  ;;  %v9463_v51 = vld [vmem:[%s11732_s1 + $0x18] sm:$0xff]  }
  0x8f   : > { %1063 = vmatmul.mubr.bf16.gmra.mrb[52].mxu0 %v9384_v52  ;;  %8435 = vmatprep.mubr.msk.bf16.mxu1 %vm9894_vm0, %v9893_v1  ;;  %v9458_v52 = vld [vmem:[%s10270_s12 + $0x38] ss:$12 sps:$4 sm:$0xff]  }
  0x90   : > { %1530 = vmatprep.mubr.bf16.mxu0 %v9391_v53  ;;  %v9468_v53 = vld [vmem:[%s11732_s1 + $0x98] sm:$0xff]  }
  0x96   : > { %8436 = vmatmul.mubr.bf16.vlgmr.msra.gmra.mrb[0].mxu1 %v9392_v55  ;;  %v9469_v55 = vld [vmem:[%s11732_s1 + $0x60] sm:$0xff]  }
  0x97   : > { %1531 = vmatmul.mubr.bf16.vlgmr.msra.gmra.mrb[56].mxu0 %v9389_v54  ;;  %8439 = vmatprep.mubr.msk.bf16.mxu1 %vm9894_vm0, %v9893_v1  ;;  %v9460_v54 = vld [vmem:[%s10270_s12 + $0x30] ss:$12 sps:$4 sm:$0xff]  }
  0x98   : > { %7675 = vmatpush3.bf16.msra.mxu0 %v9394_v56  ;;  %8464 = vmatpush3.bf16.msra.mxu1 %v9395_v57  ;;  %v9464_v56 = vld [vmem:[%s10270_s12 + $0x4c] ss:$12 sps:$4 sm:$0xff]   ;;  %v9470_v57 = vld [vmem:[%s11732_s1 + $0x20] sm:$0xff]  }
  0x99   : > { %1538 = vmatprep.mubr.bf16.mxu0 %v9396_v58  ;;  %7676 = vmatprep.subr.bf16.mxu0 %v9399_v59  ;;  %v9475_v58 = vld [vmem:[%s11732_s1 + $0xa0] sm:$0xff]   ;;  %v9476_v59 = vld [vmem:[%s11732_s1 + $0x68] sm:$0xff]  }
  0x9a   : > { %8465 = vmatprep.subr.bf16.mxu1 %v9893_v1 }
  0x9c   : > { %7677 = vmatpush3.bf16.msra.mxu0 %v9401_v60  ;;  %8466 = vmatpush3.bf16.msra.mxu1 %v9402_v62  ;;  %v9466_v60 = vld [vmem:[%s10270_s12 + $0x50] ss:$12 sps:$4 sm:$0xff]   ;;  %v9467_v62 = vld [vmem:[%s10270_s12 + $0x48] ss:$12 sps:$4 sm:$0xff]  }
  0x9d   : > { %7678 = vmatprep.subr.bf16.mxu0 %v9403_v63  ;;  %8467 = vmatprep.subr.bf16.mxu1 %v9893_v1  ;;  %v9482_v63 = vld [vmem:[%s11732_s1 + $0xa8] sm:$0xff]  }
  0x9e   : > { %8440 = vmatmul.mubr.bf16.gmra.mrb[4].mxu1 %v9398_v61  ;;  %v9477_v61 = vld [vmem:[%s11732_s1 + $0x28] sm:$0xff]  }
  0x9f   : > { %1539 = vmatmul.mubr.bf16.gmra.mrb[60].mxu0 %v9400_v0  ;;  %8443 = vmatprep.mubr.msk.bf16.mxu1 %vm9894_vm0, %v9893_v1  ;;  %v9483_v0 = vld [vmem:[%s11732_s1 + $0x70] sm:$0xff]  }
  0xa0   : > { %1546 = vmatprep.mubr.bf16.mxu0 %v9404_v2  ;;  %7679 = vmatpush3.bf16.msra.mxu0 %v9407_v3  ;;  %v9471_v2 = vld [vmem:[%s10270_s12 + $0x64] ss:$12 sps:$4 sm:$0xff]  }
  0xa1   : > { %8468 = vmatpush3.bf16.msra.mxu1 %v9409_v4  ;;  %7680 = vmatprep.subr.bf16.mxu0 %v9410_v5  ;;  %v9484_v3 = vld [vmem:[%s11732_s1 + $0x30] sm:$0xff]   ;;  %v9490_v5 = vld [vmem:[%s11732_s1 + $0x78] sm:$0xff]  }
  0xa2   : > { %8469 = vmatprep.subr.bf16.mxu1 %v9893_v1  ;;  %v9489_v4 = vld [vmem:[%s11732_s1 + $0xb0] sm:$0xff]  }
  0xa4   : > { %7681 = vmatpush3.bf16.msra.mxu0 %v9411_v6  ;;  %v9491_v6 = vld [vmem:[%s11732_s1 + $0x38] sm:$0xff]  }
  0xa5   : > { %8470 = vmatpush3.bf16.msra.mxu1 %v9416_v8  ;;  %7682 = vmatprep.subr.bf16.mxu0 %v9417_v9  ;;  %v9497_v8 = vld [vmem:[%s11732_s1 + $0x1c0] sm:$0xff]   ;;  %v9473_v9 = vld [vmem:[%s10270_s12 + $0x68] ss:$12 sps:$4 sm:$0xff]  }
  0xa6   : > { %8444 = vmatmul.mubr.bf16.gmra.mrb[8].mxu1 %v9406_v7  ;;  %8471 = vmatprep.subr.bf16.mxu1 %v9893_v1  ;;  %v9492_v7 = vld [vmem:[%s11732_s1 + $0xb8] sm:$0xff]  }
  0xa7   : > { %1547 = vmatmul.mubr.bf16.gmra.mrb[64].mxu0 %v9408_v10  ;;  %8447 = vmatprep.mubr.msk.bf16.mxu1 %vm9894_vm0, %v9893_v1  ;;  %v9474_v10 = vld [vmem:[%s10270_s12 + $0x60] ss:$12 sps:$4 sm:$0xff]  }
  0xa8   : > { %1554 = vmatprep.mubr.bf16.mxu0 %v9412_v11  ;;  %7683 = vmatpush3.bf16.msra.mxu0 %v9418_v12  ;;  %v9478_v11 = vld [vmem:[%s10270_s12 + $0x7c] ss:$12 sps:$4 sm:$0xff]   ;;  %v9480_v12 = vld [vmem:[%s10270_s12 + $0x80] ss:$12 sps:$4 sm:$0xff]  }
  0xa9   : > { %8472 = vmatpush3.bf16.msra.mxu1 %v9423_v13  ;;  %7684 = vmatprep.subr.bf16.mxu0 %v9424_v14  ;;  %v9481_v13 = vld [vmem:[%s10270_s12 + $0x78] ss:$12 sps:$4 sm:$0xff]   ;;  %v9485_v14 = vld [vmem:[%s10270_s12 + $0x94] ss:$12 sps:$4 sm:$0xff]  }
  0xaa   : > { %8473 = vmatprep.subr.bf16.mxu1 %v9893_v1 }
  0xac   : > { %7685 = vmatpush3.bf16.msra.mxu0 %v9425_v15  ;;  %v9487_v15 = vld [vmem:[%s10270_s12 + $0x98] ss:$12 sps:$4 sm:$0xff]  }
  0xad   : > { %8474 = vmatpush3.bf16.msra.mxu1 %v9430_v17  ;;  %7686 = vmatprep.subr.bf16.mxu0 %v9431_v19 }
  0xae   : > { %8448 = vmatmul.mubr.bf16.gmra.mrb[12].mxu1 %v9414_v16  ;;  %8475 = vmatprep.subr.bf16.mxu1 %v9893_v1  ;;  %v9488_v16 = vld [vmem:[%s10270_s12 + $0x90] ss:$12 sps:$4 sm:$0xff]   ;;  %s3281_s12 = sadd.s32 256, %s9952_s29 }
  0xaf   : > { %1555 = vmatmul.mubr.bf16.gmra.mrb[68].mxu0 %v9415_v18  ;;  %8451 = vmatprep.mubr.msk.bf16.mxu1 %vm9894_vm0, %v9893_v1  ;;  %v9495_v18 = vld [vmem:[%s10375_s16 + $0x4] ss:$12 sps:$4 sm:$0xff]   ;;  %s10524_s5 = sshra.s32 %s3281_s12, 3 }
  0xb0   : > { %1562 = vmatprep.mubr.bf16.mxu0 %v9419_v20  ;;  %7687 = vmatpush3.bf16.msra.mxu0 %v9432_v21  ;;  %s7450_s14 = smul.u32 12, %s10524_s5 }
  0xb1   : > { %8476 = vmatpush3.bf16.msra.mxu1 %v9437_v22  ;;  %7688 = vmatprep.subr.bf16.mxu0 %v9438_v23  ;;  %s7454_s5 = smul.u32 12, %s5889_s3 }
  0xb2   : > { %8477 = vmatprep.subr.bf16.mxu1 %v9893_v1  ;;  %s10559_s12 = scalar_lea.vmem %s11731_s0, %s7450_s14  ;;  %s10659_s14 = scalar_lea.vmem %s11731_s0, %s7449_s17 }
  0xb3   : > { %s7453_s17 = smul.u32 12, %s4940_s8  ;;  %s11278_s8 = scalar_lea.vmem %s11731_s0, %s7454_s5 }
  0xb4   : > { %7689 = vmatpush3.bf16.msra.mxu0 %v9439_v24 }
  0xb5   : > { %8478 = vmatpush3.bf16.msra.mxu1 %v9440_v25  ;;  %7747 = vmatprep.subr.bf16.mxu0 %v9445_v26  ;;  %v9496_v25 = vld [vmem:[%s10375_s16 + $0x8] ss:$12 sps:$4 sm:$0xff]  }
  0xb6   : > { %8452 = vmatmul.mubr.bf16.gmra.mrb[16].mxu1 %v9421_v27  ;;  %8507 = vmatprep.subr.bf16.mxu1 %v9893_v1  ;;  %v9493_v27 = vld [vmem:[%s10375_s16] ss:$12 sps:$4 sm:$0xff]  }
  0xb7   : > { %1563 = vmatmul.mubr.bf16.gmra.mrb[72].mxu0 %v9422_v28  ;;  %8455 = vmatprep.mubr.msk.bf16.mxu1 %vm9894_vm0, %v9893_v1  ;;  %v9498_v28 = vld [vmem:[%s11732_s1 + $0x180] sm:$0xff]  }
  0xb8   : > { %1570 = vmatprep.mubr.bf16.mxu0 %v9426_v29 }
  0xbe   : > { %8456 = vmatmul.mubr.bf16.gmra.mrb[20].mxu1 %v9428_v30 }
  0xbf   : > { %1571 = vmatmul.mubr.bf16.gmra.mrb[76].mxu0 %v9429_v31  ;;  %8459 = vmatprep.mubr.msk.bf16.mxu1 %vm9894_vm0, %v9893_v1  ;;  %v9499_v31 = vld [vmem:[%s11732_s1 + $0x200] sm:$0xff]  }
  0xc0   : > { %1578 = vmatprep.mubr.bf16.mxu0 %v9433_v32  ;;  %v9500_v32 = vld [vmem:[%s10375_s16 + $0x1c] ss:$12 sps:$4 sm:$0xff]  }
  0xc6   : > { %8460 = vmatmul.mubr.bf16.gmra.mrb[24].mxu1 %v9435_v33 }
  0xc7   : > { %1579 = vmatmul.mubr.bf16.gmra.mrb[80].mxu0 %v9436_v34  ;;  %8479 = vmatprep.mubr.msk.bf16.mxu1 %vm9894_vm0, %v9893_v1  ;;  %v9503_v34 = vld [vmem:[%s11732_s1 + $0x1c8] sm:$0xff]  }
  0xc8   : > { %2157 = vmatprep.mubr.bf16.mxu0 %v9443_v35 }
  0xce   : > { %8480 = vmatmul.mubr.bf16.vlgmr.msra.gmra.mrb[28].mxu1 %v9444_v37  ;;  %v9502_v37 = vld [vmem:[%s10375_s16 + $0x20] ss:$12 sps:$4 sm:$0xff]  }
  0xcf   : > { %2158 = vmatmul.mubr.bf16.vlgmr.msra.gmra.mrb[84].mxu0 %v9441_v36  ;;  %8483 = vmatprep.mubr.msk.bf16.mxu1 %vm9894_vm0, %v9893_v1  ;;  %v9505_v36 = vld [vmem:[%s11732_s1 + $0x188] sm:$0xff]  }
  0xd0   : > { %7748 = vmatpush3.bf16.msra.mxu0 %v9446_v38  ;;  %8508 = vmatpush3.bf16.msra.mxu1 %v9447_v39  ;;  %v9506_v38 = vld [vmem:[%s11732_s1 + $0x208] sm:$0xff]   ;;  %v9504_v39 = vld [vmem:[%s10375_s16 + $0x18] ss:$12 sps:$4 sm:$0xff]  }
  0xd1   : > { %2165 = vmatprep.mubr.bf16.mxu0 %v9448_v40  ;;  %7749 = vmatprep.subr.bf16.mxu0 %v9451_v41  ;;  %v9507_v40 = vld [vmem:[%s11732_s1 + $0x1d0] sm:$0xff]  }
  0xd2   : > { %8509 = vmatprep.subr.bf16.mxu1 %v9893_v1 }
  0xd4   : > { %7750 = vmatpush3.bf16.msra.mxu0 %v9453_v42  ;;  %8510 = vmatpush3.bf16.msra.mxu1 %v9454_v44  ;;  %v9508_v42 = vld [vmem:[%s10375_s16 + $0x34] ss:$12 sps:$4 sm:$0xff]  }
  0xd5   : > { %7751 = vmatprep.subr.bf16.mxu0 %v9455_v46  ;;  %8511 = vmatprep.subr.bf16.mxu1 %v9893_v1  ;;  %v9511_v44 = vld [vmem:[%s11732_s1 + $0x190] sm:$0xff]  }
  0xd6   : > { %8484 = vmatmul.mubr.bf16.gmra.mrb[32].mxu1 %v9450_v43 }
  0xd7   : > { %2166 = vmatmul.mubr.bf16.gmra.mrb[88].mxu0 %v9452_v45  ;;  %8487 = vmatprep.mubr.msk.bf16.mxu1 %vm9894_vm0, %v9893_v1 }
  0xd8   : > { %2173 = vmatprep.mubr.bf16.mxu0 %v9456_v47  ;;  %7752 = vmatpush3.bf16.msra.mxu0 %v9459_v48  ;;  %v9513_v47 = vld [vmem:[%s11732_s1 + $0x210] sm:$0xff]  }
  0xd9   : > { %8512 = vmatpush3.bf16.msra.mxu1 %v9461_v49  ;;  %7753 = vmatprep.subr.bf16.mxu0 %v9462_v50  ;;  %v9514_v49 = vld [vmem:[%s11732_s1 + $0x1d8] sm:$0xff]  }
  0xda   : > { %8513 = vmatprep.subr.bf16.mxu1 %v9893_v1 }
  0xdc   : > { %7754 = vmatpush3.bf16.msra.mxu0 %v9463_v51  ;;  %v9515_v51 = vld [vmem:[%s11732_s1 + $0x198] sm:$0xff]  }
  0xdd   : > { %8514 = vmatpush3.bf16.msra.mxu1 %v9468_v53  ;;  %7755 = vmatprep.subr.bf16.mxu0 %v9469_v55  ;;  %v9520_v53 = vld [vmem:[%s11732_s1 + $0x218] sm:$0xff]  }
  0xde   : > { %8488 = vmatmul.mubr.bf16.gmra.mrb[36].mxu1 %v9458_v52  ;;  %8515 = vmatprep.subr.bf16.mxu1 %v9893_v1  ;;  %v9510_v52 = vld [vmem:[%s10375_s16 + $0x38] ss:$12 sps:$4 sm:$0xff]  }
  0xdf   : > { %2174 = vmatmul.mubr.bf16.gmra.mrb[92].mxu0 %v9460_v54  ;;  %8491 = vmatprep.mubr.msk.bf16.mxu1 %vm9894_vm0, %v9893_v1  ;;  %v9521_v54 = vld [vmem:[%s11732_s1 + $0x1e0] sm:$0xff]  }
  0xe0   : > { %2181 = vmatprep.mubr.bf16.mxu0 %v9464_v56  ;;  %7756 = vmatpush3.bf16.msra.mxu0 %v9470_v57  ;;  %v9512_v57 = vld [vmem:[%s10375_s16 + $0x30] ss:$12 sps:$4 sm:$0xff]  }
  0xe1   : > { %8516 = vmatpush3.bf16.msra.mxu1 %v9475_v58  ;;  %7757 = vmatprep.subr.bf16.mxu0 %v9476_v59 }
  0xe2   : > { %8517 = vmatprep.subr.bf16.mxu1 %v9893_v1 }
  0xe4   : > { %7758 = vmatpush3.bf16.msra.mxu0 %v9477_v61  ;;  %v9522_v61 = vld [vmem:[%s11732_s1 + $0x1a0] sm:$0xff]  }
  0xe5   : > { %8518 = vmatpush3.bf16.msra.mxu1 %v9482_v63  ;;  %7759 = vmatprep.subr.bf16.mxu0 %v9483_v0  ;;  %v9527_v63 = vld [vmem:[%s11732_s1 + $0x220] sm:$0xff]   ;;  %v9528_v0 = vld [vmem:[%s11732_s1 + $0x1e8] sm:$0xff]  }
  0xe6   : > { %8492 = vmatmul.mubr.bf16.gmra.mrb[40].mxu1 %v9466_v60  ;;  %8519 = vmatprep.subr.bf16.mxu1 %v9893_v1  ;;  %v9516_v60 = vld [vmem:[%s10375_s16 + $0x4c] ss:$12 sps:$4 sm:$0xff]  }
  0xe7   : > { %2182 = vmatmul.mubr.bf16.gmra.mrb[96].mxu0 %v9467_v62  ;;  %8495 = vmatprep.mubr.msk.bf16.mxu1 %vm9894_vm0, %v9893_v1 }
  0xe8   : > { %2189 = vmatprep.mubr.bf16.mxu0 %v9471_v2  ;;  %7760 = vmatpush3.bf16.msra.mxu0 %v9484_v3  ;;  %v9529_v3 = vld [vmem:[%s11732_s1 + $0x1a8] sm:$0xff]  }
  0xe9   : > { %8520 = vmatpush3.bf16.msra.mxu1 %v9489_v4  ;;  %7761 = vmatprep.subr.bf16.mxu0 %v9490_v5  ;;  %v9518_v4 = vld [vmem:[%s10375_s16 + $0x50] ss:$12 sps:$4 sm:$0xff]   ;;  %v9534_v5 = vld [vmem:[%s11732_s1 + $0x228] sm:$0xff]  }
  0xea   : > { %8521 = vmatprep.subr.bf16.mxu1 %v9893_v1 }
  0xec   : > { %7762 = vmatpush3.bf16.msra.mxu0 %v9491_v6  ;;  %v9535_v6 = vld [vmem:[%s11732_s1 + $0x1f0] sm:$0xff]  }
  0xed   : > { %8522 = vmatpush3.bf16.msra.mxu1 %v9492_v7  ;;  %7820 = vmatprep.subr.bf16.mxu0 %v9497_v8  ;;  %v9519_v8 = vld [vmem:[%s10375_s16 + $0x48] ss:$12 sps:$4 sm:$0xff]  }
  0xee   : > { %8496 = vmatmul.mubr.bf16.gmra.mrb[44].mxu1 %v9473_v9  ;;  %8551 = vmatprep.subr.bf16.mxu1 %v9893_v1 }
  0xef   : > { %2190 = vmatmul.mubr.bf16.gmra.mrb[100].mxu0 %v9474_v10  ;;  %8499 = vmatprep.mubr.msk.bf16.mxu1 %vm9894_vm0, %v9893_v1  ;;  %v9523_v10 = vld [vmem:[%s10375_s16 + $0x64] ss:$12 sps:$4 sm:$0xff]  }
  0xf0   : > { %2197 = vmatprep.mubr.bf16.mxu0 %v9478_v11 }
  0xf6   : > { %8500 = vmatmul.mubr.bf16.gmra.mrb[48].mxu1 %v9480_v12 }
  0xf7   : > { %2198 = vmatmul.mubr.bf16.gmra.mrb[104].mxu0 %v9481_v13  ;;  %8503 = vmatprep.mubr.msk.bf16.mxu1 %vm9894_vm0, %v9893_v1  ;;  %v9536_v13 = vld [vmem:[%s11732_s1 + $0x1b0] sm:$0xff]  }
  0xf8   : > { %2205 = vmatprep.mubr.bf16.mxu0 %v9485_v14 }
  0xfa   : > { %v7471_v17 = vpop.f32.mrb[0].mxu0 }
  0xfb   : > { %v7472_v19 = vpop.f32.mrb[1].mxu0 }
  0xfc   : > { %v10503_v20 = vadd.f32 %v7472_v19, %v7471_v17  ;;  %v7474_v21 = vpop.f32.mrb[2].mxu0  ;;  %v9525_v19 = vld [vmem:[%s10375_s16 + $0x68] ss:$12 sps:$4 sm:$0xff]  }
  0xfd   : > { %v7475_v22 = vpop.f32.mrb[3].mxu0 }
  0xfe   : > { %v10505_v23 = vadd.f32 %v7475_v22, %v7474_v21  ;;  %8504 = vmatmul.mubr.bf16.gmra.mrb[52].mxu1 %v9487_v15  ;;  %v9541_v15 = vld [vmem:[%s11732_s1 + $0x230] sm:$0xff]   ;;  %v9544_v21 = vld [vmem:[%s11732_s1 + $0x238] sm:$0xff]   ;;  %v9526_v22 = vld [vmem:[%s10375_s16 + $0x60] ss:$12 sps:$4 sm:$0xff]  }
  0xff   : > { %2206 = vmatmul.mubr.bf16.gmra.mrb[108].mxu0 %v9488_v16  ;;  %8523 = vmatprep.mubr.msk.bf16.mxu1 %vm9894_vm0, %v9893_v1  ;;  %v9542_v16 = vld [vmem:[%s11732_s1 + $0x1f8] sm:$0xff]  }
 0x100   : > { %2591 = vmatprep.mubr.bf16.mxu0 %v9495_v18  ;;  %v9543_v18 = vld [vmem:[%s11732_s1 + $0x1b8] sm:$0xff]  }
 0x102   : > { %v7477_v24 = vpop.f32.mrb[4].mxu0 }
 0x103   : > { %v7478_v26 = vpop.f32.mrb[5].mxu0 }
 0x104   : > { %v10515_v29 = vadd.f32 %v7478_v26, %v7477_v24  ;;  %v7480_v30 = vpop.f32.mrb[6].mxu0  ;;  %v9549_v24 = vld [vmem:[%s11732_s1 + $0x100] sm:$0xff]   ;;  %v9530_v26 = vld [vmem:[%s10375_s16 + $0x7c] ss:$12 sps:$4 sm:$0xff]  }
 0x105   : > { %v7481_v33 = vpop.f32.mrb[7].mxu0 }
 0x106   : > { %v10526_v35 = vadd.f32 %v7481_v33, %v7480_v30  ;;  %8524 = vmatmul.mubr.bf16.vlgmr.msra.gmra.mrb[28].mxu1 %v9496_v25  ;;  %v9532_v33 = vld [vmem:[%s10375_s16 + $0x80] ss:$12 sps:$4 sm:$0xff]  }
 0x107   : > { %2592 = vmatmul.mubr.bf16.vlgmr.msra.gmra.mrb[112].mxu0 %v9493_v27  ;;  %8527 = vmatprep.mubr.msk.bf16.mxu1 %vm9894_vm0, %v9893_v1 }
 0x108   : > { %7821 = vmatpush3.bf16.msra.mxu0 %v9498_v28  ;;  %8552 = vmatpush3.bf16.msra.mxu1 %v9499_v31 }
 0x109   : > { %2599 = vmatprep.mubr.bf16.mxu0 %v9500_v32  ;;  %7822 = vmatprep.subr.bf16.mxu0 %v9503_v34 }
 0x10a   : > { %v7483_v41 = vpop.f32.mrb[8].mxu0  ;;  %8553 = vmatprep.subr.bf16.mxu1 %v9893_v1 }
 0x10b   : > { %v7484_v43 = vpop.f32.mrb[9].mxu0 }
 0x10c   : > { %v10547_v45 = vadd.f32 %v7484_v43, %v7483_v41  ;;  %v7486_v46 = vpop.f32.mrb[10].mxu0  ;;  %7823 = vmatpush3.bf16.msra.mxu0 %v9505_v36  ;;  %8554 = vmatpush3.bf16.msra.mxu1 %v9506_v38  ;;  %v9539_v43 = vld [vmem:[%s10375_s16 + $0x98] ss:$12 sps:$4 sm:$0xff]  }
 0x10d   : > { %v7487_v48 = vpop.f32.mrb[11].mxu0  ;;  %7824 = vmatprep.subr.bf16.mxu0 %v9507_v40  ;;  %8555 = vmatprep.subr.bf16.mxu1 %v9893_v1  ;;  %v9537_v40 = vld [vmem:[%s10375_s16 + $0x94] ss:$12 sps:$4 sm:$0xff]  }
 0x10e   : > { %v10561_v50 = vadd.f32 %v7487_v48, %v7486_v46  ;;  %8528 = vmatmul.mubr.bf16.gmra.mrb[32].mxu1 %v9502_v37  ;;  %v9533_v37 = vld [vmem:[%s10375_s16 + $0x78] ss:$12 sps:$4 sm:$0xff]  }
 0x10f   : > { %2600 = vmatmul.mubr.bf16.gmra.mrb[116].mxu0 %v9504_v39  ;;  %8531 = vmatprep.mubr.msk.bf16.mxu1 %vm9894_vm0, %v9893_v1 }
 0x110   : > { %2607 = vmatprep.mubr.bf16.mxu0 %v9508_v42  ;;  %7825 = vmatpush3.bf16.msra.mxu0 %v9511_v44  ;;  %v9540_v44 = vld [vmem:[%s10375_s16 + $0x90] ss:$12 sps:$4 sm:$0xff]   ;;  %s10967_s16 = scalar_lea.vmem %s11731_s0, %s7453_s17 }
 0x111   : > { %8556 = vmatpush3.bf16.msra.mxu1 %v9513_v47  ;;  %7826 = vmatprep.subr.bf16.mxu0 %v9514_v49  ;;  %v9547_v47 = vld [vmem:[%s10471_s15 + $0x4] ss:$12 sps:$4 sm:$0xff]  }
 0x112   : > { %v7489_v55 = vpop.f32.mrb[12].mxu0  ;;  %8557 = vmatprep.subr.bf16.mxu1 %v9893_v1 }
 0x113   : > { %v7490_v56 = vpop.f32.mrb[13].mxu0 }
 0x114   : > { %v10577_v58 = vadd.f32 %v7490_v56, %v7489_v55  ;;  %v7492_v59 = vpop.f32.mrb[14].mxu0  ;;  %7827 = vmatpush3.bf16.msra.mxu0 %v9515_v51  ;;  %v9545_v56 = vld [vmem:[%s10471_s15] ss:$12 sps:$4 sm:$0xff]  }
 0x115   : > { %v7493_v62 = vpop.f32.mrb[15].mxu0  ;;  %8558 = vmatpush3.bf16.msra.mxu1 %v9520_v53  ;;  %7828 = vmatprep.subr.bf16.mxu0 %v9521_v54 }
 0x116   : > { %v10589_v2 = vadd.f32 %v7493_v62, %v7492_v59  ;;  %8532 = vmatmul.mubr.bf16.gmra.mrb[36].mxu1 %v9510_v52  ;;  %8559 = vmatprep.subr.bf16.mxu1 %v9893_v1 }
 0x117   : > { %2608 = vmatmul.mubr.bf16.gmra.mrb[120].mxu0 %v9512_v57  ;;  %8535 = vmatprep.mubr.msk.bf16.mxu1 %vm9894_vm0, %v9893_v1  ;;  %v9548_v57 = vld [vmem:[%s10471_s15 + $0x8] ss:$12 sps:$4 sm:$0xff]  }
 0x118   : > { %2615 = vmatprep.mubr.bf16.mxu0 %v9516_v60  ;;  %7829 = vmatpush3.bf16.msra.mxu0 %v9522_v61 }
 0x119   : > { %8560 = vmatpush3.bf16.msra.mxu1 %v9527_v63  ;;  %7830 = vmatprep.subr.bf16.mxu0 %v9528_v0  ;;  %v9551_v63 = vld [vmem:[%s11732_s1 + $0x140] sm:$0xff]  }
 0x11a   : > { %v7495_v7 = vpop.f32.mrb[16].mxu0  ;;  %8561 = vmatprep.subr.bf16.mxu1 %v9893_v1 }
 0x11b   : > { %v7496_v9 = vpop.f32.mrb[17].mxu0 }
 0x11c   : > { %v10607_v11 = vadd.f32 %v7496_v9, %v7495_v7  ;;  %v7498_v12 = vpop.f32.mrb[18].mxu0  ;;  %7831 = vmatpush3.bf16.msra.mxu0 %v9529_v3  ;;  %v9552_v3 = vld [vmem:[%s10471_s15 + $0x1c] ss:$12 sps:$4 sm:$0xff]   ;;  %v9559_v9 = vld [vmem:[%s11732_s1 + $0x110] sm:$0xff]  }
 0x11d   : > { %v7499_v14 = vpop.f32.mrb[19].mxu0  ;;  %8562 = vmatpush3.bf16.msra.mxu1 %v9534_v5  ;;  %7832 = vmatprep.subr.bf16.mxu0 %v9535_v6  ;;  %v9557_v6 = vld [vmem:[%s11732_s1 + $0xc8] sm:$0xff]  }
 0x11e   : > { %v10618_v17 = vadd.f32 %v7499_v14, %v7498_v12  ;;  %8536 = vmatmul.mubr.bf16.gmra.mrb[40].mxu1 %v9518_v4  ;;  %8563 = vmatprep.subr.bf16.mxu1 %v9893_v1  ;;  %v9556_v12 = vld [vmem:[%s10471_s15 + $0x18] ss:$12 sps:$4 sm:$0xff]  }
 0x11f   : > { %2616 = vmatmul.mubr.bf16.gmra.mrb[124].mxu0 %v9519_v8  ;;  %8539 = vmatprep.mubr.msk.bf16.mxu1 %vm9894_vm0, %v9893_v1  ;;  %v9554_v8 = vld [vmem:[%s10471_s15 + $0x20] ss:$12 sps:$4 sm:$0xff]  }
 0x120   : > { %2623 = vmatprep.mubr.bf16.mxu0 %v9523_v10  ;;  %7833 = vmatpush3.bf16.msra.mxu0 %v9536_v13 }
 0x121   : > { %8564 = vmatpush3.bf16.msra.mxu1 %v9541_v15  ;;  %7834 = vmatprep.subr.bf16.mxu0 %v9542_v16  ;;  %v9560_v15 = vld [vmem:[%s10471_s15 + $0x34] ss:$12 sps:$4 sm:$0xff]  }
 0x122   : > { %v7501_v25 = vpop.f32.mrb[20].mxu0  ;;  %8565 = vmatprep.subr.bf16.mxu1 %v9893_v1  ;;  %v9563_v16 = vld [vmem:[%s11732_s1 + $0xd0] sm:$0xff]  }
 0x123   : > { %v7502_v27 = vpop.f32.mrb[21].mxu0 }
 0x124   : > { %v10636_v28 = vadd.f32 %v7502_v27, %v7501_v25  ;;  %v7504_v30 = vpop.f32.mrb[22].mxu0  ;;  %7835 = vmatpush3.bf16.msra.mxu0 %v9543_v18  ;;  %v9567_v25 = vld [vmem:[%s11732_s1 + $0xd8] sm:$0xff]  }
 0x125   : > { %v7505_v31 = vpop.f32.mrb[23].mxu0  ;;  %8566 = vmatpush3.bf16.msra.mxu1 %v9544_v21  ;;  %7893 = vmatprep.subr.bf16.mxu0 %v9549_v24  ;;  %v9566_v21 = vld [vmem:[%s11732_s1 + $0x118] sm:$0xff]  }
 0x126   : > { %v10638_v32 = vadd.f32 %v7505_v31, %v7504_v30  ;;  %8540 = vmatmul.mubr.bf16.gmra.mrb[44].mxu1 %v9525_v19  ;;  %8595 = vmatprep.subr.bf16.mxu1 %v9893_v1  ;;  %v9565_v19 = vld [vmem:[%s11732_s1 + $0x150] sm:$0xff]   ;;  %v9562_v27 = vld [vmem:[%s10471_s15 + $0x38] ss:$12 sps:$4 sm:$0xff]  }
 0x127   : > { %2624 = vmatmul.mubr.bf16.gmra.mrb[128].mxu0 %v9526_v22  ;;  %8543 = vmatprep.mubr.msk.bf16.mxu1 %vm9894_vm0, %v9893_v1  ;;  %v9573_v30 = vld [vmem:[%s11732_s1 + $0x120] sm:$0xff]  }
 0x128   : > { %2631 = vmatprep.mubr.bf16.mxu0 %v9530_v26 }
 0x12a   : > { %v7507_v34 = vpop.f32.mrb[24].mxu0 }
 0x12b   : > { %v7508_v36 = vpop.f32.mrb[25].mxu0 }
 0x12c   : > { %v10646_v38 = vadd.f32 %v7508_v36, %v7507_v34  ;;  %v7510_v39 = vpop.f32.mrb[26].mxu0  ;;  %v9568_v34 = vld [vmem:[%s10471_s15 + $0x4c] ss:$12 sps:$4 sm:$0xff]  }
 0x12d   : > { %v7511_v41 = vpop.f32.mrb[27].mxu0 }
 0x12e   : > { %v10649_v42 = vadd.f32 %v7511_v41, %v7510_v39  ;;  %8544 = vmatmul.mubr.bf16.gmra.mrb[48].mxu1 %v9532_v33  ;;  %v9564_v33 = vld [vmem:[%s10471_s15 + $0x30] ss:$12 sps:$4 sm:$0xff]  }
 0x12f   : > { %2632 = vmatmul.mubr.bf16.gmra.mrb[132].mxu0 %v9533_v37  ;;  %8547 = vmatprep.mubr.msk.bf16.mxu1 %vm9894_vm0, %v9893_v1 }
 0x130   : > { %2639 = vmatprep.mubr.bf16.mxu0 %v9537_v40  ;;  %v9579_v40 = vld [vmem:[%s11732_s1 + $0x160] sm:$0xff]  }
 0x132   : > { %v7544_v46 = vpop.f32.mrb[28].mxu0 }
 0x133   : > { %v7545_v48 = vpop.f32.mrb[29].mxu0 }
 0x134   : > { %v7546_v49 = vadd.f32 %v7545_v48, %v7544_v46  ;;  %v7547_v51 = vpop.f32.mrb[30].mxu0  ;;  %v9586_v48 = vld [vmem:[%s11732_s1 + $0x168] sm:$0xff]  }
 0x135   : > { %v7548_v52 = vpop.f32.mrb[31].mxu0 }
 0x136   : > { %v10662_v53 = vadd.f32 %v7546_v49, %v10503_v20  ;;  %v7549_v54 = vadd.f32 %v7548_v52, %v7547_v51  ;;  %8548 = vmatmul.mubr.bf16.gmra.mrb[52].mxu1 %v9539_v43  ;;  %v9550_v20 = vld [vmem:[%s11732_s1 + $0xc0] sm:$0xff]   ;;  %v9580_v43 = vld [vmem:[%s11732_s1 + $0x128] sm:$0xff]   ;;  %v9570_v49 = vld [vmem:[%s10471_s15 + $0x50] ss:$12 sps:$4 sm:$0xff]  }
 0x137   : > { %2640 = vmatmul.mubr.bf16.gmra.mrb[136].mxu0 %v9540_v44  ;;  %8567 = vmatprep.mubr.msk.bf16.mxu1 %vm9894_vm0, %v9893_v1  ;;  %v9587_v51 = vld [vmem:[%s11732_s1 + $0x130] sm:$0xff]  }
 0x138   : > { %v10667_v55 = vadd.f32 %v7549_v54, %v10505_v23  ;;  %3106 = vmatprep.mubr.bf16.mxu0 %v9547_v47  ;;  %v9555_v23 = vld [vmem:[%s11732_s1 + $0x108] sm:$0xff]  }
 0x139   : > { %v9581_v47 = vld [vmem:[%s11732_s1 + $0xe8] sm:$0xff]  }
 0x13a   : > { %v7550_v59 = vpop.f32.mrb[32].mxu0  ;;  %v9571_v54 = vld [vmem:[%s10471_s15 + $0x48] ss:$12 sps:$4 sm:$0xff]  }
 0x13b   : > { %v7551_v60 = vpop.f32.mrb[33].mxu0 }
 0x13c   : > { %v7552_v61 = vadd.f32 %v7551_v60, %v7550_v59  ;;  %v7553_v62 = vpop.f32.mrb[34].mxu0  ;;  %v9575_v60 = vld [vmem:[%s10471_s15 + $0x64] ss:$12 sps:$4 sm:$0xff]  }
 0x13d   : > { %v7554_v0 = vpop.f32.mrb[35].mxu0 }
 0x13e   : > { %v10682_v4 = vadd.f32 %v7552_v61, %v10515_v29  ;;  %v7555_v5 = vadd.f32 %v7554_v0, %v7553_v62  ;;  %8568 = vmatmul.mubr.bf16.vlgmr.msra.gmra.mrb[28].mxu1 %v9548_v57  ;;  %v9558_v29 = vld [vmem:[%s11732_s1 + $0x148] sm:$0xff]   ;;  %v9594_v62 = vld [vmem:[%s11732_s1 + $0x138] sm:$0xff]  }
 0x13f   : > { %3107 = vmatmul.mubr.bf16.vlgmr.msra.gmra.mrb[140].mxu0 %v9545_v56  ;;  %8571 = vmatprep.mubr.msk.bf16.mxu1 %vm9894_vm0, %v9893_v1 }
 0x140   : > { %v10690_v7 = vadd.f32 %v7555_v5, %v10526_v35  ;;  %7894 = vmatpush3.bf16.msra.mxu0 %v9550_v20  ;;  %8596 = vmatpush3.bf16.msra.mxu1 %v9551_v63  ;;  %v9593_v20 = vld [vmem:[%s11732_s1 + $0x170] sm:$0xff]  }
 0x141   : > { %3114 = vmatprep.mubr.bf16.mxu0 %v9552_v3  ;;  %7895 = vmatprep.subr.bf16.mxu0 %v9555_v23  ;;  %v9595_v3 = vld [vmem:[%s11732_s1 + $0xf8] sm:$0xff]  }
 0x142   : > { %v7556_v10 = vpop.f32.mrb[36].mxu0  ;;  %8597 = vmatprep.subr.bf16.mxu1 %v9893_v1  ;;  %v9596_v23 = vld [vmem:[%s11732_s1 + $0x178] sm:$0xff]  }
 0x143   : > { %v7557_v35 = vpop.f32.mrb[37].mxu0 }
 0x144   : > { %v7558_v13 = vadd.f32 %v7557_v35, %v7556_v10  ;;  %v7559_v14 = vpop.f32.mrb[38].mxu0  ;;  %7896 = vmatpush3.bf16.msra.mxu0 %v9557_v6  ;;  %8598 = vmatpush3.bf16.msra.mxu1 %v9558_v29  ;;  %v9577_v6 = vld [vmem:[%s10471_s15 + $0x68] ss:$12 sps:$4 sm:$0xff]  }
 0x145   : > { %v7560_v18 = vpop.f32.mrb[39].mxu0  ;;  %7897 = vmatprep.subr.bf16.mxu0 %v9559_v9  ;;  %8599 = vmatprep.subr.bf16.mxu1 %v9893_v1  ;;  %v9582_v35 = vld [vmem:[%s10471_s15 + $0x7c] ss:$12 sps:$4 sm:$0xff]  }
 0x146   : > { %v10713_v22 = vadd.f32 %v7558_v13, %v10547_v45  ;;  %v7561_v24 = vadd.f32 %v7560_v18, %v7559_v14  ;;  %8572 = vmatmul.mubr.bf16.gmra.mrb[32].mxu1 %v9554_v8  ;;  %v9572_v45 = vld [vmem:[%s11732_s1 + $0x158] sm:$0xff]   ;;  %v9578_v8 = vld [vmem:[%s10471_s15 + $0x60] ss:$12 sps:$4 sm:$0xff]  }
 0x147   : > { %3115 = vmatmul.mubr.bf16.gmra.mrb[144].mxu0 %v9556_v12  ;;  %8575 = vmatprep.mubr.msk.bf16.mxu1 %vm9894_vm0, %v9893_v1 }
 0x148   : > { %v10721_v26 = vadd.f32 %v7561_v24, %v10561_v50  ;;  %3122 = vmatprep.mubr.bf16.mxu0 %v9560_v15  ;;  %7898 = vmatpush3.bf16.msra.mxu0 %v9563_v16  ;;  %v9574_v50 = vld [vmem:[%s11732_s1 + $0xe0] sm:$0xff]  }
 0x149   : > { %8600 = vmatpush3.bf16.msra.mxu1 %v9565_v19  ;;  %7899 = vmatprep.subr.bf16.mxu0 %v9566_v21  ;;  %v9584_v16 = vld [vmem:[%s10471_s15 + $0x80] ss:$12 sps:$4 sm:$0xff]  }
 0x14a   : > { %v7562_v31 = vpop.f32.mrb[40].mxu0  ;;  %8601 = vmatprep.subr.bf16.mxu1 %v9893_v1 }
 0x14b   : > { %v7563_v36 = vpop.f32.mrb[41].mxu0 }
 0x14c   : > { %v7564_v37 = vadd.f32 %v7563_v36, %v7562_v31  ;;  %v7565_v39 = vpop.f32.mrb[42].mxu0  ;;  %7900 = vmatpush3.bf16.msra.mxu0 %v9567_v25 }
 0x14d   : > { %v7566_v41 = vpop.f32.mrb[43].mxu0  ;;  %8602 = vmatpush3.bf16.msra.mxu1 %v9572_v45  ;;  %7901 = vmatprep.subr.bf16.mxu0 %v9573_v30  ;;  %v9591_v30 = vld [vmem:[%s10471_s15 + $0x98] ss:$12 sps:$4 sm:$0xff]  }
 0x14e   : > { %v10743_v44 = vadd.f32 %v7564_v37, %v10577_v58  ;;  %v7567_v46 = vadd.f32 %v7566_v41, %v7565_v39  ;;  %8576 = vmatmul.mubr.bf16.gmra.mrb[36].mxu1 %v9562_v27  ;;  %8603 = vmatprep.subr.bf16.mxu1 %v9893_v1 }
 0x14f   : > { %3123 = vmatmul.mubr.bf16.gmra.mrb[148].mxu0 %v9564_v33  ;;  %8579 = vmatprep.mubr.msk.bf16.mxu1 %vm9894_vm0, %v9893_v1 }
 0x150   : > { %v10755_v58 = vadd.f32 %v7567_v46, %v10589_v2  ;;  %3130 = vmatprep.mubr.bf16.mxu0 %v9568_v34  ;;  %7902 = vmatpush3.bf16.msra.mxu0 %v9574_v50  ;;  %v9588_v2 = vld [vmem:[%s11732_s1 + $0xf0] sm:$0xff]  }
 0x151   : > { %8604 = vmatpush3.bf16.msra.mxu1 %v9579_v40  ;;  %7903 = vmatprep.subr.bf16.mxu0 %v9580_v43  ;;  %v9592_v34 = vld [vmem:[%s10471_s15 + $0x90] ss:$12 sps:$4 sm:$0xff]  }
 0x152   : > { %v7568_v52 = vpop.f32.mrb[44].mxu0  ;;  %8605 = vmatprep.subr.bf16.mxu1 %v9893_v1  ;;  %v9599_v43 = vld [vmem:[%s10559_s12 + $0x4] ss:$12 sps:$4 sm:$0xff]  }
 0x153   : > { %v7569_v56 = vpop.f32.mrb[45].mxu0 }
 0x154   : > { %v7570_v57 = vadd.f32 %v7569_v56, %v7568_v52  ;;  %v7571_v59 = vpop.f32.mrb[46].mxu0  ;;  %7904 = vmatpush3.bf16.msra.mxu0 %v9581_v47  ;;  %v9597_v52 = vld [vmem:[%s10559_s12] ss:$12 sps:$4 sm:$0xff]  }
 0x155   : > { %v7572_v61 = vpop.f32.mrb[47].mxu0  ;;  %8606 = vmatpush3.bf16.msra.mxu1 %v9586_v48  ;;  %7905 = vmatprep.subr.bf16.mxu0 %v9587_v51  ;;  %v9600_v51 = vld [vmem:[%s10559_s12 + $0x8] ss:$12 sps:$4 sm:$0xff]  }
 0x156   : > { %v10774_v63 = vadd.f32 %v7570_v57, %v10607_v11  ;;  %v7573_v0 = vadd.f32 %v7572_v61, %v7571_v59  ;;  %8580 = vmatmul.mubr.bf16.gmra.mrb[40].mxu1 %v9570_v49  ;;  %8607 = vmatprep.subr.bf16.mxu1 %v9893_v1  ;;  %v9601_v11 = vld [vmem:[%s11732_s1 + $0x40] sm:$0xff]  }
 0x157   : > { %3131 = vmatmul.mubr.bf16.gmra.mrb[152].mxu0 %v9571_v54  ;;  %8583 = vmatprep.mubr.msk.bf16.mxu1 %vm9894_vm0, %v9893_v1 }
 0x158   : > { %v10789_v5 = vadd.f32 %v7573_v0, %v10618_v17  ;;  %3138 = vmatprep.mubr.bf16.mxu0 %v9575_v60  ;;  %7906 = vmatpush3.bf16.msra.mxu0 %v9588_v2  ;;  %v9604_v0 = vld [vmem:[%s10559_s12 + $0x1c] ss:$12 sps:$4 sm:$0xff]  }
 0x159   : > { %8608 = vmatpush3.bf16.msra.mxu1 %v9593_v20  ;;  %7907 = vmatprep.subr.bf16.mxu0 %v9594_v62  ;;  %v9603_v62 = vld [vmem:[%s11732_s1 + $0x80] sm:$0xff]  }
 0x15a   : > { %v7574_v29 = vpop.f32.mrb[48].mxu0  ;;  %8609 = vmatprep.subr.bf16.mxu1 %v9893_v1 }
 0x15b   : > { %v7575_v9 = vpop.f32.mrb[49].mxu0 }
 0x15c   : > { %v7576_v10 = vadd.f32 %v7575_v9, %v7574_v29  ;;  %v7577_v12 = vpop.f32.mrb[50].mxu0  ;;  %7908 = vmatpush3.bf16.msra.mxu0 %v9595_v3 }
 0x15d   : > { %v7578_v17 = vpop.f32.mrb[51].mxu0  ;;  %8610 = vmatpush3.bf16.msra.mxu1 %v9596_v23  ;;  %7966 = vmatprep.subr.bf16.mxu0 %v9601_v11  ;;  %v9607_v23 = vld [vmem:[%s11732_s1 + $0x48] sm:$0xff]  }
 0x15e   : > { %v10796_v13 = vadd.f32 %v7576_v10, %v10636_v28  ;;  %v7579_v14 = vadd.f32 %v7578_v17, %v7577_v12  ;;  %8584 = vmatmul.mubr.bf16.gmra.mrb[44].mxu1 %v9577_v6  ;;  %8639 = vmatprep.subr.bf16.mxu1 %v9893_v1  ;;  %v9585_v28 = vld [vmem:[%s10471_s15 + $0x78] ss:$12 sps:$4 sm:$0xff]   ;;  %v9606_v10 = vld [vmem:[%s10559_s12 + $0x20] ss:$12 sps:$4 sm:$0xff]   ;;  %v9611_v12 = vld [vmem:[%s11732_s1 + $0x50] sm:$0xff]  }
 0x15f   : > { %3139 = vmatmul.mubr.bf16.gmra.mrb[156].mxu0 %v9578_v8  ;;  %8587 = vmatprep.mubr.msk.bf16.mxu1 %vm9894_vm0, %v9893_v1  ;;  %v9609_v8 = vld [vmem:[%s11732_s1 + $0x8] sm:$0xff]   ;;  %v9608_v17 = vld [vmem:[%s10559_s12 + $0x18] ss:$12 sps:$4 sm:$0xff]  }
 0x160   : > { %v10803_v15 = vadd.f32 %v7579_v14, %v10638_v32  ;;  %3146 = vmatprep.mubr.bf16.mxu0 %v9582_v35  ;;  %v9589_v32 = vld [vmem:[%s10471_s15 + $0x94] ss:$12 sps:$4 sm:$0xff]   ;;  %s10830_s15 = scalar_lea.vmem %s11733_s2, %s6504_s10 }
 0x162   : > { %v7580_v18 = vpop.f32.mrb[52].mxu0 }
 0x163   : > { %v7581_v19 = vpop.f32.mrb[53].mxu0 }
 0x164   : > { %v7582_v21 = vadd.f32 %v7581_v19, %v7580_v18  ;;  %v7583_v24 = vpop.f32.mrb[54].mxu0 }
 0x165   : > { %v7584_v25 = vpop.f32.mrb[55].mxu0 }
 0x166   : > { %v7585_v27 = vadd.f32 %v7584_v25, %v7583_v24  ;;  %8588 = vmatmul.mubr.bf16.gmra.mrb[48].mxu1 %v9584_v16  ;;  %v10816_v45 = vadd.f32 %v7582_v21, %v10646_v38  ;;  %v9615_v25 = vld [vmem:[%s11732_s1 + $0x10] sm:$0xff]  }
 0x167   : > { %3147 = vmatmul.mubr.bf16.gmra.mrb[160].mxu0 %v9585_v28  ;;  %8591 = vmatprep.mubr.msk.bf16.mxu1 %vm9894_vm0, %v9893_v1 }
 0x168   : > { %3154 = vmatprep.mubr.bf16.mxu0 %v9589_v32  ;;  %v10822_v31 = vadd.f32 %v7585_v27, %v10649_v42  ;;  %v9612_v32 = vld [vmem:[%s10559_s12 + $0x34] ss:$12 sps:$4 sm:$0xff]  }
 0x169   : > { %v1621_v33 = vpop.f32.mrb[0].mxu1  ;;  %v9617_v27 = vld [vmem:[%s11732_s1 + $0x90] sm:$0xff]  }
 0x16a   : > { %v7617_v50 = vpop.f32.mrb[56].mxu0  ;;  %v8437_v36 = vpop.f32.mrb[1].mxu1 }
 0x16b   : > { %v7618_v37 = vpop.f32.mrb[57].mxu0  ;;  %v1624_v39 = vpop.f32.mrb[2].mxu1  ;;  %v9619_v36 = vld [vmem:[%s11732_s1 + $0x18] sm:$0xff]  }
 0x16c   : > { %v7619_v38 = vadd.f32 %v7618_v37, %v7617_v50  ;;  %v7620_v40 = vpop.f32.mrb[58].mxu0  ;;  %v8438_v41 = vpop.f32.mrb[3].mxu1 }
 0x16d   : > { %v7621_v46 = vpop.f32.mrb[59].mxu0  ;;  %v9625_v41 = vld [vmem:[%s11732_s1 + $0x60] sm:$0xff]  }
 0x16e   : > { %v8860_v47 = vadd.f32 %v10662_v53, %v7619_v38  ;;  %v7622_v48 = vadd.f32 %v7621_v46, %v7620_v40  ;;  %8592 = vmatmul.mubr.bf16.gmra.mrb[52].mxu1 %v9591_v30  ;;  %v9614_v38 = vld [vmem:[%s10559_s12 + $0x38] ss:$12 sps:$4 sm:$0xff]  }
 0x16f   : > { %3155 = vmatmul.mubr.bf16.gmra.mrb[164].mxu0 %v9592_v34  ;;  %8611 = vmatprep.mubr.msk.bf16.mxu1 %vm9894_vm0, %v9893_v1 }
 0x170   : > { %v8861_v42 = vadd.f32 %v8860_v47, %v1621_v33  ;;  %v8863_v49 = vadd.f32 %v10667_v55, %v7622_v48  ;;  %3733 = vmatprep.mubr.bf16.mxu0 %v9599_v43  ;;  %v9602_v55 = vld [vmem:[%s11732_s1] sm:$0xff]   ;;  %v9618_v33 = vld [vmem:[%s11732_s1 + $0x58] sm:$0xff]  }
 0x171   : > { %v1629_v53 = vpop.f32.mrb[4].mxu1  ;;  %v9616_v47 = vld [vmem:[%s10559_s12 + $0x30] ss:$12 sps:$4 sm:$0xff]  }
 0x172   : > { %1690 = vst [vmem:[%s10830_s15] sm:$0xff] %v8861_v42  ;;  %v8864_v54 = vadd.f32 %v8863_v49, %v1624_v39  ;;  %v7623_v56 = vpop.f32.mrb[60].mxu0  ;;  %v8441_v57 = vpop.f32.mrb[5].mxu1 }
 0x173   : > { %v7624_v59 = vpop.f32.mrb[61].mxu0  ;;  %v1632_v60 = vpop.f32.mrb[6].mxu1  ;;  %v9631_v57 = vld [vmem:[%s11732_s1 + $0xa0] sm:$0xff]  }
 0x174   : > { %1691 = vst [vmem:[%s10830_s15 + $0x8] sm:$0xff] %v8864_v54  ;;  %v7625_v2 = vadd.f32 %v7624_v59, %v7623_v56  ;;  %v7626_v20 = vpop.f32.mrb[62].mxu0  ;;  %v8442_v61 = vpop.f32.mrb[7].mxu1  ;;  %v9626_v54 = vld [vmem:[%s11732_s1 + $0x20] sm:$0xff]   ;;  %v9632_v59 = vld [vmem:[%s11732_s1 + $0x68] sm:$0xff]  }
 0x175   : > { %v7627_v3 = vpop.f32.mrb[63].mxu0 }
 0x176   : > { %v8866_v11 = vadd.f32 %v10682_v4, %v7625_v2  ;;  %v7628_v6 = vadd.f32 %v7627_v3, %v7626_v20  ;;  %8612 = vmatmul.mubr.bf16.vlgmr.msra.gmra.mrb[56].mxu1 %v9600_v51  ;;  %v9610_v4 = vld [vmem:[%s11732_s1 + $0x88] sm:$0xff]   ;;  %v9639_v3 = vld [vmem:[%s11732_s1 + $0x70] sm:$0xff]  }
 0x177   : > { %3734 = vmatmul.mubr.bf16.vlgmr.msra.gmra.mrb[168].mxu0 %v9597_v52  ;;  %8615 = vmatprep.mubr.msk.bf16.mxu1 %vm9894_vm0, %v9893_v1  ;;  %v9620_v52 = vld [vmem:[%s10559_s12 + $0x4c] ss:$12 sps:$4 sm:$0xff]  }
 0x178   : > { %v8867_v29 = vadd.f32 %v8866_v11, %v1629_v53  ;;  %v8869_v9 = vadd.f32 %v10690_v7, %v7628_v6  ;;  %7967 = vmatpush3.bf16.msra.mxu0 %v9602_v55  ;;  %8640 = vmatpush3.bf16.msra.mxu1 %v9603_v62  ;;  %v9633_v20 = vld [vmem:[%s11732_s1 + $0x28] sm:$0xff]  }
 0x179   : > { %v1637_v35 = vpop.f32.mrb[8].mxu1  ;;  %3741 = vmatprep.mubr.bf16.mxu0 %v9604_v0  ;;  %7968 = vmatprep.subr.bf16.mxu0 %v9607_v23  ;;  %v9638_v62 = vld [vmem:[%s11732_s1 + $0xa8] sm:$0xff]  }
 0x17a   : > { %1692 = vst [vmem:[%s10830_s15 + $0x10] sm:$0xff] %v8867_v29  ;;  %v8870_v14 = vadd.f32 %v8869_v9, %v1632_v60  ;;  %v7629_v7 = vpop.f32.mrb[64].mxu0  ;;  %v8445_v16 = vpop.f32.mrb[9].mxu1  ;;  %8641 = vmatprep.subr.bf16.mxu1 %v9893_v1  ;;  %v9623_v6 = vld [vmem:[%s10559_s12 + $0x48] ss:$12 sps:$4 sm:$0xff]  }
 0x17b   : > { %v7630_v28 = vpop.f32.mrb[65].mxu0  ;;  %v1640_v18 = vpop.f32.mrb[10].mxu1 }
 0x17c   : > { %1693 = vst [vmem:[%s10830_s15 + $0x18] sm:$0xff] %v8870_v14  ;;  %v7631_v19 = vadd.f32 %v7630_v28, %v7629_v7  ;;  %v7632_v21 = vpop.f32.mrb[66].mxu0  ;;  %v8446_v24 = vpop.f32.mrb[11].mxu1  ;;  %7969 = vmatpush3.bf16.msra.mxu0 %v9609_v8  ;;  %8642 = vmatpush3.bf16.msra.mxu1 %v9610_v4  ;;  %v9645_v14 = vld [vmem:[%s11732_s1 + $0xb0] sm:$0xff]   ;;  %v9646_v7 = vld [vmem:[%s11732_s1 + $0x78] sm:$0xff]  }
 0x17d   : > { %v7633_v30 = vpop.f32.mrb[67].mxu0  ;;  %7970 = vmatprep.subr.bf16.mxu0 %v9611_v12  ;;  %8643 = vmatprep.subr.bf16.mxu1 %v9893_v1  ;;  %v9627_v12 = vld [vmem:[%s10559_s12 + $0x64] ss:$12 sps:$4 sm:$0xff]   ;;  %v9648_v24 = vld [vmem:[%s11732_s1 + $0xb8] sm:$0xff]  }
 0x17e   : > { %v8872_v34 = vadd.f32 %v10713_v22, %v7631_v19  ;;  %v7634_v50 = vadd.f32 %v7633_v30, %v7632_v21  ;;  %8616 = vmatmul.mubr.bf16.gmra.mrb[60].mxu1 %v9606_v10  ;;  %v9624_v22 = vld [vmem:[%s11732_s1 + $0x98] sm:$0xff]  }
 0x17f   : > { %3742 = vmatmul.mubr.bf16.gmra.mrb[172].mxu0 %v9608_v17  ;;  %8619 = vmatprep.mubr.msk.bf16.mxu1 %vm9894_vm0, %v9893_v1 }
 0x180   : > { %v8873_v37 = vadd.f32 %v8872_v34, %v1637_v35  ;;  %v8875_v39 = vadd.f32 %v10721_v26, %v7634_v50  ;;  %3749 = vmatprep.mubr.bf16.mxu0 %v9612_v32  ;;  %7971 = vmatpush3.bf16.msra.mxu0 %v9615_v25  ;;  %v9640_v35 = vld [vmem:[%s11732_s1 + $0x30] sm:$0xff]   ;;  %v9653_v25 = vld [vmem:[%s11732_s1 + $0x1c0] sm:$0xff]  }
 0x181   : > { %v1645_v40 = vpop.f32.mrb[12].mxu1  ;;  %8644 = vmatpush3.bf16.msra.mxu1 %v9617_v27  ;;  %7972 = vmatprep.subr.bf16.mxu0 %v9618_v33  ;;  %v9630_v33 = vld [vmem:[%s10559_s12 + $0x60] ss:$12 sps:$4 sm:$0xff]  }
 0x182   : > { %1694 = vst [vmem:[%s10830_s15 + $0x20] sm:$0xff] %v8873_v37  ;;  %v8876_v43 = vadd.f32 %v8875_v39, %v1640_v18  ;;  %v7635_v46 = vpop.f32.mrb[68].mxu0  ;;  %v8449_v26 = vpop.f32.mrb[13].mxu1  ;;  %8645 = vmatprep.subr.bf16.mxu1 %v9893_v1  ;;  %v9647_v18 = vld [vmem:[%s11732_s1 + $0x38] sm:$0xff]  }
 0x183   : > { %v7636_v48 = vpop.f32.mrb[69].mxu0  ;;  %v1648_v42 = vpop.f32.mrb[14].mxu1 }
 0x184   : > { %1695 = vst [vmem:[%s10830_s15 + $0x28] sm:$0xff] %v8876_v43  ;;  %v7637_v49 = vadd.f32 %v7636_v48, %v7635_v46  ;;  %v7638_v51 = vpop.f32.mrb[70].mxu0  ;;  %v8450_v53 = vpop.f32.mrb[15].mxu1  ;;  %7973 = vmatpush3.bf16.msra.mxu0 %v9619_v36 }
 0x185   : > { %v7639_v56 = vpop.f32.mrb[71].mxu0  ;;  %8646 = vmatpush3.bf16.msra.mxu1 %v9624_v22  ;;  %7974 = vmatprep.subr.bf16.mxu0 %v9625_v41 }
 0x186   : > { %v8878_v60 = vadd.f32 %v10743_v44, %v7637_v49  ;;  %v7640_v2 = vadd.f32 %v7639_v56, %v7638_v51  ;;  %8620 = vmatmul.mubr.bf16.gmra.mrb[64].mxu1 %v9614_v38  ;;  %8647 = vmatprep.subr.bf16.mxu1 %v9893_v1  ;;  %v9622_v44 = vld [vmem:[%s10559_s12 + $0x50] ss:$12 sps:$4 sm:$0xff]   ;;  %v9637_v49 = vld [vmem:[%s10559_s12 + $0x78] ss:$12 sps:$4 sm:$0xff]   ;;  %v9641_v56 = vld [vmem:[%s10559_s12 + $0x94] ss:$12 sps:$4 sm:$0xff]  }
 0x187   : > { %3750 = vmatmul.mubr.bf16.gmra.mrb[176].mxu0 %v9616_v47  ;;  %8623 = vmatprep.mubr.msk.bf16.mxu1 %vm9894_vm0, %v9893_v1  ;;  %v9634_v38 = vld [vmem:[%s10559_s12 + $0x7c] ss:$12 sps:$4 sm:$0xff]   ;;  %v9636_v47 = vld [vmem:[%s10559_s12 + $0x80] ss:$12 sps:$4 sm:$0xff]  }
 0x188   : > { %v8879_v61 = vadd.f32 %v8878_v60, %v1645_v40  ;;  %v8881_v55 = vadd.f32 %v10755_v58, %v7640_v2  ;;  %3757 = vmatprep.mubr.bf16.mxu0 %v9620_v52  ;;  %7975 = vmatpush3.bf16.msra.mxu0 %v9626_v54 }
 0x189   : > { %v1653_v0 = vpop.f32.mrb[16].mxu1  ;;  %8648 = vmatpush3.bf16.msra.mxu1 %v9631_v57  ;;  %7976 = vmatprep.subr.bf16.mxu0 %v9632_v59 }
 0x18a   : > { %1696 = vst [vmem:[%s10830_s15 + $0x30] sm:$0xff] %v8879_v61  ;;  %v8882_v23 = vadd.f32 %v8881_v55, %v1648_v42  ;;  %v7641_v11 = vpop.f32.mrb[72].mxu0  ;;  %v8453_v58 = vpop.f32.mrb[17].mxu1  ;;  %8649 = vmatprep.subr.bf16.mxu1 %v9893_v1  ;;  %v9643_v61 = vld [vmem:[%s10559_s12 + $0x98] ss:$12 sps:$4 sm:$0xff]  }
 0x18b   : > { %v7642_v8 = vpop.f32.mrb[73].mxu0  ;;  %v1656_v29 = vpop.f32.mrb[18].mxu1  ;;  %v9644_v55 = vld [vmem:[%s10559_s12 + $0x90] ss:$12 sps:$4 sm:$0xff]  }
 0x18c   : > { %1697 = vst [vmem:[%s10830_s15 + $0x38] sm:$0xff] %v8882_v23  ;;  %v7643_v9 = vadd.f32 %v7642_v8, %v7641_v11  ;;  %v7644_v10 = vpop.f32.mrb[74].mxu0  ;;  %v8454_v4 = vpop.f32.mrb[19].mxu1  ;;  %7977 = vmatpush3.bf16.msra.mxu0 %v9633_v20  ;;  %v9651_v23 = vld [vmem:[%s10659_s14 + $0x4] ss:$12 sps:$4 sm:$0xff]  }
 0x18d   : > { %v7645_v17 = vpop.f32.mrb[75].mxu0  ;;  %8650 = vmatpush3.bf16.msra.mxu1 %v9638_v62  ;;  %7978 = vmatprep.subr.bf16.mxu0 %v9639_v3  ;;  %v9654_v4 = vld [vmem:[%s11732_s1 + $0x180] sm:$0xff]  }
 0x18e   : > { %v8884_v16 = vadd.f32 %v10774_v63, %v7643_v9  ;;  %v7646_v28 = vadd.f32 %v7645_v17, %v7644_v10  ;;  %8624 = vmatmul.mubr.bf16.gmra.mrb[68].mxu1 %v9622_v44  ;;  %8651 = vmatprep.subr.bf16.mxu1 %v9893_v1  ;;  %v9629_v63 = vld [vmem:[%s10559_s12 + $0x68] ss:$12 sps:$4 sm:$0xff]  }
 0x18f   : > { %3758 = vmatmul.mubr.bf16.gmra.mrb[180].mxu0 %v9623_v6  ;;  %8627 = vmatprep.mubr.msk.bf16.mxu1 %vm9894_vm0, %v9893_v1  ;;  %v9649_v6 = vld [vmem:[%s10659_s14] ss:$12 sps:$4 sm:$0xff]   ;;  %v9656_v17 = vld [vmem:[%s10659_s14 + $0x1c] ss:$12 sps:$4 sm:$0xff]  }
 0x190   : > { %v8885_v19 = vadd.f32 %v8884_v16, %v1653_v0  ;;  %v8887_v21 = vadd.f32 %v10789_v5, %v7646_v28  ;;  %3765 = vmatprep.mubr.bf16.mxu0 %v9627_v12  ;;  %7979 = vmatpush3.bf16.msra.mxu0 %v9640_v35  ;;  %v9655_v12 = vld [vmem:[%s11732_s1 + $0x200] sm:$0xff]   ;;  %v9661_v16 = vld [vmem:[%s11732_s1 + $0x188] sm:$0xff]  }
 0x191   : > { %v1661_v32 = vpop.f32.mrb[20].mxu1  ;;  %8652 = vmatpush3.bf16.msra.mxu1 %v9645_v14  ;;  %7980 = vmatprep.subr.bf16.mxu0 %v9646_v7  ;;  %v9659_v14 = vld [vmem:[%s11732_s1 + $0x1c8] sm:$0xff]  }
 0x192   : > { %1698 = vst [vmem:[%s10830_s15 + $0x40] sm:$0xff] %v8885_v19  ;;  %v8888_v27 = vadd.f32 %v8887_v21, %v1656_v29  ;;  %v7647_v30 = vpop.f32.mrb[76].mxu0  ;;  %v8457_v5 = vpop.f32.mrb[21].mxu1  ;;  %8653 = vmatprep.subr.bf16.mxu1 %v9893_v1  ;;  %v9662_v28 = vld [vmem:[%s11732_s1 + $0x208] sm:$0xff]   ;;  %v9660_v21 = vld [vmem:[%s10659_s14 + $0x18] ss:$12 sps:$4 sm:$0xff]  }
 0x193   : > { %v7648_v34 = vpop.f32.mrb[77].mxu0  ;;  %v1664_v50 = vpop.f32.mrb[22].mxu1  ;;  %v9658_v19 = vld [vmem:[%s10659_s14 + $0x20] ss:$12 sps:$4 sm:$0xff]  }
 0x194   : > { %1699 = vst [vmem:[%s10830_s15 + $0x48] sm:$0xff] %v8888_v27  ;;  %v7649_v36 = vadd.f32 %v7648_v34, %v7647_v30  ;;  %v7650_v37 = vpop.f32.mrb[78].mxu0  ;;  %v8458_v39 = vpop.f32.mrb[23].mxu1  ;;  %7981 = vmatpush3.bf16.msra.mxu0 %v9647_v18  ;;  %v9663_v18 = vld [vmem:[%s11732_s1 + $0x1d0] sm:$0xff]   ;;  %v9670_v34 = vld [vmem:[%s11732_s1 + $0x1d8] sm:$0xff]  }
 0x195   : > { %v7651_v22 = vpop.f32.mrb[79].mxu0  ;;  %8654 = vmatpush3.bf16.msra.mxu1 %v9648_v24  ;;  %8039 = vmatprep.subr.bf16.mxu0 %v9653_v25  ;;  %v9664_v27 = vld [vmem:[%s10659_s14 + $0x34] ss:$12 sps:$4 sm:$0xff]  }
 0x196   : > { %v8890_v40 = vadd.f32 %v10796_v13, %v7649_v36  ;;  %v7652_v41 = vadd.f32 %v7651_v22, %v7650_v37  ;;  %8628 = vmatmul.mubr.bf16.gmra.mrb[72].mxu1 %v9629_v63  ;;  %8683 = vmatprep.subr.bf16.mxu1 %v9893_v1  ;;  %v9667_v30 = vld [vmem:[%s11732_s1 + $0x190] sm:$0xff]   ;;  %v9671_v36 = vld [vmem:[%s11732_s1 + $0x198] sm:$0xff]   ;;  %v9677_v39 = vld [vmem:[%s11732_s1 + $0x1e0] sm:$0xff]  }
 0x197   : > { %3766 = vmatmul.mubr.bf16.gmra.mrb[184].mxu0 %v9630_v33  ;;  %8631 = vmatprep.mubr.msk.bf16.mxu1 %vm9894_vm0, %v9893_v1  ;;  %v9669_v33 = vld [vmem:[%s11732_s1 + $0x210] sm:$0xff]   ;;  %v9676_v37 = vld [vmem:[%s11732_s1 + $0x218] sm:$0xff]  }
 0x198   : > { %v8891_v43 = vadd.f32 %v8890_v40, %v1661_v32  ;;  %v8893_v46 = vadd.f32 %v10803_v15, %v7652_v41  ;;  %3773 = vmatprep.mubr.bf16.mxu0 %v9634_v38  ;;  %v9666_v38 = vld [vmem:[%s10659_s14 + $0x38] ss:$12 sps:$4 sm:$0xff]   ;;  %v9668_v40 = vld [vmem:[%s10659_s14 + $0x30] ss:$12 sps:$4 sm:$0xff]  }
 0x199   : > { %v1669_v26 = vpop.f32.mrb[24].mxu1 }
 0x19a   : > { %1700 = vst [vmem:[%s10830_s15 + $0x50] sm:$0xff] %v8891_v43  ;;  %v8894_v13 = vadd.f32 %v8893_v46, %v1664_v50  ;;  %v7653_v48 = vpop.f32.mrb[80].mxu0  ;;  %v8461_v42 = vpop.f32.mrb[25].mxu1 }
 0x19b   : > { %v7654_v51 = vpop.f32.mrb[81].mxu0  ;;  %v1672_v53 = vpop.f32.mrb[26].mxu1  ;;  %v9684_v42 = vld [vmem:[%s11732_s1 + $0x1e8] sm:$0xff]  }
 0x19c   : > { %1701 = vst [vmem:[%s10830_s15 + $0x58] sm:$0xff] %v8894_v13  ;;  %v7655_v15 = vadd.f32 %v7654_v51, %v7653_v48  ;;  %v7656_v52 = vpop.f32.mrb[82].mxu0  ;;  %v8462_v54 = vpop.f32.mrb[27].mxu1  ;;  %v9683_v48 = vld [vmem:[%s11732_s1 + $0x220] sm:$0xff]   ;;  %v9685_v51 = vld [vmem:[%s11732_s1 + $0x1a8] sm:$0xff]  }
 0x19d   : > { %v7657_v57 = vpop.f32.mrb[83].mxu0 }
 0x19e   : > { %v8896_v59 = vadd.f32 %v10816_v45, %v7655_v15  ;;  %v7658_v60 = vadd.f32 %v7657_v57, %v7656_v52  ;;  %8632 = vmatmul.mubr.bf16.gmra.mrb[76].mxu1 %v9636_v47  ;;  %v9678_v47 = vld [vmem:[%s11732_s1 + $0x1a0] sm:$0xff]   ;;  %v9691_v15 = vld [vmem:[%s11732_s1 + $0x1f0] sm:$0xff]  }
 0x19f   : > { %3774 = vmatmul.mubr.bf16.gmra.mrb[188].mxu0 %v9637_v49  ;;  %8635 = vmatprep.mubr.msk.bf16.mxu1 %vm9894_vm0, %v9893_v1  ;;  %v9674_v52 = vld [vmem:[%s10659_s14 + $0x50] ss:$12 sps:$4 sm:$0xff]  }
 0x1a0   : > { %v8897_v2 = vadd.f32 %v8896_v59, %v1669_v26  ;;  %v8899_v20 = vadd.f32 %v10822_v31, %v7658_v60  ;;  %3781 = vmatprep.mubr.bf16.mxu0 %v9641_v56  ;;  %v9652_v31 = vld [vmem:[%s10659_s14 + $0x8] ss:$12 sps:$4 sm:$0xff]   ;;  %v9672_v26 = vld [vmem:[%s10659_s14 + $0x4c] ss:$12 sps:$4 sm:$0xff]  }
 0x1a1   : > { %v9675_v56 = vld [vmem:[%s10659_s14 + $0x48] ss:$12 sps:$4 sm:$0xff]  }
 0x1a2   : > { %1702 = vst [vmem:[%s10830_s15 + $0x60] sm:$0xff] %v8897_v2  ;;  %v8900_v44 = vadd.f32 %v8899_v20, %v1672_v53  ;;  %v7690_v62 = vpop.f32.mrb[84].mxu0  ;;  %v9690_v53 = vld [vmem:[%s11732_s1 + $0x228] sm:$0xff]   ;;  %v9679_v2 = vld [vmem:[%s10659_s14 + $0x64] ss:$12 sps:$4 sm:$0xff]  }
 0x1a3   : > { %v7691_v0 = vpop.f32.mrb[85].mxu0  ;;  %v9692_v20 = vld [vmem:[%s11732_s1 + $0x1b0] sm:$0xff]  }
 0x1a4   : > { %1703 = vst [vmem:[%s10830_s15 + $0x68] sm:$0xff] %v8900_v44  ;;  %v10979_v45 = vadd.f32 %v7691_v0, %v7690_v62  ;;  %v7693_v3 = vpop.f32.mrb[86].mxu0  ;;  %v9698_v44 = vld [vmem:[%s11732_s1 + $0x1f8] sm:$0xff]  }
 0x1a5   : > { %v7694_v11 = vpop.f32.mrb[87].mxu0  ;;  %v9699_v0 = vld [vmem:[%s11732_s1 + $0x1b8] sm:$0xff]  }
 0x1a6   : > { %v10982_v58 = vadd.f32 %v7694_v11, %v7693_v3  ;;  %8636 = vmatmul.mubr.bf16.gmra.mrb[80].mxu1 %v9643_v61  ;;  %v9700_v3 = vld [vmem:[%s11732_s1 + $0x238] sm:$0xff]  }
 0x1a7   : > { %3782 = vmatmul.mubr.bf16.gmra.mrb[192].mxu0 %v9644_v55  ;;  %8655 = vmatprep.mubr.msk.bf16.mxu1 %vm9894_vm0, %v9893_v1  ;;  %v9697_v55 = vld [vmem:[%s11732_s1 + $0x230] sm:$0xff]  }
 0x1a8   : > { %4167 = vmatprep.mubr.bf16.mxu0 %v9651_v23  ;;  %v9705_v23 = vld [vmem:[%s11732_s1 + $0x100] sm:$0xff]  }
 0x1aa   : > { %v7696_v8 = vpop.f32.mrb[88].mxu0 }
 0x1ab   : > { %v7697_v29 = vpop.f32.mrb[89].mxu0 }
 0x1ac   : > { %v10988_v9 = vadd.f32 %v7697_v29, %v7696_v8  ;;  %v7699_v10 = vpop.f32.mrb[90].mxu0  ;;  %v9682_v8 = vld [vmem:[%s10659_s14 + $0x60] ss:$12 sps:$4 sm:$0xff]  }
 0x1ad   : > { %v7700_v35 = vpop.f32.mrb[91].mxu0 }
 0x1ae   : > { %v11000_v7 = vadd.f32 %v7700_v35, %v7699_v10  ;;  %8656 = vmatmul.mubr.bf16.vlgmr.msra.gmra.mrb[56].mxu1 %v9652_v31  ;;  %v9681_v31 = vld [vmem:[%s10659_s14 + $0x68] ss:$12 sps:$4 sm:$0xff]  }
 0x1af   : > { %4168 = vmatmul.mubr.bf16.vlgmr.msra.gmra.mrb[196].mxu0 %v9649_v6  ;;  %8659 = vmatprep.mubr.msk.bf16.mxu1 %vm9894_vm0, %v9893_v1 }
 0x1b0   : > { %8040 = vmatpush3.bf16.msra.mxu0 %v9654_v4  ;;  %8684 = vmatpush3.bf16.msra.mxu1 %v9655_v12  ;;  %v9686_v4 = vld [vmem:[%s10659_s14 + $0x7c] ss:$12 sps:$4 sm:$0xff]  }
 0x1b1   : > { %4175 = vmatprep.mubr.bf16.mxu0 %v9656_v17  ;;  %8041 = vmatprep.subr.bf16.mxu0 %v9659_v14  ;;  %v9688_v14 = vld [vmem:[%s10659_s14 + $0x80] ss:$12 sps:$4 sm:$0xff]  }
 0x1b2   : > { %v7702_v63 = vpop.f32.mrb[92].mxu0  ;;  %8685 = vmatprep.subr.bf16.mxu1 %v9893_v1 }
 0x1b3   : > { %v7703_v24 = vpop.f32.mrb[93].mxu0 }
 0x1b4   : > { %v11016_v32 = vadd.f32 %v7703_v24, %v7702_v63  ;;  %v7705_v25 = vpop.f32.mrb[94].mxu0  ;;  %8042 = vmatpush3.bf16.msra.mxu0 %v9661_v16  ;;  %8686 = vmatpush3.bf16.msra.mxu1 %v9662_v28  ;;  %v9689_v28 = vld [vmem:[%s10659_s14 + $0x78] ss:$12 sps:$4 sm:$0xff]  }
 0x1b5   : > { %v7706_v5 = vpop.f32.mrb[95].mxu0  ;;  %8043 = vmatprep.subr.bf16.mxu0 %v9663_v18  ;;  %8687 = vmatprep.subr.bf16.mxu1 %v9893_v1 }
 0x1b6   : > { %v11029_v50 = vadd.f32 %v7706_v5, %v7705_v25  ;;  %8660 = vmatmul.mubr.bf16.gmra.mrb[60].mxu1 %v9658_v19  ;;  %v9695_v25 = vld [vmem:[%s10659_s14 + $0x98] ss:$12 sps:$4 sm:$0xff]  }
 0x1b7   : > { %4176 = vmatmul.mubr.bf16.gmra.mrb[200].mxu0 %v9660_v21  ;;  %8663 = vmatprep.mubr.msk.bf16.mxu1 %vm9894_vm0, %v9893_v1  ;;  %v9693_v21 = vld [vmem:[%s10659_s14 + $0x94] ss:$12 sps:$4 sm:$0xff]  }
 0x1b8   : > { %4183 = vmatprep.mubr.bf16.mxu0 %v9664_v27  ;;  %8044 = vmatpush3.bf16.msra.mxu0 %v9667_v30  ;;  %v9696_v27 = vld [vmem:[%s10659_s14 + $0x90] ss:$12 sps:$4 sm:$0xff]  }
 0x1b9   : > { %8688 = vmatpush3.bf16.msra.mxu1 %v9669_v33  ;;  %8045 = vmatprep.subr.bf16.mxu0 %v9670_v34 }
 0x1ba   : > { %v7708_v22 = vpop.f32.mrb[96].mxu0  ;;  %8689 = vmatprep.subr.bf16.mxu1 %v9893_v1 }
 0x1bb   : > { %v7709_v41 = vpop.f32.mrb[97].mxu0 }
 0x1bc   : > { %v11045_v43 = vadd.f32 %v7709_v41, %v7708_v22  ;;  %v7711_v46 = vpop.f32.mrb[98].mxu0  ;;  %8046 = vmatpush3.bf16.msra.mxu0 %v9671_v36  ;;  %v9703_v36 = vld [vmem:[%s10812_s4 + $0x4] ss:$12 sps:$4 sm:$0xff]   ;;  %v9704_v41 = vld [vmem:[%s10812_s4 + $0x8] ss:$12 sps:$4 sm:$0xff]  }
 0x1bd   : > { %v7712_v13 = vpop.f32.mrb[99].mxu0  ;;  %8690 = vmatpush3.bf16.msra.mxu1 %v9676_v37  ;;  %8047 = vmatprep.subr.bf16.mxu0 %v9677_v39 }
 0x1be   : > { %v11057_v49 = vadd.f32 %v7712_v13, %v7711_v46  ;;  %8664 = vmatmul.mubr.bf16.gmra.mrb[64].mxu1 %v9666_v38  ;;  %8691 = vmatprep.subr.bf16.mxu1 %v9893_v1 }
 0x1bf   : > { %4184 = vmatmul.mubr.bf16.gmra.mrb[204].mxu0 %v9668_v40  ;;  %8667 = vmatprep.mubr.msk.bf16.mxu1 %vm9894_vm0, %v9893_v1 }
 0x1c0   : > { %4191 = vmatprep.mubr.bf16.mxu0 %v9672_v26  ;;  %8048 = vmatpush3.bf16.msra.mxu0 %v9678_v47  ;;  %v9701_v26 = vld [vmem:[%s10812_s4] ss:$12 sps:$4 sm:$0xff]  }
 0x1c1   : > { %8692 = vmatpush3.bf16.msra.mxu1 %v9683_v48  ;;  %8049 = vmatprep.subr.bf16.mxu0 %v9684_v42  ;;  %v9707_v48 = vld [vmem:[%s11732_s1 + $0x140] sm:$0xff]  }
 0x1c2   : > { %v7714_v54 = vpop.f32.mrb[100].mxu0  ;;  %8693 = vmatprep.subr.bf16.mxu1 %v9893_v1 }
 0x1c3   : > { %v7715_v57 = vpop.f32.mrb[101].mxu0 }
 0x1c4   : > { %v11074_v59 = vadd.f32 %v7715_v57, %v7714_v54  ;;  %v7717_v60 = vpop.f32.mrb[102].mxu0  ;;  %8050 = vmatpush3.bf16.msra.mxu0 %v9685_v51  ;;  %v9708_v51 = vld [vmem:[%s10812_s4 + $0x1c] ss:$12 sps:$4 sm:$0xff]  }
 0x1c5   : > { %v7718_v61 = vpop.f32.mrb[103].mxu0  ;;  %8694 = vmatpush3.bf16.msra.mxu1 %v9690_v53  ;;  %8051 = vmatprep.subr.bf16.mxu0 %v9691_v15  ;;  %v9713_v54 = vld [vmem:[%s11732_s1 + $0xc8] sm:$0xff]  }
 0x1c6   : > { %v11086_v62 = vadd.f32 %v7718_v61, %v7717_v60  ;;  %8668 = vmatmul.mubr.bf16.gmra.mrb[68].mxu1 %v9674_v52  ;;  %8695 = vmatprep.subr.bf16.mxu1 %v9893_v1 }
 0x1c7   : > { %4192 = vmatmul.mubr.bf16.gmra.mrb[208].mxu0 %v9675_v56  ;;  %8671 = vmatprep.mubr.msk.bf16.mxu1 %vm9894_vm0, %v9893_v1  ;;  %v9715_v56 = vld [vmem:[%s11732_s1 + $0x110] sm:$0xff]  }
 0x1c8   : > { %4199 = vmatprep.mubr.bf16.mxu0 %v9679_v2  ;;  %8052 = vmatpush3.bf16.msra.mxu0 %v9692_v20  ;;  %v9712_v2 = vld [vmem:[%s10812_s4 + $0x18] ss:$12 sps:$4 sm:$0xff]  }
 0x1c9   : > { %8696 = vmatpush3.bf16.msra.mxu1 %v9697_v55  ;;  %8053 = vmatprep.subr.bf16.mxu0 %v9698_v44  ;;  %v9716_v55 = vld [vmem:[%s10812_s4 + $0x34] ss:$12 sps:$4 sm:$0xff]  }
 0x1ca   : > { %v7720_v11 = vpop.f32.mrb[104].mxu0  ;;  %8697 = vmatprep.subr.bf16.mxu1 %v9893_v1  ;;  %v9719_v44 = vld [vmem:[%s11732_s1 + $0xd0] sm:$0xff]  }
 0x1cb   : > { %v7721_v6 = vpop.f32.mrb[105].mxu0 }
 0x1cc   : > { %v11103_v29 = vadd.f32 %v7721_v6, %v7720_v11  ;;  %v7723_v10 = vpop.f32.mrb[106].mxu0  ;;  %8054 = vmatpush3.bf16.msra.mxu0 %v9699_v0 }
 0x1cd   : > { %v7724_v12 = vpop.f32.mrb[107].mxu0  ;;  %8698 = vmatpush3.bf16.msra.mxu1 %v9700_v3  ;;  %8112 = vmatprep.subr.bf16.mxu0 %v9705_v23  ;;  %v9721_v3 = vld [vmem:[%s11732_s1 + $0x150] sm:$0xff]   ;;  %v9722_v23 = vld [vmem:[%s11732_s1 + $0x118] sm:$0xff]  }
 0x1ce   : > { %v11106_v35 = vadd.f32 %v7724_v12, %v7723_v10  ;;  %8672 = vmatmul.mubr.bf16.gmra.mrb[72].mxu1 %v9681_v31  ;;  %8727 = vmatprep.subr.bf16.mxu1 %v9893_v1  ;;  %v9729_v10 = vld [vmem:[%s11732_s1 + $0x120] sm:$0xff]  }
 0x1cf   : > { %4200 = vmatmul.mubr.bf16.gmra.mrb[212].mxu0 %v9682_v8  ;;  %8675 = vmatprep.mubr.msk.bf16.mxu1 %vm9894_vm0, %v9893_v1  ;;  %v9723_v8 = vld [vmem:[%s11732_s1 + $0xd8] sm:$0xff]  }
 0x1d0   : > { %4207 = vmatprep.mubr.bf16.mxu0 %v9686_v4 }
 0x1d2   : > { %v7726_v17 = vpop.f32.mrb[108].mxu0 }
 0x1d3   : > { %v7727_v16 = vpop.f32.mrb[109].mxu0 }
 0x1d4   : > { %v11119_v18 = vadd.f32 %v7727_v16, %v7726_v17  ;;  %v7729_v19 = vpop.f32.mrb[110].mxu0  ;;  %v9720_v17 = vld [vmem:[%s10812_s4 + $0x30] ss:$12 sps:$4 sm:$0xff]  }
 0x1d5   : > { %v7730_v63 = vpop.f32.mrb[111].mxu0 }
 0x1d6   : > { %v11122_v24 = vadd.f32 %v7730_v63, %v7729_v19  ;;  %8676 = vmatmul.mubr.bf16.gmra.mrb[76].mxu1 %v9688_v14  ;;  %v9730_v19 = vld [vmem:[%s11732_s1 + $0xe0] sm:$0xff]  }
 0x1d7   : > { %4208 = vmatmul.mubr.bf16.gmra.mrb[216].mxu0 %v9689_v28  ;;  %8679 = vmatprep.mubr.msk.bf16.mxu1 %vm9894_vm0, %v9893_v1  ;;  %v9724_v28 = vld [vmem:[%s10812_s4 + $0x4c] ss:$12 sps:$4 sm:$0xff]   ;;  %v9735_v63 = vld [vmem:[%s11732_s1 + $0x160] sm:$0xff]  }
 0x1d8   : > { %4215 = vmatprep.mubr.bf16.mxu0 %v9693_v21 }
 0x1da   : > { %v7763_v30 = vpop.f32.mrb[112].mxu0 }
 0x1db   : > { %v7764_v5 = vpop.f32.mrb[113].mxu0 }
 0x1dc   : > { %v7765_v33 = vadd.f32 %v7764_v5, %v7763_v30  ;;  %v7766_v34 = vpop.f32.mrb[114].mxu0 }
 0x1dd   : > { %v7767_v37 = vpop.f32.mrb[115].mxu0 }
 0x1de   : > { %v11130_v39 = vadd.f32 %v7765_v33, %v10979_v45  ;;  %v7768_v38 = vadd.f32 %v7767_v37, %v7766_v34  ;;  %8680 = vmatmul.mubr.bf16.gmra.mrb[80].mxu1 %v9695_v25  ;;  %v9706_v45 = vld [vmem:[%s11732_s1 + $0xc0] sm:$0xff]   ;;  %v9736_v25 = vld [vmem:[%s11732_s1 + $0x128] sm:$0xff]   ;;  %v9743_v34 = vld [vmem:[%s11732_s1 + $0x130] sm:$0xff]  }
 0x1df   : > { %4216 = vmatmul.mubr.bf16.gmra.mrb[220].mxu0 %v9696_v27  ;;  %8699 = vmatprep.mubr.msk.bf16.mxu1 %vm9894_vm0, %v9893_v1  ;;  %v9742_v33 = vld [vmem:[%s11732_s1 + $0x168] sm:$0xff]   ;;  %v9726_v37 = vld [vmem:[%s10812_s4 + $0x50] ss:$12 sps:$4 sm:$0xff]  }
 0x1e0   : > { %v11135_v22 = vadd.f32 %v7768_v38, %v10982_v58  ;;  %4682 = vmatprep.mubr.bf16.mxu0 %v9703_v36  ;;  %v9711_v58 = vld [vmem:[%s11732_s1 + $0x108] sm:$0xff]  }
 0x1e1   : > { %v9727_v38 = vld [vmem:[%s10812_s4 + $0x48] ss:$12 sps:$4 sm:$0xff]  }
 0x1e2   : > { %v7769_v40 = vpop.f32.mrb[116].mxu0 }
 0x1e3   : > { %v7770_v46 = vpop.f32.mrb[117].mxu0 }
 0x1e4   : > { %v7771_v47 = vadd.f32 %v7770_v46, %v7769_v40  ;;  %v7772_v13 = vpop.f32.mrb[118].mxu0  ;;  %v9731_v46 = vld [vmem:[%s10812_s4 + $0x64] ss:$12 sps:$4 sm:$0xff]  }
 0x1e5   : > { %v7773_v42 = vpop.f32.mrb[119].mxu0 }
 0x1e6   : > { %v11150_v53 = vadd.f32 %v7771_v47, %v10988_v9  ;;  %v7774_v15 = vadd.f32 %v7773_v42, %v7772_v13  ;;  %8700 = vmatmul.mubr.bf16.vlgmr.msra.gmra.mrb[56].mxu1 %v9704_v41  ;;  %v9714_v9 = vld [vmem:[%s11732_s1 + $0x148] sm:$0xff]   ;;  %v9749_v13 = vld [vmem:[%s11732_s1 + $0x170] sm:$0xff]  }
 0x1e7   : > { %4683 = vmatmul.mubr.bf16.vlgmr.msra.gmra.mrb[224].mxu0 %v9701_v26  ;;  %8703 = vmatprep.mubr.msk.bf16.mxu1 %vm9894_vm0, %v9893_v1  ;;  %v9744_v26 = vld [vmem:[%s11732_s1 + $0xf0] sm:$0xff]  }
 0x1e8   : > { %v11155_v52 = vadd.f32 %v7774_v15, %v11000_v7  ;;  %8113 = vmatpush3.bf16.msra.mxu0 %v9706_v45  ;;  %8728 = vmatpush3.bf16.msra.mxu1 %v9707_v48  ;;  %v9710_v7 = vld [vmem:[%s10812_s4 + $0x20] ss:$12 sps:$4 sm:$0xff]   ;;  %v9750_v45 = vld [vmem:[%s11732_s1 + $0x138] sm:$0xff]  }
 0x1e9   : > { %4690 = vmatprep.mubr.bf16.mxu0 %v9708_v51  ;;  %8114 = vmatprep.subr.bf16.mxu0 %v9711_v58  ;;  %v9752_v58 = vld [vmem:[%s11732_s1 + $0x178] sm:$0xff]   ;;  %v9757_v15 = vld [vmem:[%s11732_s1 + $0x40] sm:$0xff]  }
 0x1ea   : > { %v7775_v57 = vpop.f32.mrb[120].mxu0  ;;  %8729 = vmatprep.subr.bf16.mxu1 %v9893_v1 }
 0x1eb   : > { %v7776_v60 = vpop.f32.mrb[121].mxu0 }
 0x1ec   : > { %v7777_v20 = vadd.f32 %v7776_v60, %v7775_v57  ;;  %v7778_v61 = vpop.f32.mrb[122].mxu0  ;;  %8115 = vmatpush3.bf16.msra.mxu0 %v9713_v54  ;;  %8730 = vmatpush3.bf16.msra.mxu1 %v9714_v9  ;;  %v9733_v9 = vld [vmem:[%s10812_s4 + $0x68] ss:$12 sps:$4 sm:$0xff]  }
 0x1ed   : > { %v7779_v0 = vpop.f32.mrb[123].mxu0  ;;  %8116 = vmatprep.subr.bf16.mxu0 %v9715_v56  ;;  %8731 = vmatprep.subr.bf16.mxu1 %v9893_v1  ;;  %v9734_v56 = vld [vmem:[%s10812_s4 + $0x60] ss:$12 sps:$4 sm:$0xff]   ;;  %v9738_v60 = vld [vmem:[%s10812_s4 + $0x7c] ss:$12 sps:$4 sm:$0xff]  }
 0x1ee   : > { %v11181_v11 = vadd.f32 %v7777_v20, %v11016_v32  ;;  %v7780_v31 = vadd.f32 %v7779_v0, %v7778_v61  ;;  %8704 = vmatmul.mubr.bf16.gmra.mrb[60].mxu1 %v9710_v7  ;;  %v9728_v32 = vld [vmem:[%s11732_s1 + $0x158] sm:$0xff]  }
 0x1ef   : > { %4691 = vmatmul.mubr.bf16.gmra.mrb[228].mxu0 %v9712_v2  ;;  %8707 = vmatprep.mubr.msk.bf16.mxu1 %vm9894_vm0, %v9893_v1 }
 0x1f0   : > { %v11186_v6 = vadd.f32 %v7780_v31, %v11029_v50  ;;  %4698 = vmatprep.mubr.bf16.mxu0 %v9716_v55  ;;  %8117 = vmatpush3.bf16.msra.mxu0 %v9719_v44  ;;  %v9718_v50 = vld [vmem:[%s10812_s4 + $0x38] ss:$12 sps:$4 sm:$0xff]  }
 0x1f1   : > { %8732 = vmatpush3.bf16.msra.mxu1 %v9721_v3  ;;  %8118 = vmatprep.subr.bf16.mxu0 %v9722_v23  ;;  %v9741_v3 = vld [vmem:[%s10812_s4 + $0x78] ss:$12 sps:$4 sm:$0xff]  }
 0x1f2   : > { %v7781_v4 = vpop.f32.mrb[124].mxu0  ;;  %8733 = vmatprep.subr.bf16.mxu1 %v9893_v1 }
 0x1f3   : > { %v7782_v12 = vpop.f32.mrb[125].mxu0 }
 0x1f4   : > { %v7783_v14 = vadd.f32 %v7782_v12, %v7781_v4  ;;  %v7784_v16 = vpop.f32.mrb[126].mxu0  ;;  %8119 = vmatpush3.bf16.msra.mxu0 %v9723_v8  ;;  %v9745_v8 = vld [vmem:[%s10812_s4 + $0x94] ss:$12 sps:$4 sm:$0xff]  }
 0x1f5   : > { %v7785_v21 = vpop.f32.mrb[127].mxu0  ;;  %8734 = vmatpush3.bf16.msra.mxu1 %v9728_v32  ;;  %8120 = vmatprep.subr.bf16.mxu0 %v9729_v10 }
 0x1f6   : > { %v11211_v27 = vadd.f32 %v7783_v14, %v11045_v43  ;;  %v7786_v30 = vadd.f32 %v7785_v21, %v7784_v16  ;;  %8708 = vmatmul.mubr.bf16.gmra.mrb[64].mxu1 %v9718_v50  ;;  %8735 = vmatprep.subr.bf16.mxu1 %v9893_v1  ;;  %v9737_v43 = vld [vmem:[%s11732_s1 + $0xe8] sm:$0xff]   ;;  %v9747_v50 = vld [vmem:[%s10812_s4 + $0x98] ss:$12 sps:$4 sm:$0xff]  }
 0x1f7   : > { %4699 = vmatmul.mubr.bf16.gmra.mrb[232].mxu0 %v9720_v17  ;;  %8711 = vmatprep.mubr.msk.bf16.mxu1 %vm9894_vm0, %v9893_v1  ;;  %v9748_v17 = vld [vmem:[%s10812_s4 + $0x90] ss:$12 sps:$4 sm:$0xff]  }
 0x1f8   : > { %v11217_v5 = vadd.f32 %v7786_v30, %v11057_v49  ;;  %4706 = vmatprep.mubr.bf16.mxu0 %v9724_v28  ;;  %8121 = vmatpush3.bf16.msra.mxu0 %v9730_v19 }
 0x1f9   : > { %8736 = vmatpush3.bf16.msra.mxu1 %v9735_v63  ;;  %8122 = vmatprep.subr.bf16.mxu0 %v9736_v25  ;;  %v9755_v25 = vld [vmem:[%s10967_s16 + $0x4] ss:$12 sps:$4 sm:$0xff]  }
 0x1fa   : > { %v7787_v36 = vpop.f32.mrb[128].mxu0  ;;  %8737 = vmatprep.subr.bf16.mxu1 %v9893_v1 }
 0x1fb   : > { %v7788_v49 = vpop.f32.mrb[129].mxu0 }
 0x1fc   : > { %v7789_v40 = vadd.f32 %v7788_v49, %v7787_v36  ;;  %v7790_v41 = vpop.f32.mrb[130].mxu0  ;;  %8123 = vmatpush3.bf16.msra.mxu0 %v9737_v43 }
 0x1fd   : > { %v7791_v47 = vpop.f32.mrb[131].mxu0  ;;  %8738 = vmatpush3.bf16.msra.mxu1 %v9742_v33  ;;  %8124 = vmatprep.subr.bf16.mxu0 %v9743_v34 }
 0x1fe   : > { %v11242_v48 = vadd.f32 %v7789_v40, %v11074_v59  ;;  %v7792_v42 = vadd.f32 %v7791_v47, %v7790_v41  ;;  %8712 = vmatmul.mubr.bf16.gmra.mrb[68].mxu1 %v9726_v37  ;;  %8739 = vmatprep.subr.bf16.mxu1 %v9893_v1  ;;  %v9751_v59 = vld [vmem:[%s11732_s1 + $0xf8] sm:$0xff]   ;;  %v9756_v40 = vld [vmem:[%s10967_s16 + $0x8] ss:$12 sps:$4 sm:$0xff]  }
 0x1ff   : > { %4707 = vmatmul.mubr.bf16.gmra.mrb[236].mxu0 %v9727_v38  ;;  %8715 = vmatprep.mubr.msk.bf16.mxu1 %vm9894_vm0, %v9893_v1 }
 0x200   : > { %v11248_v51 = vadd.f32 %v7792_v42, %v11086_v62  ;;  %4714 = vmatprep.mubr.bf16.mxu0 %v9731_v46  ;;  %8125 = vmatpush3.bf16.msra.mxu0 %v9744_v26  ;;  %v9753_v46 = vld [vmem:[%s10967_s16] ss:$12 sps:$4 sm:$0xff]  }
 0x201   : > { %8740 = vmatpush3.bf16.msra.mxu1 %v9749_v13  ;;  %8126 = vmatprep.subr.bf16.mxu0 %v9750_v45  ;;  %v9758_v45 = vld [vmem:[%s11732_s1] sm:$0xff]  }
 0x202   : > { %v7793_v54 = vpop.f32.mrb[132].mxu0  ;;  %8741 = vmatprep.subr.bf16.mxu1 %v9893_v1 }
 0x203   : > { %v7794_v62 = vpop.f32.mrb[133].mxu0 }
 0x204   : > { %v7795_v57 = vadd.f32 %v7794_v62, %v7793_v54  ;;  %v7796_v7 = vpop.f32.mrb[134].mxu0  ;;  %8127 = vmatpush3.bf16.msra.mxu0 %v9751_v59  ;;  %v9762_v59 = vld [vmem:[%s10967_s16 + $0x1c] ss:$12 sps:$4 sm:$0xff]  }
 0x205   : > { %v7797_v2 = vpop.f32.mrb[135].mxu0  ;;  %8742 = vmatpush3.bf16.msra.mxu1 %v9752_v58  ;;  %8185 = vmatprep.subr.bf16.mxu0 %v9757_v15  ;;  %v9764_v58 = vld [vmem:[%s11732_s1 + $0x48] sm:$0xff]  }
 0x206   : > { %v11264_v20 = vadd.f32 %v7795_v57, %v11103_v29  ;;  %v7798_v61 = vadd.f32 %v7797_v2, %v7796_v7  ;;  %8716 = vmatmul.mubr.bf16.gmra.mrb[72].mxu1 %v9733_v9  ;;  %8771 = vmatprep.subr.bf16.mxu1 %v9893_v1  ;;  %v9740_v29 = vld [vmem:[%s10812_s4 + $0x80] ss:$12 sps:$4 sm:$0xff]   ;;  %v9767_v7 = vld [vmem:[%s11732_s1 + $0x50] sm:$0xff]  }
 0x207   : > { %4715 = vmatmul.mubr.bf16.gmra.mrb[240].mxu0 %v9734_v56  ;;  %8719 = vmatprep.mubr.msk.bf16.mxu1 %vm9894_vm0, %v9893_v1  ;;  %v9765_v56 = vld [vmem:[%s11732_s1 + $0x8] sm:$0xff]  }
 0x208   : > { %v11271_v55 = vadd.f32 %v7798_v61, %v11106_v35  ;;  %4722 = vmatprep.mubr.bf16.mxu0 %v9738_v60  ;;  %v9763_v61 = vld [vmem:[%s10967_s16 + $0x20] ss:$12 sps:$4 sm:$0xff]  }
 0x20a   : > { %v7799_v44 = vpop.f32.mrb[136].mxu0 }
 0x20b   : > { %v7800_v0 = vpop.f32.mrb[137].mxu0 }
 0x20c   : > { %v7801_v23 = vadd.f32 %v7800_v0, %v7799_v44  ;;  %v7802_v31 = vpop.f32.mrb[138].mxu0  ;;  %v9760_v0 = vld [vmem:[%s10967_s16 + $0x18] ss:$12 sps:$4 sm:$0xff]  }
 0x20d   : > { %v7803_v32 = vpop.f32.mrb[139].mxu0 }
 0x20e   : > { %v11282_v35 = vadd.f32 %v7801_v23, %v11119_v18  ;;  %v7804_v10 = vadd.f32 %v7803_v32, %v7802_v31  ;;  %8720 = vmatmul.mubr.bf16.gmra.mrb[76].mxu1 %v9740_v29  ;;  %v9772_v32 = vld [vmem:[%s11732_s1 + $0x10] sm:$0xff]  }
 0x20f   : > { %4723 = vmatmul.mubr.bf16.gmra.mrb[244].mxu0 %v9741_v3  ;;  %8723 = vmatprep.mubr.msk.bf16.mxu1 %vm9894_vm0, %v9893_v1 }
 0x210   : > { %v11287_v4 = vadd.f32 %v7804_v10, %v11122_v24  ;;  %4730 = vmatprep.mubr.bf16.mxu0 %v9745_v8  ;;  %v9770_v8 = vld [vmem:[%s10967_s16 + $0x34] ss:$12 sps:$4 sm:$0xff]  }
 0x211   : > { %v3197_v12 = vpop.f32.mrb[28].mxu1 }
 0x212   : > { %v7836_v14 = vpop.f32.mrb[140].mxu0  ;;  %v8569_v16 = vpop.f32.mrb[29].mxu1 }
 0x213   : > { %v7837_v28 = vpop.f32.mrb[141].mxu0  ;;  %v3200_v18 = vpop.f32.mrb[30].mxu1 }
 0x214   : > { %v7838_v19 = vadd.f32 %v7837_v28, %v7836_v14  ;;  %v7839_v21 = vpop.f32.mrb[142].mxu0  ;;  %v8570_v63 = vpop.f32.mrb[31].mxu1 }
 0x215   : > { %v7840_v30 = vpop.f32.mrb[143].mxu0 }
 0x216   : > { %v8902_v43 = vadd.f32 %v11130_v39, %v7838_v19  ;;  %v7841_v24 = vadd.f32 %v7840_v30, %v7839_v21  ;;  %8724 = vmatmul.mubr.bf16.gmra.mrb[80].mxu1 %v9747_v50  ;;  %v9773_v50 = vld [vmem:[%s11732_s1 + $0x90] sm:$0xff]   ;;  %v9771_v30 = vld [vmem:[%s10967_s16 + $0x38] ss:$12 sps:$4 sm:$0xff]  }
 0x217   : > { %4731 = vmatmul.mubr.bf16.gmra.mrb[248].mxu0 %v9748_v17  ;;  %8743 = vmatprep.mubr.msk.bf16.mxu1 %vm9894_vm0, %v9893_v1 }
 0x218   : > { %v8903_v33 = vadd.f32 %v8902_v43, %v3197_v12  ;;  %v8905_v34 = vadd.f32 %v11135_v22, %v7841_v24  ;;  %5309 = vmatprep.mubr.bf16.mxu0 %v9755_v25  ;;  %v9759_v22 = vld [vmem:[%s11732_s1 + $0x80] sm:$0xff]   ;;  %v9774_v12 = vld [vmem:[%s11732_s1 + $0x58] sm:$0xff]  }
 0x219   : > { %v3205_v36 = vpop.f32.mrb[32].mxu1 }
 0x21a   : > { %3266 = vst [vmem:[%s10830_s15 + $0x70] sm:$0xff] %v8903_v33  ;;  %v8906_v37 = vadd.f32 %v8905_v34, %v3200_v18  ;;  %v7842_v49 = vpop.f32.mrb[144].mxu0  ;;  %v8573_v38 = vpop.f32.mrb[33].mxu1  ;;  %v9775_v18 = vld [vmem:[%s11732_s1 + $0x18] sm:$0xff]  }
 0x21b   : > { %v7843_v39 = vpop.f32.mrb[145].mxu0  ;;  %v3208_v41 = vpop.f32.mrb[34].mxu1  ;;  %v9768_v33 = vld [vmem:[%s10967_s16 + $0x30] ss:$12 sps:$4 sm:$0xff]   ;;  %v9782_v38 = vld [vmem:[%s11732_s1 + $0x20] sm:$0xff]  }
 0x21c   : > { %3267 = vst [vmem:[%s10830_s15 + $0x78] sm:$0xff] %v8906_v37  ;;  %v7844_v26 = vadd.f32 %v7843_v39, %v7842_v49  ;;  %v7845_v47 = vpop.f32.mrb[146].mxu0  ;;  %v8574_v13 = vpop.f32.mrb[35].mxu1  ;;  %v9778_v49 = vld [vmem:[%s10967_s16 + $0x4c] ss:$12 sps:$4 sm:$0xff]   ;;  %v9787_v39 = vld [vmem:[%s11732_s1 + $0xa0] sm:$0xff]  }
 0x21d   : > { %v7846_v42 = vpop.f32.mrb[147].mxu0 }
 0x21e   : > { %v8908_v15 = vadd.f32 %v11150_v53, %v7844_v26  ;;  %v7847_v54 = vadd.f32 %v7846_v42, %v7845_v47  ;;  %8744 = vmatmul.mubr.bf16.vlgmr.msra.gmra.mrb[84].mxu1 %v9756_v40  ;;  %v9766_v53 = vld [vmem:[%s11732_s1 + $0x88] sm:$0xff]  }
 0x21f   : > { %5310 = vmatmul.mubr.bf16.vlgmr.msra.gmra.mrb[252].mxu0 %v9753_v46  ;;  %8747 = vmatprep.mubr.msk.bf16.mxu1 %vm9894_vm0, %v9893_v1 }
 0x220   : > { %v8909_v9 = vadd.f32 %v8908_v15, %v3205_v36  ;;  %v8911_v62 = vadd.f32 %v11155_v52, %v7847_v54  ;;  %8186 = vmatpush3.bf16.msra.mxu0 %v9758_v45  ;;  %8772 = vmatpush3.bf16.msra.mxu1 %v9759_v22  ;;  %v9794_v22 = vld [vmem:[%s11732_s1 + $0xa8] sm:$0xff]   ;;  %v9779_v15 = vld [vmem:[%s10967_s16 + $0x50] ss:$12 sps:$4 sm:$0xff]  }
 0x221   : > { %v3213_v57 = vpop.f32.mrb[36].mxu1  ;;  %5317 = vmatprep.mubr.bf16.mxu0 %v9762_v59  ;;  %8187 = vmatprep.subr.bf16.mxu0 %v9764_v58 }
 0x222   : > { %3268 = vst [vmem:[%s10830_s15 + $0x80] sm:$0xff] %v8909_v9  ;;  %v8912_v52 = vadd.f32 %v8911_v62, %v3208_v41  ;;  %v7848_v60 = vpop.f32.mrb[148].mxu0  ;;  %v8577_v2 = vpop.f32.mrb[37].mxu1  ;;  %8773 = vmatprep.subr.bf16.mxu1 %v9893_v1  ;;  %v9788_v41 = vld [vmem:[%s11732_s1 + $0x68] sm:$0xff]  }
 0x223   : > { %v7849_v44 = vpop.f32.mrb[149].mxu0  ;;  %v3216_v29 = vpop.f32.mrb[38].mxu1  ;;  %v9776_v62 = vld [vmem:[%s10967_s16 + $0x48] ss:$12 sps:$4 sm:$0xff]  }
 0x224   : > { %3269 = vst [vmem:[%s10830_s15 + $0x88] sm:$0xff] %v8912_v52  ;;  %v7850_v3 = vadd.f32 %v7849_v44, %v7848_v60  ;;  %v7851_v23 = vpop.f32.mrb[150].mxu0  ;;  %v8578_v31 = vpop.f32.mrb[39].mxu1  ;;  %8188 = vmatpush3.bf16.msra.mxu0 %v9765_v56  ;;  %8774 = vmatpush3.bf16.msra.mxu1 %v9766_v53  ;;  %v9796_v52 = vld [vmem:[%s11732_s1 + $0x30] sm:$0xff]  }
 0x225   : > { %v7852_v10 = vpop.f32.mrb[151].mxu0  ;;  %8189 = vmatprep.subr.bf16.mxu0 %v9767_v7  ;;  %8775 = vmatprep.subr.bf16.mxu1 %v9893_v1  ;;  %v9785_v7 = vld [vmem:[%s10967_s16 + $0x64] ss:$12 sps:$4 sm:$0xff]   ;;  %v9804_v31 = vld [vmem:[%s11732_s1 + $0xb8] sm:$0xff]  }
 0x226   : > { %v8914_v17 = vadd.f32 %v11181_v11, %v7850_v3  ;;  %v7853_v14 = vadd.f32 %v7852_v10, %v7851_v23  ;;  %8748 = vmatmul.mubr.bf16.gmra.mrb[88].mxu1 %v9763_v61  ;;  %v9780_v11 = vld [vmem:[%s11732_s1 + $0x98] sm:$0xff]   ;;  %v9801_v2 = vld [vmem:[%s11732_s1 + $0xb0] sm:$0xff]  }
 0x227   : > { %5318 = vmatmul.mubr.bf16.gmra.mrb[0].mxu0 %v9760_v0  ;;  %8751 = vmatprep.mubr.msk.bf16.mxu1 %vm9894_vm0, %v9893_v1  ;;  %v9802_v61 = vld [vmem:[%s11732_s1 + $0x78] sm:$0xff]  }
 0x228   : > { %v8915_v16 = vadd.f32 %v8914_v17, %v3213_v57  ;;  %v8917_v28 = vadd.f32 %v11186_v6, %v7853_v14  ;;  %5325 = vmatprep.mubr.bf16.mxu0 %v9770_v8  ;;  %8190 = vmatpush3.bf16.msra.mxu0 %v9772_v32  ;;  %v9781_v6 = vld [vmem:[%s11732_s1 + $0x60] sm:$0xff]  }
 0x229   : > { %v3221_v19 = vpop.f32.mrb[40].mxu1  ;;  %8776 = vmatpush3.bf16.msra.mxu1 %v9773_v50  ;;  %8191 = vmatprep.subr.bf16.mxu0 %v9774_v12  ;;  %v9786_v50 = vld [vmem:[%s10967_s16 + $0x68] ss:$12 sps:$4 sm:$0xff]   ;;  %v9783_v14 = vld [vmem:[%s10967_s16 + $0x60] ss:$12 sps:$4 sm:$0xff]  }
 0x22a   : > { %3270 = vst [vmem:[%s10830_s15 + $0x90] sm:$0xff] %v8915_v16  ;;  %v8918_v21 = vadd.f32 %v8917_v28, %v3216_v29  ;;  %v7854_v63 = vpop.f32.mrb[152].mxu0  ;;  %v8581_v25 = vpop.f32.mrb[41].mxu1  ;;  %8777 = vmatprep.subr.bf16.mxu1 %v9893_v1 }
 0x22b   : > { %v7855_v43 = vpop.f32.mrb[153].mxu0  ;;  %v3224_v24 = vpop.f32.mrb[42].mxu1 }
 0x22c   : > { %3271 = vst [vmem:[%s10830_s15 + $0x98] sm:$0xff] %v8918_v21  ;;  %v7856_v34 = vadd.f32 %v7855_v43, %v7854_v63  ;;  %v7857_v36 = vpop.f32.mrb[154].mxu0  ;;  %v8582_v37 = vpop.f32.mrb[43].mxu1  ;;  %8192 = vmatpush3.bf16.msra.mxu0 %v9775_v18 }
 0x22d   : > { %v7858_v40 = vpop.f32.mrb[155].mxu0  ;;  %8778 = vmatpush3.bf16.msra.mxu1 %v9780_v11  ;;  %8193 = vmatprep.subr.bf16.mxu0 %v9781_v6  ;;  %v9790_v37 = vld [vmem:[%s10967_s16 + $0x78] ss:$12 sps:$4 sm:$0xff]  }
 0x22e   : > { %v8920_v46 = vadd.f32 %v11211_v27, %v7856_v34  ;;  %v7859_v26 = vadd.f32 %v7858_v40, %v7857_v36  ;;  %8752 = vmatmul.mubr.bf16.gmra.mrb[92].mxu1 %v9771_v30  ;;  %8779 = vmatprep.subr.bf16.mxu1 %v9893_v1  ;;  %v9789_v27 = vld [vmem:[%s11732_s1 + $0x28] sm:$0xff]  }
 0x22f   : > { %5326 = vmatmul.mubr.bf16.gmra.mrb[4].mxu0 %v9768_v33  ;;  %8755 = vmatprep.mubr.msk.bf16.mxu1 %vm9894_vm0, %v9893_v1  ;;  %v9793_v33 = vld [vmem:[%s10967_s16 + $0x80] ss:$12 sps:$4 sm:$0xff]  }
 0x230   : > { %v8921_v47 = vadd.f32 %v8920_v46, %v3221_v19  ;;  %v8923_v13 = vadd.f32 %v11217_v5, %v7859_v26  ;;  %5333 = vmatprep.mubr.bf16.mxu0 %v9778_v49  ;;  %8194 = vmatpush3.bf16.msra.mxu0 %v9782_v38  ;;  %v9795_v5 = vld [vmem:[%s11732_s1 + $0x70] sm:$0xff]   ;;  %v9792_v19 = vld [vmem:[%s10967_s16 + $0x7c] ss:$12 sps:$4 sm:$0xff]  }
 0x231   : > { %v3229_v45 = vpop.f32.mrb[44].mxu1  ;;  %8780 = vmatpush3.bf16.msra.mxu1 %v9787_v39  ;;  %8195 = vmatprep.subr.bf16.mxu0 %v9788_v41  ;;  %v9799_v39 = vld [vmem:[%s10967_s16 + $0x94] ss:$12 sps:$4 sm:$0xff]  }
 0x232   : > { %3272 = vst [vmem:[%s10830_s15 + $0xa0] sm:$0xff] %v8921_v47  ;;  %v8924_v42 = vadd.f32 %v8923_v13, %v3224_v24  ;;  %v7860_v59 = vpop.f32.mrb[156].mxu0  ;;  %v8585_v58 = vpop.f32.mrb[45].mxu1  ;;  %8781 = vmatprep.subr.bf16.mxu1 %v9893_v1 }
 0x233   : > { %v7861_v54 = vpop.f32.mrb[157].mxu0  ;;  %v3232_v9 = vpop.f32.mrb[46].mxu1 }
 0x234   : > { %3273 = vst [vmem:[%s10830_s15 + $0xa8] sm:$0xff] %v8924_v42  ;;  %v7862_v56 = vadd.f32 %v7861_v54, %v7860_v59  ;;  %v7863_v53 = vpop.f32.mrb[158].mxu0  ;;  %v8586_v57 = vpop.f32.mrb[47].mxu1  ;;  %8196 = vmatpush3.bf16.msra.mxu0 %v9789_v27  ;;  %v9807_v59 = vld [vmem:[%s11117_s25 + $0x4] ss:$12 sps:$4 sm:$0xff]  }
 0x235   : > { %v7864_v60 = vpop.f32.mrb[159].mxu0  ;;  %8782 = vmatpush3.bf16.msra.mxu1 %v9794_v22  ;;  %8197 = vmatprep.subr.bf16.mxu0 %v9795_v5  ;;  %v9797_v5 = vld [vmem:[%s10967_s16 + $0x90] ss:$12 sps:$4 sm:$0xff]   ;;  %v9808_v54 = vld [vmem:[%s11117_s25 + $0x8] ss:$12 sps:$4 sm:$0xff]   ;;  %v9810_v57 = vld [vmem:[%s11732_s1 + $0x180] sm:$0xff]  }
 0x236   : > { %v8926_v44 = vadd.f32 %v11242_v48, %v7862_v56  ;;  %v7865_v29 = vadd.f32 %v7864_v60, %v7863_v53  ;;  %8756 = vmatmul.mubr.bf16.gmra.mrb[96].mxu1 %v9779_v15  ;;  %8783 = vmatprep.subr.bf16.mxu1 %v9893_v1  ;;  %v9803_v48 = vld [vmem:[%s11732_s1 + $0x38] sm:$0xff]  }
 0x237   : > { %5334 = vmatmul.mubr.bf16.gmra.mrb[8].mxu0 %v9776_v62  ;;  %8759 = vmatprep.mubr.msk.bf16.mxu1 %vm9894_vm0, %v9893_v1  ;;  %v9805_v62 = vld [vmem:[%s11117_s25] ss:$12 sps:$4 sm:$0xff]   ;;  %v9814_v60 = vld [vmem:[%s11117_s25 + $0x1c] ss:$12 sps:$4 sm:$0xff]  }
 0x238   : > { %v8927_v0 = vadd.f32 %v8926_v44, %v3229_v45  ;;  %v8929_v3 = vadd.f32 %v11248_v51, %v7865_v29  ;;  %5341 = vmatprep.mubr.bf16.mxu0 %v9785_v7  ;;  %8198 = vmatpush3.bf16.msra.mxu0 %v9796_v52  ;;  %v9809_v51 = vld [vmem:[%s11732_s1 + $0x1c0] sm:$0xff]   ;;  %v9817_v44 = vld [vmem:[%s11732_s1 + $0x188] sm:$0xff]  }
 0x239   : > { %v3237_v23 = vpop.f32.mrb[48].mxu1  ;;  %8784 = vmatpush3.bf16.msra.mxu1 %v9801_v2  ;;  %8199 = vmatprep.subr.bf16.mxu0 %v9802_v61  ;;  %v9800_v45 = vld [vmem:[%s10967_s16 + $0x98] ss:$12 sps:$4 sm:$0xff]   ;;  %v9816_v2 = vld [vmem:[%s11732_s1 + $0x1c8] sm:$0xff]  }
 0x23a   : > { %3274 = vst [vmem:[%s10830_s15 + $0xb0] sm:$0xff] %v8927_v0  ;;  %v8930_v8 = vadd.f32 %v8929_v3, %v3232_v9  ;;  %v7866_v32 = vpop.f32.mrb[160].mxu0  ;;  %v8589_v10 = vpop.f32.mrb[49].mxu1  ;;  %8785 = vmatprep.subr.bf16.mxu1 %v9893_v1  ;;  %v9811_v7 = vld [vmem:[%s11732_s1 + $0x200] sm:$0xff]   ;;  %v9818_v29 = vld [vmem:[%s11732_s1 + $0x208] sm:$0xff]   ;;  %v9819_v0 = vld [vmem:[%s11732_s1 + $0x1d0] sm:$0xff]  }
 0x23b   : > { %v7867_v12 = vpop.f32.mrb[161].mxu0  ;;  %v3240_v17 = vpop.f32.mrb[50].mxu1  ;;  %v9824_v10 = vld [vmem:[%s11732_s1 + $0x190] sm:$0xff]  }
 0x23c   : > { %3275 = vst [vmem:[%s10830_s15 + $0xb8] sm:$0xff] %v8930_v8  ;;  %v7868_v16 = vadd.f32 %v7867_v12, %v7866_v32  ;;  %v7869_v28 = vpop.f32.mrb[162].mxu0  ;;  %v8590_v18 = vpop.f32.mrb[51].mxu1  ;;  %8200 = vmatpush3.bf16.msra.mxu0 %v9803_v48  ;;  %v9815_v48 = vld [vmem:[%s11117_s25 + $0x20] ss:$12 sps:$4 sm:$0xff]   ;;  %v9825_v12 = vld [vmem:[%s11732_s1 + $0x210] sm:$0xff]  }
 0x23d   : > { %v7870_v11 = vpop.f32.mrb[163].mxu0  ;;  %8786 = vmatpush3.bf16.msra.mxu1 %v9804_v31  ;;  %8258 = vmatprep.subr.bf16.mxu0 %v9809_v51  ;;  %v9812_v31 = vld [vmem:[%s11117_s25 + $0x18] ss:$12 sps:$4 sm:$0xff]   ;;  %v9822_v32 = vld [vmem:[%s11117_s25 + $0x34] ss:$12 sps:$4 sm:$0xff]  }
 0x23e   : > { %v8932_v6 = vadd.f32 %v11264_v20, %v7868_v16  ;;  %v7871_v21 = vadd.f32 %v7870_v11, %v7869_v28  ;;  %8760 = vmatmul.mubr.bf16.gmra.mrb[100].mxu1 %v9786_v50  ;;  %8815 = vmatprep.subr.bf16.mxu1 %v9893_v1  ;;  %v9827_v16 = vld [vmem:[%s11732_s1 + $0x198] sm:$0xff]   ;;  %v9833_v18 = vld [vmem:[%s11732_s1 + $0x1e0] sm:$0xff]  }
 0x23f   : > { %5342 = vmatmul.mubr.bf16.gmra.mrb[12].mxu0 %v9783_v14  ;;  %8763 = vmatprep.mubr.msk.bf16.mxu1 %vm9894_vm0, %v9893_v1  ;;  %v9832_v28 = vld [vmem:[%s11732_s1 + $0x218] sm:$0xff]  }
 0x240   : > { %v8933_v63 = vadd.f32 %v8932_v6, %v3237_v23  ;;  %v8935_v25 = vadd.f32 %v11271_v55, %v7871_v21  ;;  %5349 = vmatprep.mubr.bf16.mxu0 %v9792_v19  ;;  %v9823_v11 = vld [vmem:[%s11117_s25 + $0x38] ss:$12 sps:$4 sm:$0xff]   ;;  %v9820_v21 = vld [vmem:[%s11117_s25 + $0x30] ss:$12 sps:$4 sm:$0xff]  }
 0x241   : > { %v3245_v30 = vpop.f32.mrb[52].mxu1 }
 0x242   : > { %3276 = vst [vmem:[%s10830_s15 + $0xc0] sm:$0xff] %v8933_v63  ;;  %v8936_v43 = vadd.f32 %v8935_v25, %v3240_v17  ;;  %v7872_v24 = vpop.f32.mrb[164].mxu0  ;;  %v8593_v20 = vpop.f32.mrb[53].mxu1  ;;  %v9826_v17 = vld [vmem:[%s11732_s1 + $0x1d8] sm:$0xff]  }
 0x243   : > { %v7873_v34 = vpop.f32.mrb[165].mxu0  ;;  %v3248_v36 = vpop.f32.mrb[54].mxu1  ;;  %v9839_v20 = vld [vmem:[%s11732_s1 + $0x220] sm:$0xff]  }
 0x244   : > { %3277 = vst [vmem:[%s10830_s15 + $0xc8] sm:$0xff] %v8936_v43  ;;  %v7874_v49 = vadd.f32 %v7873_v34, %v7872_v24  ;;  %v7875_v38 = vpop.f32.mrb[166].mxu0  ;;  %v8594_v40 = vpop.f32.mrb[55].mxu1  ;;  %v9834_v43 = vld [vmem:[%s11732_s1 + $0x1a0] sm:$0xff]  }
 0x245   : > { %v7876_v55 = vpop.f32.mrb[167].mxu0  ;;  %v9831_v40 = vld [vmem:[%s11117_s25 + $0x50] ss:$12 sps:$4 sm:$0xff]  }
 0x246   : > { %v8938_v41 = vadd.f32 %v11282_v35, %v7874_v49  ;;  %v7877_v46 = vadd.f32 %v7876_v55, %v7875_v38  ;;  %8764 = vmatmul.mubr.bf16.gmra.mrb[104].mxu1 %v9793_v33  ;;  %v9840_v33 = vld [vmem:[%s11732_s1 + $0x1e8] sm:$0xff]   ;;  %v9847_v49 = vld [vmem:[%s11732_s1 + $0x1f0] sm:$0xff]  }
 0x247   : > { %5350 = vmatmul.mubr.bf16.gmra.mrb[16].mxu0 %v9790_v37  ;;  %8767 = vmatprep.mubr.msk.bf16.mxu1 %vm9894_vm0, %v9893_v1  ;;  %v9846_v37 = vld [vmem:[%s11732_s1 + $0x228] sm:$0xff]  }
 0x248   : > { %v8939_v26 = vadd.f32 %v8938_v41, %v3245_v30  ;;  %v8941_v47 = vadd.f32 %v11287_v4, %v7877_v46  ;;  %5357 = vmatprep.mubr.bf16.mxu0 %v9799_v39  ;;  %v9830_v30 = vld [vmem:[%s11117_s25 + $0x4c] ss:$12 sps:$4 sm:$0xff]   ;;  %v9828_v55 = vld [vmem:[%s11117_s25 + $0x48] ss:$12 sps:$4 sm:$0xff]  }
 0x24a   : > { %3278 = vst [vmem:[%s10830_s15 + $0xd0] sm:$0xff] %v8939_v26  ;;  %v8942_v13 = vadd.f32 %v8941_v47, %v3248_v36  ;;  %v7909_v27 = vpop.f32.mrb[168].mxu0  ;;  %v9841_v36 = vld [vmem:[%s11732_s1 + $0x1a8] sm:$0xff]   ;;  %v9837_v26 = vld [vmem:[%s11117_s25 + $0x64] ss:$12 sps:$4 sm:$0xff]  }
 0x24b   : > { %v7910_v22 = vpop.f32.mrb[169].mxu0  ;;  %v9848_v47 = vld [vmem:[%s11732_s1 + $0x1b0] sm:$0xff]  }
 0x24c   : > { %3279 = vst [vmem:[%s10830_s15 + $0xd8] sm:$0xff] %v8942_v13  ;;  %v11434_v35 = vadd.f32 %v7910_v22, %v7909_v27  ;;  %v7912_v42 = vpop.f32.mrb[170].mxu0  ;;  %v9853_v27 = vld [vmem:[%s11732_s1 + $0x230] sm:$0xff]  }
 0x24d   : > { %v7913_v58 = vpop.f32.mrb[171].mxu0 }
 0x24e   : > { %v11437_v15 = vadd.f32 %v7913_v58, %v7912_v42  ;;  %8768 = vmatmul.mubr.bf16.gmra.mrb[108].mxu1 %v9800_v45  ;;  %v9854_v45 = vld [vmem:[%s11732_s1 + $0x1f8] sm:$0xff]   ;;  %v9838_v58 = vld [vmem:[%s11117_s25 + $0x68] ss:$12 sps:$4 sm:$0xff]  }
 0x24f   : > { %5358 = vmatmul.mubr.bf16.gmra.mrb[20].mxu0 %v9797_v5  ;;  %8787 = vmatprep.mubr.msk.bf16.mxu1 %vm9894_vm0, %v9893_v1  ;;  %v9855_v5 = vld [vmem:[%s11732_s1 + $0x1b8] sm:$0xff]  }
 0x250   : > { %5743 = vmatprep.mubr.bf16.mxu0 %v9807_v59  ;;  %v9856_v42 = vld [vmem:[%s11732_s1 + $0x238] sm:$0xff]  }
 0x252   : > { %v7915_v4 = vpop.f32.mrb[172].mxu0 }
 0x253   : > { %v7916_v9 = vpop.f32.mrb[173].mxu0 }
 0x254   : > { %v11443_v56 = vadd.f32 %v7916_v9, %v7915_v4  ;;  %v7918_v53 = vpop.f32.mrb[174].mxu0 }
 0x255   : > { %v7919_v52 = vpop.f32.mrb[175].mxu0 }
 0x256   : > { %v11455_v61 = vadd.f32 %v7919_v52, %v7918_v53  ;;  %8788 = vmatmul.mubr.bf16.vlgmr.msra.gmra.mrb[84].mxu1 %v9808_v54  ;;  %v9835_v54 = vld [vmem:[%s11117_s25 + $0x60] ss:$12 sps:$4 sm:$0xff]   ;;  %v9844_v53 = vld [vmem:[%s11117_s25 + $0x7c] ss:$12 sps:$4 sm:$0xff]  }
 0x257   : > { %5744 = vmatmul.mubr.bf16.vlgmr.msra.gmra.mrb[24].mxu0 %v9805_v62  ;;  %8791 = vmatprep.mubr.msk.bf16.mxu1 %vm9894_vm0, %v9893_v1 }
 0x258   : > { %8259 = vmatpush3.bf16.msra.mxu0 %v9810_v57  ;;  %8816 = vmatpush3.bf16.msra.mxu1 %v9811_v7 }
 0x259   : > { %5751 = vmatprep.mubr.bf16.mxu0 %v9814_v60  ;;  %8260 = vmatprep.subr.bf16.mxu0 %v9816_v2  ;;  %v9845_v60 = vld [vmem:[%s11117_s25 + $0x80] ss:$12 sps:$4 sm:$0xff]  }
 0x25a   : > { %v7921_v3 = vpop.f32.mrb[176].mxu0  ;;  %8817 = vmatprep.subr.bf16.mxu1 %v9893_v1 }
 0x25b   : > { %v7922_v23 = vpop.f32.mrb[177].mxu0 }
 0x25c   : > { %v11471_v51 = vadd.f32 %v7922_v23, %v7921_v3  ;;  %v7924_v8 = vpop.f32.mrb[178].mxu0  ;;  %8261 = vmatpush3.bf16.msra.mxu0 %v9817_v44  ;;  %8818 = vmatpush3.bf16.msra.mxu1 %v9818_v29  ;;  %v9842_v44 = vld [vmem:[%s11117_s25 + $0x78] ss:$12 sps:$4 sm:$0xff]   ;;  %v9851_v3 = vld [vmem:[%s11117_s25 + $0x94] ss:$12 sps:$4 sm:$0xff]  }
 0x25d   : > { %v7925_v50 = vpop.f32.mrb[179].mxu0  ;;  %8262 = vmatprep.subr.bf16.mxu0 %v9819_v0  ;;  %8819 = vmatprep.subr.bf16.mxu1 %v9893_v1 }
 0x25e   : > { %v11484_v14 = vadd.f32 %v7925_v50, %v7924_v8  ;;  %8792 = vmatmul.mubr.bf16.gmra.mrb[88].mxu1 %v9815_v48  ;;  %v9852_v8 = vld [vmem:[%s11117_s25 + $0x98] ss:$12 sps:$4 sm:$0xff]  }
 0x25f   : > { %5752 = vmatmul.mubr.bf16.gmra.mrb[28].mxu0 %v9812_v31  ;;  %8795 = vmatprep.mubr.msk.bf16.mxu1 %vm9894_vm0, %v9893_v1 }
 0x260   : > { %5759 = vmatprep.mubr.bf16.mxu0 %v9822_v32  ;;  %8263 = vmatpush3.bf16.msra.mxu0 %v9824_v10  ;;  %v9849_v10 = vld [vmem:[%s11117_s25 + $0x90] ss:$12 sps:$4 sm:$0xff]  }
 0x261   : > { %8820 = vmatpush3.bf16.msra.mxu1 %v9825_v12  ;;  %8264 = vmatprep.subr.bf16.mxu0 %v9826_v17  ;;  %v9859_v17 = vld [vmem:[%s11278_s8 + $0x4] ss:$12 sps:$4 sm:$0xff]  }
 0x262   : > { %v7927_v19 = vpop.f32.mrb[180].mxu0  ;;  %8821 = vmatprep.subr.bf16.mxu1 %v9893_v1 }
 0x263   : > { %v7928_v6 = vpop.f32.mrb[181].mxu0 }
 0x264   : > { %v11500_v63 = vadd.f32 %v7928_v6, %v7927_v19  ;;  %v7930_v25 = vpop.f32.mrb[182].mxu0  ;;  %8265 = vmatpush3.bf16.msra.mxu0 %v9827_v16  ;;  %v9860_v6 = vld [vmem:[%s11278_s8 + $0x8] ss:$12 sps:$4 sm:$0xff]  }
 0x265   : > { %v7931_v24 = vpop.f32.mrb[183].mxu0  ;;  %8822 = vmatpush3.bf16.msra.mxu1 %v9832_v28  ;;  %8266 = vmatprep.subr.bf16.mxu0 %v9833_v18 }
 0x266   : > { %v11512_v34 = vadd.f32 %v7931_v24, %v7930_v25  ;;  %8796 = vmatmul.mubr.bf16.gmra.mrb[92].mxu1 %v9823_v11  ;;  %8823 = vmatprep.subr.bf16.mxu1 %v9893_v1  ;;  %v9857_v25 = vld [vmem:[%s11278_s8] ss:$12 sps:$4 sm:$0xff]  }
 0x267   : > { %5760 = vmatmul.mubr.bf16.gmra.mrb[32].mxu0 %v9820_v21  ;;  %8799 = vmatprep.mubr.msk.bf16.mxu1 %vm9894_vm0, %v9893_v1 }
 0x268   : > { %5767 = vmatprep.mubr.bf16.mxu0 %v9830_v30  ;;  %8267 = vmatpush3.bf16.msra.mxu0 %v9834_v43 }
 0x269   : > { %8824 = vmatpush3.bf16.msra.mxu1 %v9839_v20  ;;  %8268 = vmatprep.subr.bf16.mxu0 %v9840_v33 }
 0x26a   : > { %v7933_v38 = vpop.f32.mrb[184].mxu0  ;;  %8825 = vmatprep.subr.bf16.mxu1 %v9893_v1 }
 0x26b   : > { %v7934_v39 = vpop.f32.mrb[185].mxu0 }
 0x26c   : > { %v11529_v41 = vadd.f32 %v7934_v39, %v7933_v38  ;;  %v7936_v46 = vpop.f32.mrb[186].mxu0  ;;  %8269 = vmatpush3.bf16.msra.mxu0 %v9841_v36  ;;  %v9861_v38 = vld [vmem:[%s11278_s8 + $0x18] ss:$12 sps:$4 sm:$0xff]  }
 0x26d   : > { %v7937_v13 = vpop.f32.mrb[187].mxu0  ;;  %8826 = vmatpush3.bf16.msra.mxu1 %v9846_v37  ;;  %8270 = vmatprep.subr.bf16.mxu0 %v9847_v49  ;;  %v9864_v37 = vld [vmem:[%s11278_s8 + $0x20] ss:$12 sps:$4 sm:$0xff]  }
 0x26e   : > { %v11541_v22 = vadd.f32 %v7937_v13, %v7936_v46  ;;  %8800 = vmatmul.mubr.bf16.gmra.mrb[96].mxu1 %v9831_v40  ;;  %8827 = vmatprep.subr.bf16.mxu1 %v9893_v1  ;;  %v9868_v13 = vld [vmem:[%s11278_s8 + $0x38] ss:$12 sps:$4 sm:$0xff]  }
 0x26f   : > { %5768 = vmatmul.mubr.bf16.gmra.mrb[36].mxu0 %v9828_v55  ;;  %8803 = vmatprep.mubr.msk.bf16.mxu1 %vm9894_vm0, %v9893_v1 }
 0x270   : > { %5775 = vmatprep.mubr.bf16.mxu0 %v9837_v26  ;;  %8271 = vmatpush3.bf16.msra.mxu0 %v9848_v47 }
 0x271   : > { %8828 = vmatpush3.bf16.msra.mxu1 %v9853_v27  ;;  %8272 = vmatprep.subr.bf16.mxu0 %v9854_v45  ;;  %v9865_v45 = vld [vmem:[%s11278_s8 + $0x30] ss:$12 sps:$4 sm:$0xff]  }
 0x272   : > { %v7939_v59 = vpop.f32.mrb[188].mxu0  ;;  %8829 = vmatprep.subr.bf16.mxu1 %v9893_v1 }
 0x273   : > { %v7940_v4 = vpop.f32.mrb[189].mxu0 }
 0x274   : > { %v11555_v9 = vadd.f32 %v7940_v4, %v7939_v59  ;;  %v7942_v62 = vpop.f32.mrb[190].mxu0  ;;  %8273 = vmatpush3.bf16.msra.mxu0 %v9855_v5 }
 0x275   : > { %v7943_v57 = vpop.f32.mrb[191].mxu0  ;;  %8830 = vmatpush3.bf16.msra.mxu1 %v9856_v42 }
 0x276   : > { %v11558_v7 = vadd.f32 %v7943_v57, %v7942_v62  ;;  %8804 = vmatmul.mubr.bf16.gmra.mrb[100].mxu1 %v9838_v58  ;;  %v9872_v62 = vld [vmem:[%s11278_s8 + $0x50] ss:$12 sps:$4 sm:$0xff]   ;;  %v9869_v57 = vld [vmem:[%s11278_s8 + $0x48] ss:$12 sps:$4 sm:$0xff]  }
 0x277   : > { %5776 = vmatmul.mubr.bf16.gmra.mrb[40].mxu0 %v9835_v54  ;;  %8807 = vmatprep.mubr.msk.bf16.mxu1 %vm9894_vm0, %v9893_v1 }
 0x278   : > { %5783 = vmatprep.mubr.bf16.mxu0 %v9844_v53 }
 0x27a   : > { %v7945_v52 = vpop.f32.mrb[192].mxu0 }
 0x27b   : > { %v7946_v2 = vpop.f32.mrb[193].mxu0 }
 0x27c   : > { %v11564_v29 = vadd.f32 %v7946_v2, %v7945_v52  ;;  %v7948_v0 = vpop.f32.mrb[194].mxu0 }
 0x27d   : > { %v7949_v48 = vpop.f32.mrb[195].mxu0 }
 0x27e   : > { %v11567_v23 = vadd.f32 %v7949_v48, %v7948_v0  ;;  %8808 = vmatmul.mubr.bf16.gmra.mrb[104].mxu1 %v9845_v60  ;;  %v9876_v48 = vld [vmem:[%s11278_s8 + $0x68] ss:$12 sps:$4 sm:$0xff]  }
 0x27f   : > { %5784 = vmatmul.mubr.bf16.gmra.mrb[44].mxu0 %v9842_v44  ;;  %8811 = vmatprep.mubr.msk.bf16.mxu1 %vm9894_vm0, %v9893_v1 }
 0x280   : > { %5791 = vmatprep.mubr.bf16.mxu0 %v9851_v3 }
 0x282   : > { %v7982_v31 = vpop.f32.mrb[196].mxu0 }
 0x283   : > { %v7983_v32 = vpop.f32.mrb[197].mxu0 }
 0x284   : > { %v7984_v50 = vadd.f32 %v7983_v32, %v7982_v31  ;;  %v7985_v12 = vpop.f32.mrb[198].mxu0 }
 0x285   : > { %v7986_v16 = vpop.f32.mrb[199].mxu0 }
 0x286   : > { %v11575_v28 = vadd.f32 %v7984_v50, %v11434_v35  ;;  %v7987_v18 = vadd.f32 %v7986_v16, %v7985_v12  ;;  %8812 = vmatmul.mubr.bf16.gmra.mrb[108].mxu1 %v9852_v8  ;;  %v9863_v35 = vld [vmem:[%s11278_s8 + $0x1c] ss:$12 sps:$4 sm:$0xff]   ;;  %v9873_v8 = vld [vmem:[%s11278_s8 + $0x60] ss:$12 sps:$4 sm:$0xff]  }
 0x287   : > { %5792 = vmatmul.mubr.bf16.gmra.mrb[48].mxu0 %v9849_v10  ;;  %8831 = vmatprep.mubr.msk.bf16.mxu1 %vm9894_vm0, %v9893_v1 }
 0x288   : > { %v11580_v19 = vadd.f32 %v7987_v18, %v11437_v15  ;;  %6258 = vmatprep.mubr.bf16.mxu0 %v9859_v17  ;;  %v9880_v18 = vld [vmem:[%s11278_s8 + $0x80] ss:$12 sps:$4 sm:$0xff]  }
 0x28a   : > { %v7988_v11 = vpop.f32.mrb[200].mxu0 }
 0x28b   : > { %v7989_v21 = vpop.f32.mrb[201].mxu0 }
 0x28c   : > { %v7990_v30 = vadd.f32 %v7989_v21, %v7988_v11  ;;  %v7991_v43 = vpop.f32.mrb[202].mxu0 }
 0x28d   : > { %v7992_v24 = vpop.f32.mrb[203].mxu0 }
 0x28e   : > { %v11586_v20 = vadd.f32 %v7990_v30, %v11443_v56  ;;  %v7993_v33 = vadd.f32 %v7992_v24, %v7991_v43  ;;  %8832 = vmatmul.mubr.bf16.vlgmr.msra.gmra.mrb[84].mxu1 %v9860_v6  ;;  %v9867_v56 = vld [vmem:[%s11278_s8 + $0x34] ss:$12 sps:$4 sm:$0xff]   ;;  %v9877_v6 = vld [vmem:[%s11278_s8 + $0x78] ss:$12 sps:$4 sm:$0xff]  }
 0x28f   : > { %6259 = vmatmul.mubr.bf16.vlgmr.msra.gmra.mrb[52].mxu0 %v9857_v25  ;;  %8835 = vmatprep.mubr.msk.bf16.mxu1 %vm9894_vm0, %v9893_v1 }
 0x290   : > { %v11591_v15 = vadd.f32 %v7993_v33, %v11455_v61  ;;  %6266 = vmatprep.mubr.bf16.mxu0 %v9863_v35 }
 0x292   : > { %v7994_v36 = vpop.f32.mrb[204].mxu0 }
 0x293   : > { %v7995_v49 = vpop.f32.mrb[205].mxu0 }
 0x294   : > { %v7996_v40 = vadd.f32 %v7995_v49, %v7994_v36  ;;  %v7997_v39 = vpop.f32.mrb[206].mxu0 }
 0x295   : > { %v7998_v55 = vpop.f32.mrb[207].mxu0 }
 0x296   : > { %v11597_v46 = vadd.f32 %v7996_v40, %v11471_v51  ;;  %v7999_v26 = vadd.f32 %v7998_v55, %v7997_v39  ;;  %8836 = vmatmul.mubr.bf16.gmra.mrb[88].mxu1 %v9864_v37  ;;  %v9871_v51 = vld [vmem:[%s11278_s8 + $0x4c] ss:$12 sps:$4 sm:$0xff]   ;;  %v9881_v40 = vld [vmem:[%s11278_s8 + $0x90] ss:$12 sps:$4 sm:$0xff]  }
 0x297   : > { %6267 = vmatmul.mubr.bf16.gmra.mrb[56].mxu0 %v9861_v38  ;;  %8839 = vmatprep.mubr.msk.bf16.mxu1 %vm9894_vm0, %v9893_v1  ;;  %v9884_v37 = vld [vmem:[%s11278_s8 + $0x98] ss:$12 sps:$4 sm:$0xff]  }
 0x298   : > { %v11602_v61 = vadd.f32 %v7999_v26, %v11484_v14  ;;  %6274 = vmatprep.mubr.bf16.mxu0 %v9867_v56 }
 0x29a   : > { %v8000_v47 = vpop.f32.mrb[208].mxu0 }
 0x29b   : > { %v8001_v27 = vpop.f32.mrb[209].mxu0 }
 0x29c   : > { %v8002_v5 = vadd.f32 %v8001_v27, %v8000_v47  ;;  %v8003_v42 = vpop.f32.mrb[210].mxu0 }
 0x29d   : > { %v8004_v59 = vpop.f32.mrb[211].mxu0 }
 0x29e   : > { %v11608_v58 = vadd.f32 %v8002_v5, %v11500_v63  ;;  %v8005_v4 = vadd.f32 %v8004_v59, %v8003_v42  ;;  %8840 = vmatmul.mubr.bf16.gmra.mrb[92].mxu1 %v9868_v13  ;;  %v9875_v63 = vld [vmem:[%s11278_s8 + $0x64] ss:$12 sps:$4 sm:$0xff]  }
 0x29f   : > { %6275 = vmatmul.mubr.bf16.gmra.mrb[60].mxu0 %v9865_v45  ;;  %8843 = vmatprep.mubr.msk.bf16.mxu1 %vm9894_vm0, %v9893_v1 }
 0x2a0   : > { %v11613_v14 = vadd.f32 %v8005_v4, %v11512_v34  ;;  %6282 = vmatprep.mubr.bf16.mxu0 %v9871_v51 }
 0x2a2   : > { %v8006_v54 = vpop.f32.mrb[212].mxu0 }
 0x2a3   : > { %v8007_v53 = vpop.f32.mrb[213].mxu0 }
 0x2a4   : > { %v8008_v52 = vadd.f32 %v8007_v53, %v8006_v54  ;;  %v8009_v60 = vpop.f32.mrb[214].mxu0 }
 0x2a5   : > { %v8010_v2 = vpop.f32.mrb[215].mxu0 }
 0x2a6   : > { %v11619_v44 = vadd.f32 %v8008_v52, %v11529_v41  ;;  %v8011_v0 = vadd.f32 %v8010_v2, %v8009_v60  ;;  %8844 = vmatmul.mubr.bf16.gmra.mrb[96].mxu1 %v9872_v62  ;;  %v9879_v41 = vld [vmem:[%s11278_s8 + $0x7c] ss:$12 sps:$4 sm:$0xff]  }
 0x2a7   : > { %6283 = vmatmul.mubr.bf16.gmra.mrb[64].mxu0 %v9869_v57  ;;  %8847 = vmatprep.mubr.msk.bf16.mxu1 %vm9894_vm0, %v9893_v1 }
 0x2a8   : > { %v11624_v34 = vadd.f32 %v8011_v0, %v11541_v22  ;;  %6290 = vmatprep.mubr.bf16.mxu0 %v9875_v63 }
 0x2aa   : > { %v8012_v3 = vpop.f32.mrb[216].mxu0 }
 0x2ab   : > { %v8013_v31 = vpop.f32.mrb[217].mxu0 }
 0x2ac   : > { %v8014_v32 = vadd.f32 %v8013_v31, %v8012_v3  ;;  %v8015_v10 = vpop.f32.mrb[218].mxu0 }
 0x2ad   : > { %v8016_v50 = vpop.f32.mrb[219].mxu0 }
 0x2ae   : > { %v11630_v12 = vadd.f32 %v8014_v32, %v11555_v9  ;;  %v8017_v17 = vadd.f32 %v8016_v50, %v8015_v10  ;;  %8848 = vmatmul.mubr.bf16.gmra.mrb[100].mxu1 %v9876_v48  ;;  %v9883_v9 = vld [vmem:[%s11278_s8 + $0x94] ss:$12 sps:$4 sm:$0xff]  }
 0x2af   : > { %6291 = vmatmul.mubr.bf16.gmra.mrb[68].mxu0 %v9873_v8  ;;  %8851 = vmatprep.mubr.msk.bf16.mxu1 %vm9894_vm0, %v9893_v1 }
 0x2b0   : > { %v11635_v22 = vadd.f32 %v8017_v17, %v11558_v7  ;;  %6298 = vmatprep.mubr.bf16.mxu0 %v9879_v41 }
 0x2b2   : > { %v8018_v16 = vpop.f32.mrb[220].mxu0 }
 0x2b3   : > { %v8019_v11 = vpop.f32.mrb[221].mxu0 }
 0x2b4   : > { %v8020_v21 = vadd.f32 %v8019_v11, %v8018_v16  ;;  %v8021_v25 = vpop.f32.mrb[222].mxu0 }
 0x2b5   : > { %v8022_v30 = vpop.f32.mrb[223].mxu0 }
 0x2b6   : > { %v11641_v43 = vadd.f32 %v8020_v21, %v11564_v29  ;;  %v8023_v35 = vadd.f32 %v8022_v30, %v8021_v25  ;;  %8852 = vmatmul.mubr.bf16.gmra.mrb[104].mxu1 %v9880_v18 }
 0x2b7   : > { %6299 = vmatmul.mubr.bf16.gmra.mrb[72].mxu0 %v9877_v6  ;;  %8855 = vmatprep.mubr.msk.bf16.mxu1 %vm9894_vm0, %v9893_v1 }
 0x2b8   : > { %v11646_v7 = vadd.f32 %v8023_v35, %v11567_v23  ;;  %6306 = vmatprep.mubr.bf16.mxu0 %v9883_v9 }
 0x2b9   : > { %v4773_v24 = vpop.f32.mrb[56].mxu1 }
 0x2ba   : > { %v8055_v33 = vpop.f32.mrb[224].mxu0  ;;  %v8701_v36 = vpop.f32.mrb[57].mxu1 }
 0x2bb   : > { %v8056_v49 = vpop.f32.mrb[225].mxu0  ;;  %v4776_v38 = vpop.f32.mrb[58].mxu1 }
 0x2bc   : > { %v8057_v29 = vadd.f32 %v8056_v49, %v8055_v33  ;;  %v8058_v39 = vpop.f32.mrb[226].mxu0  ;;  %v8702_v56 = vpop.f32.mrb[59].mxu1 }
 0x2bd   : > { %v8059_v55 = vpop.f32.mrb[227].mxu0 }
 0x2be   : > { %v8944_v26 = vadd.f32 %v11575_v28, %v8057_v29  ;;  %v8060_v1 = vadd.f32 %v8059_v55, %v8058_v39  ;;  %8856 = vmatmul.mubr.bf16.gmra.mrb[108].mxu1 %v9884_v37 }
 0x2bf   : > { %6307 = vmatmul.mubr.bf16.gmra.mrb[76].mxu0 %v9881_v40 }
 0x2c0   : > { %v8945_v23 = vadd.f32 %v8944_v26, %v4773_v24  ;;  %v8947_v47 = vadd.f32 %v11580_v19, %v8060_v1 }
 0x2c1   : > { %v4781_v13 = vpop.f32.mrb[60].mxu1 }
 0x2c2   : > { %4842 = vst [vmem:[%s10830_s15 + $0xe0] sm:$0xff] %v8945_v23  ;;  %v8948_v27 = vadd.f32 %v8947_v47, %v4776_v38  ;;  %v8061_v45 = vpop.f32.mrb[228].mxu0  ;;  %v8705_v5 = vpop.f32.mrb[61].mxu1 }
 0x2c3   : > { %v8062_v42 = vpop.f32.mrb[229].mxu0  ;;  %v4784_v51 = vpop.f32.mrb[62].mxu1 }
 0x2c4   : > { %4843 = vst [vmem:[%s10830_s15 + $0xe8] sm:$0xff] %v8948_v27  ;;  %v8063_v59 = vadd.f32 %v8062_v42, %v8061_v45  ;;  %v8064_v4 = vpop.f32.mrb[230].mxu0  ;;  %v8706_v54 = vpop.f32.mrb[63].mxu1 }
 0x2c5   : > { %v8065_v28 = vpop.f32.mrb[231].mxu0 }
 0x2c6   : > { %v8950_v62 = vadd.f32 %v11586_v20, %v8063_v59  ;;  %v8066_v53 = vadd.f32 %v8065_v28, %v8064_v4 }
 0x2c8   : > { %v8951_v57 = vadd.f32 %v8950_v62, %v4781_v13  ;;  %v8953_v19 = vadd.f32 %v11591_v15, %v8066_v53 }
 0x2c9   : > { %v4789_v52 = vpop.f32.mrb[64].mxu1 }
 0x2ca   : > { %4844 = vst [vmem:[%s10830_s15 + $0xf0] sm:$0xff] %v8951_v57  ;;  %v8954_v60 = vadd.f32 %v8953_v19, %v4784_v51  ;;  %v8067_v63 = vpop.f32.mrb[232].mxu0  ;;  %v8709_v2 = vpop.f32.mrb[65].mxu1 }
 0x2cb   : > { %v8068_v0 = vpop.f32.mrb[233].mxu0  ;;  %v4792_v3 = vpop.f32.mrb[66].mxu1 }
 0x2cc   : > { %4845 = vst [vmem:[%s10830_s15 + $0xf8] sm:$0xff] %v8954_v60  ;;  %v8069_v48 = vadd.f32 %v8068_v0, %v8067_v63  ;;  %v8070_v31 = vpop.f32.mrb[234].mxu0  ;;  %v8710_v8 = vpop.f32.mrb[67].mxu1 }
 0x2cd   : > { %v8071_v32 = vpop.f32.mrb[235].mxu0 }
 0x2ce   : > { %v8956_v20 = vadd.f32 %v11597_v46, %v8069_v48  ;;  %v8072_v10 = vadd.f32 %v8071_v32, %v8070_v31 }
 0x2d0   : > { %v8957_v41 = vadd.f32 %v8956_v20, %v4789_v52  ;;  %v8959_v15 = vadd.f32 %v11602_v61, %v8072_v10 }
 0x2d1   : > { %v4797_v50 = vpop.f32.mrb[68].mxu1 }
 0x2d2   : > { %4846 = vst [vmem:[%s10830_s15 + $0x100] sm:$0xff] %v8957_v41  ;;  %v8960_v17 = vadd.f32 %v8959_v15, %v4792_v3  ;;  %v8073_v16 = vpop.f32.mrb[236].mxu0  ;;  %v8713_v18 = vpop.f32.mrb[69].mxu1 }
 0x2d3   : > { %v8074_v11 = vpop.f32.mrb[237].mxu0  ;;  %v4800_v6 = vpop.f32.mrb[70].mxu1 }
 0x2d4   : > { %4847 = vst [vmem:[%s10830_s15 + $0x108] sm:$0xff] %v8960_v17  ;;  %v8075_v21 = vadd.f32 %v8074_v11, %v8073_v16  ;;  %v8076_v25 = vpop.f32.mrb[238].mxu0  ;;  %v8714_v9 = vpop.f32.mrb[71].mxu1 }
 0x2d5   : > { %v8077_v30 = vpop.f32.mrb[239].mxu0 }
 0x2d6   : > { %v8962_v46 = vadd.f32 %v11608_v58, %v8075_v21  ;;  %v8078_v35 = vadd.f32 %v8077_v30, %v8076_v25 }
 0x2d8   : > { %v8963_v24 = vadd.f32 %v8962_v46, %v4797_v50  ;;  %v8965_v61 = vadd.f32 %v11613_v14, %v8078_v35 }
 0x2d9   : > { %v4805_v33 = vpop.f32.mrb[72].mxu1 }
 0x2da   : > { %4848 = vst [vmem:[%s10830_s15 + $0x110] sm:$0xff] %v8963_v24  ;;  %v8966_v36 = vadd.f32 %v8965_v61, %v4800_v6  ;;  %v8079_v37 = vpop.f32.mrb[240].mxu0  ;;  %v8717_v49 = vpop.f32.mrb[73].mxu1 }
 0x2db   : > { %v8080_v38 = vpop.f32.mrb[241].mxu0  ;;  %v4808_v40 = vpop.f32.mrb[74].mxu1 }
 0x2dc   : > { %4849 = vst [vmem:[%s10830_s15 + $0x118] sm:$0xff] %v8966_v36  ;;  %v8081_v29 = vadd.f32 %v8080_v38, %v8079_v37  ;;  %v8082_v39 = vpop.f32.mrb[242].mxu0  ;;  %v8718_v56 = vpop.f32.mrb[75].mxu1 }
 0x2dd   : > { %v8083_v55 = vpop.f32.mrb[243].mxu0 }
 0x2de   : > { %v8968_v58 = vadd.f32 %v11619_v44, %v8081_v29  ;;  %v8084_v26 = vadd.f32 %v8083_v55, %v8082_v39 }
 0x2e0   : > { %v8969_v1 = vadd.f32 %v8968_v58, %v4805_v33  ;;  %v8971_v14 = vadd.f32 %v11624_v34, %v8084_v26 }
 0x2e1   : > { %v4813_v23 = vpop.f32.mrb[76].mxu1 }
 0x2e2   : > { %4850 = vst [vmem:[%s10830_s15 + $0x120] sm:$0xff] %v8969_v1  ;;  %v8972_v47 = vadd.f32 %v8971_v14, %v4808_v40  ;;  %v8085_v13 = vpop.f32.mrb[244].mxu0  ;;  %v8721_v27 = vpop.f32.mrb[77].mxu1 }
 0x2e3   : > { %v8086_v45 = vpop.f32.mrb[245].mxu0  ;;  %v4816_v5 = vpop.f32.mrb[78].mxu1 }
 0x2e4   : > { %4851 = vst [vmem:[%s10830_s15 + $0x128] sm:$0xff] %v8972_v47  ;;  %v8087_v42 = vadd.f32 %v8086_v45, %v8085_v13  ;;  %v8088_v51 = vpop.f32.mrb[246].mxu0  ;;  %v8722_v59 = vpop.f32.mrb[79].mxu1 }
 0x2e5   : > { %v8089_v4 = vpop.f32.mrb[247].mxu0 }
 0x2e6   : > { %v8974_v44 = vadd.f32 %v11630_v12, %v8087_v42  ;;  %v8090_v54 = vadd.f32 %v8089_v4, %v8088_v51 }
 0x2e8   : > { %v8975_v28 = vadd.f32 %v8974_v44, %v4813_v23  ;;  %v8977_v34 = vadd.f32 %v11635_v22, %v8090_v54 }
 0x2e9   : > { %v4821_v62 = vpop.f32.mrb[80].mxu1 }
 0x2ea   : > { %4852 = vst [vmem:[%s10830_s15 + $0x130] sm:$0xff] %v8975_v28  ;;  %v8978_v53 = vadd.f32 %v8977_v34, %v4816_v5  ;;  %v8091_v57 = vpop.f32.mrb[248].mxu0  ;;  %v8725_v19 = vpop.f32.mrb[81].mxu1 }
 0x2eb   : > { %v8092_v52 = vpop.f32.mrb[249].mxu0  ;;  %v4824_v60 = vpop.f32.mrb[82].mxu1 }
 0x2ec   : > { %4853 = vst [vmem:[%s10830_s15 + $0x138] sm:$0xff] %v8978_v53  ;;  %v8093_v63 = vadd.f32 %v8092_v52, %v8091_v57  ;;  %v8094_v2 = vpop.f32.mrb[250].mxu0  ;;  %v8726_v0 = vpop.f32.mrb[83].mxu1 }
 0x2ed   : > { %v8095_v3 = vpop.f32.mrb[251].mxu0 }
 0x2ee   : > { %v8980_v12 = vadd.f32 %v11641_v43, %v8093_v63  ;;  %v8096_v48 = vadd.f32 %v8095_v3, %v8094_v2 }
 0x2f0   : > { %v8981_v31 = vadd.f32 %v8980_v12, %v4821_v62  ;;  %v8983_v22 = vadd.f32 %v11646_v7, %v8096_v48 }
 0x2f2   : > { %4854 = vst [vmem:[%s10830_s15 + $0x140] sm:$0xff] %v8981_v31  ;;  %v8984_v8 = vadd.f32 %v8983_v22, %v4824_v60  ;;  %v8128_v32 = vpop.f32.mrb[252].mxu0 }
 0x2f3   : > { %v8129_v20 = vpop.f32.mrb[253].mxu0 }
 0x2f4   : > { %4855 = vst [vmem:[%s10830_s15 + $0x148] sm:$0xff] %v8984_v8  ;;  %v8130_v10 = vadd.f32 %v8129_v20, %v8128_v32  ;;  %v8131_v41 = vpop.f32.mrb[254].mxu0 }
 0x2f5   : > { %v8132_v15 = vpop.f32.mrb[255].mxu0 }
 0x2f6   : > { %v8133_v50 = vadd.f32 %v8132_v15, %v8131_v41 }
 0x2fa   : > { %v8134_v17 = vpop.f32.mrb[0].mxu0 }
 0x2fb   : > { %v8135_v16 = vpop.f32.mrb[1].mxu0 }
 0x2fc   : > { %v8136_v18 = vadd.f32 %v8135_v16, %v8134_v17  ;;  %v8137_v11 = vpop.f32.mrb[2].mxu0 }
 0x2fd   : > { %v8138_v6 = vpop.f32.mrb[3].mxu0 }
 0x2fe   : > { %v8139_v21 = vadd.f32 %v8138_v6, %v8137_v11 }
 0x302   : > { %v8140_v43 = vpop.f32.mrb[4].mxu0 }
 0x303   : > { %v8141_v25 = vpop.f32.mrb[5].mxu0 }
 0x304   : > { %v8142_v9 = vadd.f32 %v8141_v25, %v8140_v43  ;;  %v8143_v30 = vpop.f32.mrb[6].mxu0 }
 0x305   : > { %v8144_v7 = vpop.f32.mrb[7].mxu0 }
 0x306   : > { %v8145_v46 = vadd.f32 %v8144_v7, %v8143_v30 }
 0x30a   : > { %v8146_v35 = vpop.f32.mrb[8].mxu0 }
 0x30b   : > { %v8147_v24 = vpop.f32.mrb[9].mxu0 }
 0x30c   : > { %v8148_v61 = vadd.f32 %v8147_v24, %v8146_v35  ;;  %v8149_v33 = vpop.f32.mrb[10].mxu0 }
 0x30d   : > { %v8150_v36 = vpop.f32.mrb[11].mxu0 }
 0x30e   : > { %v8151_v37 = vadd.f32 %v8150_v36, %v8149_v33 }
 0x312   : > { %v8152_v49 = vpop.f32.mrb[12].mxu0 }
 0x313   : > { %v8153_v38 = vpop.f32.mrb[13].mxu0 }
 0x314   : > { %v8154_v40 = vadd.f32 %v8153_v38, %v8152_v49  ;;  %v8155_v29 = vpop.f32.mrb[14].mxu0 }
 0x315   : > { %v8156_v39 = vpop.f32.mrb[15].mxu0 }
 0x316   : > { %v8157_v56 = vadd.f32 %v8156_v39, %v8155_v29 }
 0x31a   : > { %v8158_v55 = vpop.f32.mrb[16].mxu0 }
 0x31b   : > { %v8159_v58 = vpop.f32.mrb[17].mxu0 }
 0x31c   : > { %v8160_v26 = vadd.f32 %v8159_v58, %v8158_v55  ;;  %v8161_v1 = vpop.f32.mrb[18].mxu0 }
 0x31d   : > { %v8162_v14 = vpop.f32.mrb[19].mxu0 }
 0x31e   : > { %v8163_v23 = vadd.f32 %v8162_v14, %v8161_v1 }
 0x322   : > { %v8164_v47 = vpop.f32.mrb[20].mxu0 }
 0x323   : > { %v8165_v13 = vpop.f32.mrb[21].mxu0 }
 0x324   : > { %v8166_v27 = vadd.f32 %v8165_v13, %v8164_v47  ;;  %v8167_v45 = vpop.f32.mrb[22].mxu0 }
 0x325   : > { %v8168_v5 = vpop.f32.mrb[23].mxu0 }
 0x326   : > { %v8169_v42 = vadd.f32 %v8168_v5, %v8167_v45 }
 0x32a   : > { %v8201_v51 = vpop.f32.mrb[24].mxu0 }
 0x32b   : > { %v8202_v59 = vpop.f32.mrb[25].mxu0 }
 0x32c   : > { %v8203_v4 = vadd.f32 %v8202_v59, %v8201_v51  ;;  %v8204_v44 = vpop.f32.mrb[26].mxu0 }
 0x32d   : > { %v8205_v54 = vpop.f32.mrb[27].mxu0 }
 0x32e   : > { %v8985_v28 = vadd.f32 %v8203_v4, %v8130_v10  ;;  %v8206_v34 = vadd.f32 %v8205_v54, %v8204_v44 }
 0x330   : > { %v8988_v62 = vadd.f32 %v8206_v34, %v8133_v50 }
 0x332   : > { %v8207_v53 = vpop.f32.mrb[28].mxu0 }
 0x333   : > { %v8208_v57 = vpop.f32.mrb[29].mxu0 }
 0x334   : > { %v8209_v19 = vadd.f32 %v8208_v57, %v8207_v53  ;;  %v8210_v52 = vpop.f32.mrb[30].mxu0 }
 0x335   : > { %v8211_v60 = vpop.f32.mrb[31].mxu0 }
 0x336   : > { %v11678_v63 = vadd.f32 %v8209_v19, %v8136_v18  ;;  %v8212_v2 = vadd.f32 %v8211_v60, %v8210_v52 }
 0x338   : > { %v11680_v0 = vadd.f32 %v8212_v2, %v8139_v21 }
 0x33a   : > { %v8213_v3 = vpop.f32.mrb[32].mxu0 }
 0x33b   : > { %v8214_v12 = vpop.f32.mrb[33].mxu0 }
 0x33c   : > { %v8215_v48 = vadd.f32 %v8214_v12, %v8213_v3  ;;  %v8216_v31 = vpop.f32.mrb[34].mxu0 }
 0x33d   : > { %v8217_v22 = vpop.f32.mrb[35].mxu0 }
 0x33e   : > { %v11682_v8 = vadd.f32 %v8215_v48, %v8142_v9  ;;  %v8218_v32 = vadd.f32 %v8217_v22, %v8216_v31 }
 0x340   : > { %v11684_v20 = vadd.f32 %v8218_v32, %v8145_v46 }
 0x342   : > { %v8219_v10 = vpop.f32.mrb[36].mxu0 }
 0x343   : > { %v8220_v41 = vpop.f32.mrb[37].mxu0 }
 0x344   : > { %v8221_v15 = vadd.f32 %v8220_v41, %v8219_v10  ;;  %v8222_v50 = vpop.f32.mrb[38].mxu0 }
 0x345   : > { %v8223_v17 = vpop.f32.mrb[39].mxu0 }
 0x346   : > { %v11686_v16 = vadd.f32 %v8221_v15, %v8148_v61  ;;  %v8224_v18 = vadd.f32 %v8223_v17, %v8222_v50 }
 0x348   : > { %v11688_v11 = vadd.f32 %v8224_v18, %v8151_v37 }
 0x34a   : > { %v8225_v6 = vpop.f32.mrb[40].mxu0 }
 0x34b   : > { %v8226_v21 = vpop.f32.mrb[41].mxu0 }
 0x34c   : > { %v8227_v43 = vadd.f32 %v8226_v21, %v8225_v6  ;;  %v8228_v25 = vpop.f32.mrb[42].mxu0 }
 0x34d   : > { %v8229_v30 = vpop.f32.mrb[43].mxu0 }
 0x34e   : > { %v11690_v9 = vadd.f32 %v8227_v43, %v8154_v40  ;;  %v8230_v7 = vadd.f32 %v8229_v30, %v8228_v25 }
 0x350   : > { %v11692_v46 = vadd.f32 %v8230_v7, %v8157_v56 }
 0x352   : > { %v8231_v35 = vpop.f32.mrb[44].mxu0 }
 0x353   : > { %v8232_v24 = vpop.f32.mrb[45].mxu0 }
 0x354   : > { %v8233_v33 = vadd.f32 %v8232_v24, %v8231_v35  ;;  %v8234_v36 = vpop.f32.mrb[46].mxu0 }
 0x355   : > { %v8235_v49 = vpop.f32.mrb[47].mxu0 }
 0x356   : > { %v11694_v61 = vadd.f32 %v8233_v33, %v8160_v26  ;;  %v8236_v38 = vadd.f32 %v8235_v49, %v8234_v36 }
 0x358   : > { %v11696_v37 = vadd.f32 %v8236_v38, %v8163_v23 }
 0x35a   : > { %v8237_v29 = vpop.f32.mrb[48].mxu0 }
 0x35b   : > { %v8238_v39 = vpop.f32.mrb[49].mxu0 }
 0x35c   : > { %v8239_v55 = vadd.f32 %v8238_v39, %v8237_v29  ;;  %v8240_v58 = vpop.f32.mrb[50].mxu0 }
 0x35d   : > { %v8241_v1 = vpop.f32.mrb[51].mxu0 }
 0x35e   : > { %v11698_v40 = vadd.f32 %v8239_v55, %v8166_v27  ;;  %v8242_v14 = vadd.f32 %v8241_v1, %v8240_v58 }
 0x360   : > { %v11700_v56 = vadd.f32 %v8242_v14, %v8169_v42 }
 0x361   : > { %v6349_v47 = vpop.f32.mrb[84].mxu1 }
 0x362   : > { %v8274_v13 = vpop.f32.mrb[52].mxu0  ;;  %v8833_v45 = vpop.f32.mrb[85].mxu1 }
 0x363   : > { %v8275_v5 = vpop.f32.mrb[53].mxu0  ;;  %v6352_v26 = vpop.f32.mrb[86].mxu1 }
 0x364   : > { %v8276_v51 = vadd.f32 %v8275_v5, %v8274_v13  ;;  %v8277_v23 = vpop.f32.mrb[54].mxu0  ;;  %v8834_v59 = vpop.f32.mrb[87].mxu1 }
 0x365   : > { %v8278_v4 = vpop.f32.mrb[55].mxu0 }
 0x366   : > { %v8986_v44 = vadd.f32 %v8985_v28, %v8276_v51  ;;  %v8279_v54 = vadd.f32 %v8278_v4, %v8277_v23 }
 0x368   : > { %v8987_v34 = vadd.f32 %v8986_v44, %v6349_v47  ;;  %v8989_v53 = vadd.f32 %v8988_v62, %v8279_v54 }
 0x369   : > { %v6357_v27 = vpop.f32.mrb[88].mxu1 }
 0x36a   : > { %6418 = vst [vmem:[%s10830_s15 + $0x150] sm:$0xff] %v8987_v34  ;;  %v8990_v57 = vadd.f32 %v8989_v53, %v6352_v26  ;;  %v8280_v42 = vpop.f32.mrb[56].mxu0  ;;  %v8837_v19 = vpop.f32.mrb[89].mxu1 }
 0x36b   : > { %v8281_v52 = vpop.f32.mrb[57].mxu0  ;;  %v6360_v60 = vpop.f32.mrb[90].mxu1 }
 0x36c   : > { %6419 = vst [vmem:[%s10830_s15 + $0x158] sm:$0xff] %v8990_v57  ;;  %v8282_v2 = vadd.f32 %v8281_v52, %v8280_v42  ;;  %v8283_v3 = vpop.f32.mrb[58].mxu0  ;;  %v8838_v12 = vpop.f32.mrb[91].mxu1 }
 0x36d   : > { %v8284_v48 = vpop.f32.mrb[59].mxu0 }
 0x36e   : > { %v8992_v31 = vadd.f32 %v11678_v63, %v8282_v2  ;;  %v8285_v28 = vadd.f32 %v8284_v48, %v8283_v3 }
 0x370   : > { %v8993_v22 = vadd.f32 %v8992_v31, %v6357_v27  ;;  %v8995_v62 = vadd.f32 %v11680_v0, %v8285_v28 }
 0x371   : > { %v6365_v32 = vpop.f32.mrb[92].mxu1 }
 0x372   : > { %6420 = vst [vmem:[%s10830_s15 + $0x160] sm:$0xff] %v8993_v22  ;;  %v8996_v10 = vadd.f32 %v8995_v62, %v6360_v60  ;;  %v8286_v41 = vpop.f32.mrb[60].mxu0  ;;  %v8841_v15 = vpop.f32.mrb[93].mxu1 }
 0x373   : > { %v8287_v50 = vpop.f32.mrb[61].mxu0  ;;  %v6368_v17 = vpop.f32.mrb[94].mxu1 }
 0x374   : > { %6421 = vst [vmem:[%s10830_s15 + $0x168] sm:$0xff] %v8996_v10  ;;  %v8288_v18 = vadd.f32 %v8287_v50, %v8286_v41  ;;  %v8289_v6 = vpop.f32.mrb[62].mxu0  ;;  %v8842_v21 = vpop.f32.mrb[95].mxu1 }
 0x375   : > { %v8290_v43 = vpop.f32.mrb[63].mxu0 }
 0x376   : > { %v8998_v63 = vadd.f32 %v11682_v8, %v8288_v18  ;;  %v8291_v25 = vadd.f32 %v8290_v43, %v8289_v6 }
 0x378   : > { %v8999_v30 = vadd.f32 %v8998_v63, %v6365_v32  ;;  %v9001_v0 = vadd.f32 %v11684_v20, %v8291_v25 }
 0x379   : > { %v6373_v7 = vpop.f32.mrb[96].mxu1 }
 0x37a   : > { %6422 = vst [vmem:[%s10830_s15 + $0x170] sm:$0xff] %v8999_v30  ;;  %v9002_v35 = vadd.f32 %v9001_v0, %v6368_v17  ;;  %v8292_v24 = vpop.f32.mrb[64].mxu0  ;;  %v8845_v33 = vpop.f32.mrb[97].mxu1 }
 0x37b   : > { %v8293_v36 = vpop.f32.mrb[65].mxu0  ;;  %v6376_v49 = vpop.f32.mrb[98].mxu1 }
 0x37c   : > { %6423 = vst [vmem:[%s10830_s15 + $0x178] sm:$0xff] %v9002_v35  ;;  %v8294_v38 = vadd.f32 %v8293_v36, %v8292_v24  ;;  %v8295_v29 = vpop.f32.mrb[66].mxu0  ;;  %v8846_v39 = vpop.f32.mrb[99].mxu1 }
 0x37d   : > { %v8296_v55 = vpop.f32.mrb[67].mxu0 }
 0x37e   : > { %v9004_v8 = vadd.f32 %v11686_v16, %v8294_v38  ;;  %v8297_v58 = vadd.f32 %v8296_v55, %v8295_v29 }
 0x380   : > { %v9005_v1 = vadd.f32 %v9004_v8, %v6373_v7  ;;  %v9007_v20 = vadd.f32 %v11688_v11, %v8297_v58 }
 0x381   : > { %v6381_v14 = vpop.f32.mrb[100].mxu1 }
 0x382   : > { %6424 = vst [vmem:[%s10830_s15 + $0x180] sm:$0xff] %v9005_v1  ;;  %v9008_v47 = vadd.f32 %v9007_v20, %v6376_v49  ;;  %v8298_v13 = vpop.f32.mrb[68].mxu0  ;;  %v8849_v45 = vpop.f32.mrb[101].mxu1 }
 0x383   : > { %v8299_v5 = vpop.f32.mrb[69].mxu0  ;;  %v6384_v26 = vpop.f32.mrb[102].mxu1 }
 0x384   : > { %6425 = vst [vmem:[%s10830_s15 + $0x188] sm:$0xff] %v9008_v47  ;;  %v8300_v51 = vadd.f32 %v8299_v5, %v8298_v13  ;;  %v8301_v23 = vpop.f32.mrb[70].mxu0  ;;  %v8850_v59 = vpop.f32.mrb[103].mxu1 }
 0x385   : > { %v8302_v4 = vpop.f32.mrb[71].mxu0 }
 0x386   : > { %v9010_v16 = vadd.f32 %v11690_v9, %v8300_v51  ;;  %v8303_v44 = vadd.f32 %v8302_v4, %v8301_v23 }
 0x388   : > { %v9011_v54 = vadd.f32 %v9010_v16, %v6381_v14  ;;  %v9013_v11 = vadd.f32 %v11692_v46, %v8303_v44 }
 0x389   : > { %v6389_v34 = vpop.f32.mrb[104].mxu1 }
 0x38a   : > { %6426 = vst [vmem:[%s10830_s15 + $0x190] sm:$0xff] %v9011_v54  ;;  %v9014_v53 = vadd.f32 %v9013_v11, %v6384_v26  ;;  %v8304_v27 = vpop.f32.mrb[72].mxu0  ;;  %v8853_v57 = vpop.f32.mrb[105].mxu1 }
 0x38b   : > { %v8305_v42 = vpop.f32.mrb[73].mxu0  ;;  %v6392_v19 = vpop.f32.mrb[106].mxu1 }
 0x38c   : > { %6427 = vst [vmem:[%s10830_s15 + $0x198] sm:$0xff] %v9014_v53  ;;  %v8306_v52 = vadd.f32 %v8305_v42, %v8304_v27  ;;  %v8307_v60 = vpop.f32.mrb[74].mxu0  ;;  %v8854_v2 = vpop.f32.mrb[107].mxu1 }
 0x38d   : > { %v8308_v3 = vpop.f32.mrb[75].mxu0 }
 0x38e   : > { %v9016_v9 = vadd.f32 %v11694_v61, %v8306_v52  ;;  %v8309_v12 = vadd.f32 %v8308_v3, %v8307_v60 }
 0x390   : > { %v9017_v48 = vadd.f32 %v9016_v9, %v6389_v34  ;;  %v9019_v46 = vadd.f32 %v11696_v37, %v8309_v12 }
 0x391   : > { %v6397_v31 = vpop.f32.mrb[108].mxu1 }
 0x392   : > { %6428 = vst [vmem:[%s10830_s15 + $0x1a0] sm:$0xff] %v9017_v48  ;;  %v9020_v28 = vadd.f32 %v9019_v46, %v6392_v19  ;;  %v8310_v22 = vpop.f32.mrb[76].mxu0  ;;  %v8857_v62 = vpop.f32.mrb[109].mxu1 }
 0x393   : > { %v8311_v32 = vpop.f32.mrb[77].mxu0  ;;  %v6400_v10 = vpop.f32.mrb[110].mxu1 }
 0x394   : > { %6429 = vst [vmem:[%s10830_s15 + $0x1a8] sm:$0xff] %v9020_v28  ;;  %v8312_v41 = vadd.f32 %v8311_v32, %v8310_v22  ;;  %v8313_v15 = vpop.f32.mrb[78].mxu0  ;;  %v8858_v50 = vpop.f32.mrb[111].mxu1 }
 0x395   : > { %v8314_v17 = vpop.f32.mrb[79].mxu0 }
 0x396   : > { %v9022_v61 = vadd.f32 %v11698_v40, %v8312_v41  ;;  %v8315_v18 = vadd.f32 %v8314_v17, %v8313_v15 }
 0x398   : > { %v9023_v6 = vadd.f32 %v9022_v61, %v6397_v31  ;;  %v9025_v37 = vadd.f32 %v11700_v56, %v8315_v18 }
 0x39a   : > { %6430 = vst [vmem:[%s10830_s15 + $0x1b0] sm:$0xff] %v9023_v6  ;;  %v9026_v21 = vadd.f32 %v9025_v37, %v6400_v10 }
 0x39c   : > { %6431 = vst [vmem:[%s10830_s15 + $0x1b8] sm:$0xff] %v9026_v21 }
 0x39d PF: > { %s12_s9 = sadd.s32 1, %s9891_s9  }
 0x39e   : > { %p9_p4 = scmp.ge.s32.totalorder %s12_s9, 4  }
 0x3a0   :  { %11 = sbr.rel (!%p9_p4) target bundleno = 1 (0x1), region = 69 }

</bundles_post_ra>
